<compile_context>
chip_gen: v6e
topology: v6e:2x2x1
jax: 0.10.0
libtpu: 0.0.40
codegen_flags: <defaults>
</compile_context>

<pallas_src>
import functools

import jax
import jax.numpy as jnp
from jax.experimental import pallas as pl
from jax.experimental.pallas import tpu as pltpu


def _round_up(x, m):
    return ((x + m - 1) // m) * m


def _softdot_kernel(Dp, TB, h_ref, ctx_ref, mask_ref, w_h_ref, w_oc_ref,
                    htilde_ref, attn_ref, wc_ref):
    """One grid step: TB batch rows.

    h_ref:    (TB, Dp)        streamed activations (stream dtype)
    ctx_ref:  (TB, Sp, Dp)    streamed context (stream dtype)
    mask_ref: (TB, Sp)        int32, nonzero => masked
    w_h_ref:  (Dp, 2Dp)       [W_in^T | Woh^T]  (resident, single-buffered)
    w_oc_ref: (Dp, Dp)        Woc^T             (resident, single-buffered)
    htilde_ref: (TB, Dp)      output
    attn_ref:   (TB, Sp)      output
    wc_ref:     (TB, Dp) f32  VMEM scratch for the weighted contexts
    """
    h = h_ref[...]                                                        # (TB, Dp)

    # Fused h projections: one MXU pass with M=TB -> [target | h @ Woh^T], f32 accumulation.
    hp = jnp.dot(h, w_h_ref[...], preferred_element_type=jnp.float32)     # (TB, 2Dp)
    target = hp[:, :Dp]                                                   # (TB, Dp) f32
    h_out = hp[:, Dp:]                                                    # (TB, Dp) f32

    # Per-row score / softmax / weighted-context (each batch row has its own context,
    # so these contractions are inherently M=1; statically unrolled over the TB rows).
    for b in range(TB):
        ctx_b = ctx_ref[b]                                                # (Sp, Dp)
        t_b = target[b:b + 1, :].astype(ctx_b.dtype)                      # (1, Dp)

        # scores: NT-form contraction over the feature dim. The big (Sp, Dp) tile is the
        # transposed-RHS operand of the MXU (same form as the flash-attention einsum);
        # only the 1-row target would ever need an explicit transpose, and it doesn't.
        s_b = jax.lax.dot_general(
            t_b, ctx_b,
            dimension_numbers=(((1,), (1,)), ((), ())),
            preferred_element_type=jnp.float32)                           # (1, Sp) f32

        # masked_fill with a large finite negative (padded S positions are masked too).
        s_b = jnp.where(mask_ref[b:b + 1, :] != 0, -1e30, s_b)

        # softmax over the sequence axis, in f32, exact reciprocal.
        m_b = jnp.max(s_b, axis=-1, keepdims=True)
        p_b = jnp.exp(s_b - m_b)
        denom = jnp.sum(p_b, axis=-1, keepdims=True)
        a_b = p_b * pl.reciprocal(denom, approx=False)                    # (1, Sp) f32

        attn_ref[b:b + 1, :] = a_b.astype(attn_ref.dtype)

        # weighted context row -- MXU, written into the f32 scratch.
        wc_ref[b:b + 1, :] = jnp.dot(a_b.astype(ctx_b.dtype), ctx_b,
                                     preferred_element_type=jnp.float32)  # (1, Dp)

    # Output projection, batched over the TB rows (no lane-dim concatenate):
    #   h~ = tanh(wc @ Woc^T + h @ Woh^T)  ==  tanh([wc, h] @ W_out^T)
    out = jnp.dot(wc_ref[...].astype(w_oc_ref.dtype), w_oc_ref[...],
                  preferred_element_type=jnp.float32) + h_out             # (TB, Dp) f32
    htilde_ref[...] = jnp.tanh(out).astype(htilde_ref.dtype)


@functools.partial(jax.jit, static_argnames=("stream_dtype", "single_buffer_weights"))
def _soft_dot_attention_impl(h, context, w_in, w_out, mask, stream_dtype,
                             single_buffer_weights):
    B, D = h.shape
    _, S, _ = context.shape
    Dp = _round_up(D, 128)          # lane-dense feature dim
    Sp = _round_up(S, 128)          # lane-dense sequence dim (softmax axis)

    out_dtype = h.dtype
    ctx_dtype = jnp.dtype(stream_dtype) if stream_dtype is not None else jnp.dtype(context.dtype)
    ctx_isize = ctx_dtype.itemsize
    out_isize = jnp.dtype(out_dtype).itemsize

    # ---- batch tile (TB) selection ------------------------------------------------------
    # Minimum TB keeps the (TB, *) sublane tiles legal for packed dtypes (f32:8, bf16:16, 8-bit:32).
    min_tb = {4: 8, 2: 16, 1: 32}.get(ctx_isize, 8)

    weight_bytes = 3 * Dp * Dp * ctx_isize                 # (Dp,2Dp) + (Dp,Dp) resident weights
    weight_buffers = 1 if single_buffer_weights else 2

    def _per_step_bytes(tb):
        return (2 * tb * Sp * Dp * ctx_isize               # context (double-buffered)
                + 2 * tb * Dp * ctx_isize                  # h
                + 2 * tb * Sp * 4                          # int32 mask
                + 2 * tb * Dp * out_isize                  # h_tilde
                + 2 * tb * Sp * out_isize                  # attn
                + tb * Dp * 4)                             # wc scratch

    budget = 48 * 1024 * 1024                              # leaves headroom on v7x's 64 MiB/TC
    TB = min_tb
    for cand in (8, 16, 32):
        if cand < min_tb:
            continue
        fits = weight_buffers * weight_bytes + _per_step_bytes(cand) <= budget
        pad_ok = _round_up(max(B, 1), cand) - B <= max(B // 4, min_tb)
        if fits and pad_ok:
            TB = cand
    Bp = _round_up(max(B, 1), TB)

    vmem_needed = weight_buffers * weight_bytes + _per_step_bytes(TB)
    vmem_limit = int(min(64 * 1024 * 1024, max(vmem_needed + (4 << 20), 16 << 20)))

    # ---- padding / dtype staging (padded rows & cols contribute nothing) -----------------
    h_p = jnp.pad(h, ((0, Bp - B), (0, Dp - D))).astype(ctx_dtype)
    ctx_p = jnp.pad(context, ((0, Bp - B), (0, Sp - S), (0, Dp - D))).astype(ctx_dtype)

    if mask is None:
        mask_i = jnp.zeros((B, S), dtype=jnp.int32)
    else:
        mask_i = mask.astype(jnp.int32)
    mask_p = jnp.pad(mask_i, ((0, Bp - B), (0, Sp - S)), constant_values=1)

    # Pre-transposed weights; h's two projections fused into one (Dp, 2Dp) weight.
    w_in_t = jnp.pad(w_in.T, ((0, Dp - D), (0, Dp - D)))                  # W_in^T
    w_oh_t = jnp.pad(w_out[:, D:].T, ((0, Dp - D), (0, Dp - D)))          # Woh^T (h part)
    w_oc_t = jnp.pad(w_out[:, :D].T, ((0, Dp - D), (0, Dp - D))).astype(ctx_dtype)   # Woc^T
    w_h = jnp.concatenate([w_in_t, w_oh_t], axis=1).astype(ctx_dtype)     # (Dp, 2Dp)

    # ---- specs ----------------------------------------------------------------------------
    grid = (Bp // TB,)
    if single_buffer_weights:
        w_h_spec = pl.BlockSpec((Dp, 2 * Dp), lambda i: (0, 0), pipeline_mode=pl.Buffered(1))
        w_oc_spec = pl.BlockSpec((Dp, Dp), lambda i: (0, 0), pipeline_mode=pl.Buffered(1))
    else:
        w_h_spec = pl.BlockSpec((Dp, 2 * Dp), lambda i: (0, 0))
        w_oc_spec = pl.BlockSpec((Dp, Dp), lambda i: (0, 0))

    in_specs = [
        pl.BlockSpec((TB, Dp), lambda i: (i, 0)),           # h
        pl.BlockSpec((TB, Sp, Dp), lambda i: (i, 0, 0)),    # context (streamed, pipelined)
        pl.BlockSpec((TB, Sp), lambda i: (i, 0)),           # mask
        w_h_spec,                                           # [W_in^T | Woh^T] (resident)
        w_oc_spec,                                          # Woc^T            (resident)
    ]
    out_specs = (
        pl.BlockSpec((TB, Dp), lambda i: (i, 0)),           # h_tilde
        pl.BlockSpec((TB, Sp), lambda i: (i, 0)),           # attn (lane-dense Sp)
    )
    out_shape = (
        jax.ShapeDtypeStruct((Bp, Dp), out_dtype),
        jax.ShapeDtypeStruct((Bp, Sp), out_dtype),
    )

    cost = pl.CostEstimate(
        flops=int(Bp * (4 * Sp * Dp + 6 * Dp * Dp)),
        transcendentals=int(Bp * (Sp + Dp)),
        bytes_accessed=int(Bp * Sp * Dp * ctx_isize + Bp * Dp * ctx_isize + Bp * Sp * 4
                           + 3 * Dp * Dp * ctx_isize + Bp * Dp * out_isize
                           + Bp * Sp * out_isize),
    )

    htilde_p, attn_p = pl.pallas_call(
        functools.partial(_softdot_kernel, Dp, TB),
        grid=grid,
        in_specs=in_specs,
        out_specs=out_specs,
        out_shape=out_shape,
        scratch_shapes=[pltpu.VMEM((TB, Dp), jnp.float32)],
        compiler_params=pltpu.CompilerParams(
            dimension_semantics=("parallel",),
            vmem_limit_bytes=vmem_limit,
        ),
        cost_estimate=cost,
    )(h_p, ctx_p, mask_p, w_h, w_oc_t)

    # Strip batch / feature / sequence padding.
    return htilde_p[:B, :D], attn_p[:B, :S]


def soft_dot_attention(h, context, w_in, w_out, mask=None, stream_dtype=None):
    """Pallas SoftDotAttention forward.

    h:       (B, D)
    context: (B, S, D)
    w_in:    (D, D)   -- linear_in.weight  (PyTorch layout: out_features x in_features)
    w_out:   (D, 2D)  -- linear_out.weight
    mask:    (B, S) bool/int, True/nonzero positions are masked out (or None)
    stream_dtype: optional dtype (e.g. jnp.bfloat16) for streaming context/weights
    returns (h_tilde (B, D), attn (B, S))
    """
    try:
        return _soft_dot_attention_impl(h, context, w_in, w_out, mask,
                                        stream_dtype, True)
    except Exception:
        # Fallback if this jax build rejects pipeline_mode=pl.Buffered(1) on the
        # resident weight BlockSpecs: identical kernel, default (double) buffering.
        return _soft_dot_attention_impl(h, context, w_in, w_out, mask,
                                        stream_dtype, False)


def _reference(h, context, w_in, w_out, mask=None):
    """Pure-JAX reference mirroring the PyTorch module."""
    target = h @ w_in.T                                       # (B, D)
    scores = jnp.einsum('bsd,bd->bs', context, target)        # (B, S)
    if mask is not None:
        scores = jnp.where(mask, -jnp.inf, scores)
    attn = jax.nn.softmax(scores, axis=1)                     # (B, S)
    wc = jnp.einsum('bs,bsd->bd', attn, context)              # (B, D)
    h_tilde = jnp.tanh(jnp.concatenate([wc, h], axis=1) @ w_out.T)
    return h_tilde, attn


if __name__ == "__main__":
    B, S, D = 2, 8, 32

    key = jax.random.PRNGKey(0)
    k_h, k_c, k_win, k_wout, k_m = jax.random.split(key, 5)

    h = jax.random.normal(k_h, (B, D), dtype=jnp.float32)
    context = jax.random.normal(k_c, (B, S, D), dtype=jnp.float32)

    # Deterministic PyTorch-style Linear init: U(-1/sqrt(fan_in), 1/sqrt(fan_in))
    bound_in = 1.0 / (D ** 0.5)
    bound_out = 1.0 / ((2 * D) ** 0.5)
    w_in = jax.random.uniform(k_win, (D, D), minval=-bound_in, maxval=bound_in,
                              dtype=jnp.float32)
    w_out = jax.random.uniform(k_wout, (D, 2 * D), minval=-bound_out, maxval=bound_out,
                               dtype=jnp.float32)

    # Optional mask: mask out the last two positions of batch element 1.
    mask = jnp.zeros((B, S), dtype=jnp.bool_).at[1, -2:].set(True)

    # f32 path (no mask and with mask) checked against the reference.
    for m in (None, mask):
        h_tilde, attn = soft_dot_attention(h, context, w_in, w_out, mask=m)
        jax.block_until_ready((h_tilde, attn))
        h_ref_v, a_ref_v = _reference(h, context, w_in, w_out, mask=m)
        assert jnp.allclose(h_tilde, h_ref_v, atol=2e-3, rtol=2e-3), "h_tilde mismatch"
        assert jnp.allclose(attn, a_ref_v, atol=2e-3, rtol=2e-3), "attn mismatch"

    # bf16-streamed path (context/weights in bf16, f32 accumulation) -- looser tolerance.
    h_tilde_bf, attn_bf = soft_dot_attention(h, context, w_in, w_out, mask=mask,
                                             stream_dtype=jnp.bfloat16)
    jax.block_until_ready((h_tilde_bf, attn_bf))
    h_ref_m, a_ref_m = _reference(h, context, w_in, w_out, mask=mask)
    assert jnp.allclose(h_tilde_bf, h_ref_m, atol=5e-2, rtol=5e-2), "bf16 h_tilde mismatch"
    assert jnp.allclose(attn_bf, a_ref_m, atol=5e-2, rtol=5e-2), "bf16 attn mismatch"

    print("KERNEL_OK")
</pallas_src>

<mosaic_0001>
module attributes {stable_mosaic.version = 11 : i64} {
  func.func @_softdot_kernel(%arg0: i32, %arg1: memref<8x128xf32, #tpu.memory_space<vmem>>, %arg2: memref<8x128x128xf32, #tpu.memory_space<vmem>>, %arg3: memref<8x128xi32, #tpu.memory_space<vmem>>, %arg4: memref<128x256xf32, #tpu.memory_space<vmem>>, %arg5: memref<128x128xf32, #tpu.memory_space<vmem>>, %arg6: memref<8x128xf32, #tpu.memory_space<vmem>>, %arg7: memref<8x128xf32, #tpu.memory_space<vmem>>, %arg8: memref<8x128xf32, #tpu.memory_space<vmem>>) attributes {dimension_semantics = [#tpu.dimension_semantics<parallel>], iteration_bounds = array<i64: 1>, scalar_prefetch = 0 : i64, scratch_operands = 1 : i64, tpu.core_type = #tpu.core_type<tc>, window_params = [{transform_indices = @transform_0, window_bounds = array<i64: 8, 128>}, {transform_indices = @transform_1, window_bounds = array<i64: 8, 128, 128>}, {transform_indices = @transform_2, window_bounds = array<i64: 8, 128>}, {pipeline_mode = #tpu.pipeline_mode<synchronous>, transform_indices = @transform_3, window_bounds = array<i64: 128, 256>}, {pipeline_mode = #tpu.pipeline_mode<synchronous>, transform_indices = @transform_4, window_bounds = array<i64: 128, 128>}, {transform_indices = @transform_5, window_bounds = array<i64: 8, 128>}, {transform_indices = @transform_6, window_bounds = array<i64: 8, 128>}]} {
    %c0 = arith.constant 0 : index
    %c0_0 = arith.constant 0 : index
    %0 = vector.load %arg1[%c0, %c0_0] : memref<8x128xf32, #tpu.memory_space<vmem>>, vector<8x128xf32>
    %c0_1 = arith.constant 0 : index
    %c0_2 = arith.constant 0 : index
    %1 = vector.load %arg4[%c0_1, %c0_2] : memref<128x256xf32, #tpu.memory_space<vmem>>, vector<128x256xf32>
    %cst = arith.constant dense<0.000000e+00> : vector<8x256xf32>
    %2 = tpu.matmul %0, %1, %cst {dimension_numbers = #tpu.dot_dimension_numbers<[1], [0], [0], [1], [0, 0, 1, 1], [], []>} : vector<8x128xf32>, vector<128x256xf32>, vector<8x256xf32> -> vector<8x256xf32>
    %3 = vector.extract_strided_slice %2 {offsets = [0, 0], sizes = [8, 128], strides = [1, 1]} : vector<8x256xf32> to vector<8x128xf32>
    %4 = vector.extract_strided_slice %2 {offsets = [0, 128], sizes = [8, 128], strides = [1, 1]} : vector<8x256xf32> to vector<8x128xf32>
    %c0_3 = arith.constant 0 : index
    %c0_4 = arith.constant 0 : index
    %c0_5 = arith.constant 0 : index
    %5 = vector.load %arg2[%c0_3, %c0_4, %c0_5] : memref<8x128x128xf32, #tpu.memory_space<vmem>>, vector<1x128x128xf32>
    %6 = vector.shape_cast %5 : vector<1x128x128xf32> to vector<128x128xf32>
    %7 = vector.extract_strided_slice %3 {offsets = [0, 0], sizes = [1, 128], strides = [1, 1]} : vector<8x128xf32> to vector<1x128xf32>
    %cst_6 = arith.constant dense<0.000000e+00> : vector<1x128xf32>
    %8 = tpu.matmul %7, %6, %cst_6 {dimension_numbers = #tpu.dot_dimension_numbers<[1], [1], [0], [0], [0, 0, 1, 0], [], []>} : vector<1x128xf32>, vector<128x128xf32>, vector<1x128xf32> -> vector<1x128xf32>
    %c0_7 = arith.constant 0 : index
    %c0_8 = arith.constant 0 : index
    %9 = vector.load %arg3[%c0_7, %c0_8] : memref<8x128xi32, #tpu.memory_space<vmem>>, vector<1x128xi32>
    %c0_i32 = arith.constant 0 : i32
    %10 = vector.broadcast %c0_i32 : i32 to vector<1x128xi32>
    %11 = arith.cmpi ne, %9, %10 : vector<1x128xi32>
    %cst_9 = arith.constant -1.000000e+30 : f32
    %12 = vector.broadcast %cst_9 : f32 to vector<1x128xf32>
    %13 = arith.select %11, %12, %8 : vector<1x128xi1>, vector<1x128xf32>
    %cst_10 = arith.constant dense<0xFF800000> : vector<1xf32>
    %14 = vector.multi_reduction <maximumf>, %13, %cst_10 [1] : vector<1x128xf32> to vector<1xf32>
    %15 = vector.shape_cast %14 : vector<1xf32> to vector<1x1xf32>
    %16 = vector.broadcast %15 : vector<1x1xf32> to vector<1x128xf32>
    %17 = arith.subf %13, %16 : vector<1x128xf32>
    %18 = math.exp %17 : vector<1x128xf32>
    %cst_11 = arith.constant dense<0.000000e+00> : vector<1xf32>
    %19 = vector.multi_reduction <add>, %18, %cst_11 [1] : vector<1x128xf32> to vector<1xf32>
    %20 = vector.shape_cast %19 : vector<1xf32> to vector<1x1xf32>
    %21 = tpu.reciprocal %20 : vector<1x1xf32> -> vector<1x1xf32>
    %22 = vector.broadcast %21 : vector<1x1xf32> to vector<1x128xf32>
    %23 = arith.mulf %18, %22 : vector<1x128xf32>
    %c0_12 = arith.constant 0 : index
    %c0_13 = arith.constant 0 : index
    %24 = vector.load %arg7[%c0_12, %c0_13] : memref<8x128xf32, #tpu.memory_space<vmem>>, vector<1x128xf32>
    tpu.vector_store %arg7[%c0_12, %c0_13], %23 {strides = array<i32>} : memref<8x128xf32, #tpu.memory_space<vmem>>, vector<1x128xf32>,
    %cst_14 = arith.constant dense<0.000000e+00> : vector<1x128xf32>
    %25 = tpu.matmul %23, %6, %cst_14 {dimension_numbers = #tpu.dot_dimension_numbers<[1], [0], [0], [1], [0, 0, 1, 1], [], []>} : vector<1x128xf32>, vector<128x128xf32>, vector<1x128xf32> -> vector<1x128xf32>
    %c0_15 = arith.constant 0 : index
    %c0_16 = arith.constant 0 : index
    %26 = vector.load %arg8[%c0_15, %c0_16] : memref<8x128xf32, #tpu.memory_space<vmem>>, vector<1x128xf32>
    tpu.vector_store %arg8[%c0_15, %c0_16], %25 {strides = array<i32>} : memref<8x128xf32, #tpu.memory_space<vmem>>, vector<1x128xf32>,
    %c1 = arith.constant 1 : index
    %c0_17 = arith.constant 0 : index
    %c0_18 = arith.constant 0 : index
    %27 = vector.load %arg2[%c1, %c0_17, %c0_18] : memref<8x128x128xf32, #tpu.memory_space<vmem>>, vector<1x128x128xf32>
    %28 = vector.shape_cast %27 : vector<1x128x128xf32> to vector<128x128xf32>
    %29 = vector.extract_strided_slice %3 {offsets = [1, 0], sizes = [1, 128], strides = [1, 1]} : vector<8x128xf32> to vector<1x128xf32>
    %cst_19 = arith.constant dense<0.000000e+00> : vector<1x128xf32>
    %30 = tpu.matmul %29, %28, %cst_19 {dimension_numbers = #tpu.dot_dimension_numbers<[1], [1], [0], [0], [0, 0, 1, 0], [], []>} : vector<1x128xf32>, vector<128x128xf32>, vector<1x128xf32> -> vector<1x128xf32>
    %c1_20 = arith.constant 1 : index
    %c0_21 = arith.constant 0 : index
    %31 = vector.load %arg3[%c1_20, %c0_21] : memref<8x128xi32, #tpu.memory_space<vmem>>, vector<1x128xi32>
    %c0_i32_22 = arith.constant 0 : i32
    %32 = vector.broadcast %c0_i32_22 : i32 to vector<1x128xi32>
    %33 = arith.cmpi ne, %31, %32 : vector<1x128xi32>
    %cst_23 = arith.constant -1.000000e+30 : f32
    %34 = vector.broadcast %cst_23 : f32 to vector<1x128xf32>
    %35 = arith.select %33, %34, %30 : vector<1x128xi1>, vector<1x128xf32>
    %cst_24 = arith.constant dense<0xFF800000> : vector<1xf32>
    %36 = vector.multi_reduction <maximumf>, %35, %cst_24 [1] : vector<1x128xf32> to vector<1xf32>
    %37 = vector.shape_cast %36 : vector<1xf32> to vector<1x1xf32>
    %38 = vector.broadcast %37 : vector<1x1xf32> to vector<1x128xf32>
    %39 = arith.subf %35, %38 : vector<1x128xf32>
    %40 = math.exp %39 : vector<1x128xf32>
    %cst_25 = arith.constant dense<0.000000e+00> : vector<1xf32>
    %41 = vector.multi_reduction <add>, %40, %cst_25 [1] : vector<1x128xf32> to vector<1xf32>
    %42 = vector.shape_cast %41 : vector<1xf32> to vector<1x1xf32>
    %43 = tpu.reciprocal %42 : vector<1x1xf32> -> vector<1x1xf32>
    %44 = vector.broadcast %43 : vector<1x1xf32> to vector<1x128xf32>
    %45 = arith.mulf %40, %44 : vector<1x128xf32>
    %c1_26 = arith.constant 1 : index
    %c0_27 = arith.constant 0 : index
    %46 = vector.load %arg7[%c1_26, %c0_27] : memref<8x128xf32, #tpu.memory_space<vmem>>, vector<1x128xf32>
    tpu.vector_store %arg7[%c1_26, %c0_27], %45 {strides = array<i32>} : memref<8x128xf32, #tpu.memory_space<vmem>>, vector<1x128xf32>,
    %cst_28 = arith.constant dense<0.000000e+00> : vector<1x128xf32>
    %47 = tpu.matmul %45, %28, %cst_28 {dimension_numbers = #tpu.dot_dimension_numbers<[1], [0], [0], [1], [0, 0, 1, 1], [], []>} : vector<1x128xf32>, vector<128x128xf32>, vector<1x128xf32> -> vector<1x128xf32>
    %c1_29 = arith.constant 1 : index
    %c0_30 = arith.constant 0 : index
    %48 = vector.load %arg8[%c1_29, %c0_30] : memref<8x128xf32, #tpu.memory_space<vmem>>, vector<1x128xf32>
    tpu.vector_store %arg8[%c1_29, %c0_30], %47 {strides = array<i32>} : memref<8x128xf32, #tpu.memory_space<vmem>>, vector<1x128xf32>,
    %c2 = arith.constant 2 : index
    %c0_31 = arith.constant 0 : index
    %c0_32 = arith.constant 0 : index
    %49 = vector.load %arg2[%c2, %c0_31, %c0_32] : memref<8x128x128xf32, #tpu.memory_space<vmem>>, vector<1x128x128xf32>
    %50 = vector.shape_cast %49 : vector<1x128x128xf32> to vector<128x128xf32>
    %51 = vector.extract_strided_slice %3 {offsets = [2, 0], sizes = [1, 128], strides = [1, 1]} : vector<8x128xf32> to vector<1x128xf32>
    %cst_33 = arith.constant dense<0.000000e+00> : vector<1x128xf32>
    %52 = tpu.matmul %51, %50, %cst_33 {dimension_numbers = #tpu.dot_dimension_numbers<[1], [1], [0], [0], [0, 0, 1, 0], [], []>} : vector<1x128xf32>, vector<128x128xf32>, vector<1x128xf32> -> vector<1x128xf32>
    %c2_34 = arith.constant 2 : index
    %c0_35 = arith.constant 0 : index
    %53 = vector.load %arg3[%c2_34, %c0_35] : memref<8x128xi32, #tpu.memory_space<vmem>>, vector<1x128xi32>
    %c0_i32_36 = arith.constant 0 : i32
    %54 = vector.broadcast %c0_i32_36 : i32 to vector<1x128xi32>
    %55 = arith.cmpi ne, %53, %54 : vector<1x128xi32>
    %cst_37 = arith.constant -1.000000e+30 : f32
    %56 = vector.broadcast %cst_37 : f32 to vector<1x128xf32>
    %57 = arith.select %55, %56, %52 : vector<1x128xi1>, vector<1x128xf32>
    %cst_38 = arith.constant dense<0xFF800000> : vector<1xf32>
    %58 = vector.multi_reduction <maximumf>, %57, %cst_38 [1] : vector<1x128xf32> to vector<1xf32>
    %59 = vector.shape_cast %58 : vector<1xf32> to vector<1x1xf32>
    %60 = vector.broadcast %59 : vector<1x1xf32> to vector<1x128xf32>
    %61 = arith.subf %57, %60 : vector<1x128xf32>
    %62 = math.exp %61 : vector<1x128xf32>
    %cst_39 = arith.constant dense<0.000000e+00> : vector<1xf32>
    %63 = vector.multi_reduction <add>, %62, %cst_39 [1] : vector<1x128xf32> to vector<1xf32>
    %64 = vector.shape_cast %63 : vector<1xf32> to vector<1x1xf32>
    %65 = tpu.reciprocal %64 : vector<1x1xf32> -> vector<1x1xf32>
    %66 = vector.broadcast %65 : vector<1x1xf32> to vector<1x128xf32>
    %67 = arith.mulf %62, %66 : vector<1x128xf32>
    %c2_40 = arith.constant 2 : index
    %c0_41 = arith.constant 0 : index
    %68 = vector.load %arg7[%c2_40, %c0_41] : memref<8x128xf32, #tpu.memory_space<vmem>>, vector<1x128xf32>
    tpu.vector_store %arg7[%c2_40, %c0_41], %67 {strides = array<i32>} : memref<8x128xf32, #tpu.memory_space<vmem>>, vector<1x128xf32>,
    %cst_42 = arith.constant dense<0.000000e+00> : vector<1x128xf32>
    %69 = tpu.matmul %67, %50, %cst_42 {dimension_numbers = #tpu.dot_dimension_numbers<[1], [0], [0], [1], [0, 0, 1, 1], [], []>} : vector<1x128xf32>, vector<128x128xf32>, vector<1x128xf32> -> vector<1x128xf32>
    %c2_43 = arith.constant 2 : index
    %c0_44 = arith.constant 0 : index
    %70 = vector.load %arg8[%c2_43, %c0_44] : memref<8x128xf32, #tpu.memory_space<vmem>>, vector<1x128xf32>
    tpu.vector_store %arg8[%c2_43, %c0_44], %69 {strides = array<i32>} : memref<8x128xf32, #tpu.memory_space<vmem>>, vector<1x128xf32>,
    %c3 = arith.constant 3 : index
    %c0_45 = arith.constant 0 : index
    %c0_46 = arith.constant 0 : index
    %71 = vector.load %arg2[%c3, %c0_45, %c0_46] : memref<8x128x128xf32, #tpu.memory_space<vmem>>, vector<1x128x128xf32>
    %72 = vector.shape_cast %71 : vector<1x128x128xf32> to vector<128x128xf32>
    %73 = vector.extract_strided_slice %3 {offsets = [3, 0], sizes = [1, 128], strides = [1, 1]} : vector<8x128xf32> to vector<1x128xf32>
    %cst_47 = arith.constant dense<0.000000e+00> : vector<1x128xf32>
    %74 = tpu.matmul %73, %72, %cst_47 {dimension_numbers = #tpu.dot_dimension_numbers<[1], [1], [0], [0], [0, 0, 1, 0], [], []>} : vector<1x128xf32>, vector<128x128xf32>, vector<1x128xf32> -> vector<1x128xf32>
    %c3_48 = arith.constant 3 : index
    %c0_49 = arith.constant 0 : index
    %75 = vector.load %arg3[%c3_48, %c0_49] : memref<8x128xi32, #tpu.memory_space<vmem>>, vector<1x128xi32>
    %c0_i32_50 = arith.constant 0 : i32
    %76 = vector.broadcast %c0_i32_50 : i32 to vector<1x128xi32>
    %77 = arith.cmpi ne, %75, %76 : vector<1x128xi32>
    %cst_51 = arith.constant -1.000000e+30 : f32
    %78 = vector.broadcast %cst_51 : f32 to vector<1x128xf32>
    %79 = arith.select %77, %78, %74 : vector<1x128xi1>, vector<1x128xf32>
    %cst_52 = arith.constant dense<0xFF800000> : vector<1xf32>
    %80 = vector.multi_reduction <maximumf>, %79, %cst_52 [1] : vector<1x128xf32> to vector<1xf32>
    %81 = vector.shape_cast %80 : vector<1xf32> to vector<1x1xf32>
    %82 = vector.broadcast %81 : vector<1x1xf32> to vector<1x128xf32>
    %83 = arith.subf %79, %82 : vector<1x128xf32>
    %84 = math.exp %83 : vector<1x128xf32>
    %cst_53 = arith.constant dense<0.000000e+00> : vector<1xf32>
    %85 = vector.multi_reduction <add>, %84, %cst_53 [1] : vector<1x128xf32> to vector<1xf32>
    %86 = vector.shape_cast %85 : vector<1xf32> to vector<1x1xf32>
    %87 = tpu.reciprocal %86 : vector<1x1xf32> -> vector<1x1xf32>
    %88 = vector.broadcast %87 : vector<1x1xf32> to vector<1x128xf32>
    %89 = arith.mulf %84, %88 : vector<1x128xf32>
    %c3_54 = arith.constant 3 : index
    %c0_55 = arith.constant 0 : index
    %90 = vector.load %arg7[%c3_54, %c0_55] : memref<8x128xf32, #tpu.memory_space<vmem>>, vector<1x128xf32>
    tpu.vector_store %arg7[%c3_54, %c0_55], %89 {strides = array<i32>} : memref<8x128xf32, #tpu.memory_space<vmem>>, vector<1x128xf32>,
    %cst_56 = arith.constant dense<0.000000e+00> : vector<1x128xf32>
    %91 = tpu.matmul %89, %72, %cst_56 {dimension_numbers = #tpu.dot_dimension_numbers<[1], [0], [0], [1], [0, 0, 1, 1], [], []>} : vector<1x128xf32>, vector<128x128xf32>, vector<1x128xf32> -> vector<1x128xf32>
    %c3_57 = arith.constant 3 : index
    %c0_58 = arith.constant 0 : index
    %92 = vector.load %arg8[%c3_57, %c0_58] : memref<8x128xf32, #tpu.memory_space<vmem>>, vector<1x128xf32>
    tpu.vector_store %arg8[%c3_57, %c0_58], %91 {strides = array<i32>} : memref<8x128xf32, #tpu.memory_space<vmem>>, vector<1x128xf32>,
    %c4 = arith.constant 4 : index
    %c0_59 = arith.constant 0 : index
    %c0_60 = arith.constant 0 : index
    %93 = vector.load %arg2[%c4, %c0_59, %c0_60] : memref<8x128x128xf32, #tpu.memory_space<vmem>>, vector<1x128x128xf32>
    %94 = vector.shape_cast %93 : vector<1x128x128xf32> to vector<128x128xf32>
    %95 = vector.extract_strided_slice %3 {offsets = [4, 0], sizes = [1, 128], strides = [1, 1]} : vector<8x128xf32> to vector<1x128xf32>
    %cst_61 = arith.constant dense<0.000000e+00> : vector<1x128xf32>
    %96 = tpu.matmul %95, %94, %cst_61 {dimension_numbers = #tpu.dot_dimension_numbers<[1], [1], [0], [0], [0, 0, 1, 0], [], []>} : vector<1x128xf32>, vector<128x128xf32>, vector<1x128xf32> -> vector<1x128xf32>
    %c4_62 = arith.constant 4 : index
    %c0_63 = arith.constant 0 : index
    %97 = vector.load %arg3[%c4_62, %c0_63] : memref<8x128xi32, #tpu.memory_space<vmem>>, vector<1x128xi32>
    %c0_i32_64 = arith.constant 0 : i32
    %98 = vector.broadcast %c0_i32_64 : i32 to vector<1x128xi32>
    %99 = arith.cmpi ne, %97, %98 : vector<1x128xi32>
    %cst_65 = arith.constant -1.000000e+30 : f32
    %100 = vector.broadcast %cst_65 : f32 to vector<1x128xf32>
    %101 = arith.select %99, %100, %96 : vector<1x128xi1>, vector<1x128xf32>
    %cst_66 = arith.constant dense<0xFF800000> : vector<1xf32>
    %102 = vector.multi_reduction <maximumf>, %101, %cst_66 [1] : vector<1x128xf32> to vector<1xf32>
    %103 = vector.shape_cast %102 : vector<1xf32> to vector<1x1xf32>
    %104 = vector.broadcast %103 : vector<1x1xf32> to vector<1x128xf32>
    %105 = arith.subf %101, %104 : vector<1x128xf32>
    %106 = math.exp %105 : vector<1x128xf32>
    %cst_67 = arith.constant dense<0.000000e+00> : vector<1xf32>
    %107 = vector.multi_reduction <add>, %106, %cst_67 [1] : vector<1x128xf32> to vector<1xf32>
    %108 = vector.shape_cast %107 : vector<1xf32> to vector<1x1xf32>
    %109 = tpu.reciprocal %108 : vector<1x1xf32> -> vector<1x1xf32>
    %110 = vector.broadcast %109 : vector<1x1xf32> to vector<1x128xf32>
    %111 = arith.mulf %106, %110 : vector<1x128xf32>
    %c4_68 = arith.constant 4 : index
    %c0_69 = arith.constant 0 : index
    %112 = vector.load %arg7[%c4_68, %c0_69] : memref<8x128xf32, #tpu.memory_space<vmem>>, vector<1x128xf32>
    tpu.vector_store %arg7[%c4_68, %c0_69], %111 {strides = array<i32>} : memref<8x128xf32, #tpu.memory_space<vmem>>, vector<1x128xf32>,
    %cst_70 = arith.constant dense<0.000000e+00> : vector<1x128xf32>
    %113 = tpu.matmul %111, %94, %cst_70 {dimension_numbers = #tpu.dot_dimension_numbers<[1], [0], [0], [1], [0, 0, 1, 1], [], []>} : vector<1x128xf32>, vector<128x128xf32>, vector<1x128xf32> -> vector<1x128xf32>
    %c4_71 = arith.constant 4 : index
    %c0_72 = arith.constant 0 : index
    %114 = vector.load %arg8[%c4_71, %c0_72] : memref<8x128xf32, #tpu.memory_space<vmem>>, vector<1x128xf32>
    tpu.vector_store %arg8[%c4_71, %c0_72], %113 {strides = array<i32>} : memref<8x128xf32, #tpu.memory_space<vmem>>, vector<1x128xf32>,
    %c5 = arith.constant 5 : index
    %c0_73 = arith.constant 0 : index
    %c0_74 = arith.constant 0 : index
    %115 = vector.load %arg2[%c5, %c0_73, %c0_74] : memref<8x128x128xf32, #tpu.memory_space<vmem>>, vector<1x128x128xf32>
    %116 = vector.shape_cast %115 : vector<1x128x128xf32> to vector<128x128xf32>
    %117 = vector.extract_strided_slice %3 {offsets = [5, 0], sizes = [1, 128], strides = [1, 1]} : vector<8x128xf32> to vector<1x128xf32>
    %cst_75 = arith.constant dense<0.000000e+00> : vector<1x128xf32>
    %118 = tpu.matmul %117, %116, %cst_75 {dimension_numbers = #tpu.dot_dimension_numbers<[1], [1], [0], [0], [0, 0, 1, 0], [], []>} : vector<1x128xf32>, vector<128x128xf32>, vector<1x128xf32> -> vector<1x128xf32>
    %c5_76 = arith.constant 5 : index
    %c0_77 = arith.constant 0 : index
    %119 = vector.load %arg3[%c5_76, %c0_77] : memref<8x128xi32, #tpu.memory_space<vmem>>, vector<1x128xi32>
    %c0_i32_78 = arith.constant 0 : i32
    %120 = vector.broadcast %c0_i32_78 : i32 to vector<1x128xi32>
    %121 = arith.cmpi ne, %119, %120 : vector<1x128xi32>
    %cst_79 = arith.constant -1.000000e+30 : f32
    %122 = vector.broadcast %cst_79 : f32 to vector<1x128xf32>
    %123 = arith.select %121, %122, %118 : vector<1x128xi1>, vector<1x128xf32>
    %cst_80 = arith.constant dense<0xFF800000> : vector<1xf32>
    %124 = vector.multi_reduction <maximumf>, %123, %cst_80 [1] : vector<1x128xf32> to vector<1xf32>
    %125 = vector.shape_cast %124 : vector<1xf32> to vector<1x1xf32>
    %126 = vector.broadcast %125 : vector<1x1xf32> to vector<1x128xf32>
    %127 = arith.subf %123, %126 : vector<1x128xf32>
    %128 = math.exp %127 : vector<1x128xf32>
    %cst_81 = arith.constant dense<0.000000e+00> : vector<1xf32>
    %129 = vector.multi_reduction <add>, %128, %cst_81 [1] : vector<1x128xf32> to vector<1xf32>
    %130 = vector.shape_cast %129 : vector<1xf32> to vector<1x1xf32>
    %131 = tpu.reciprocal %130 : vector<1x1xf32> -> vector<1x1xf32>
    %132 = vector.broadcast %131 : vector<1x1xf32> to vector<1x128xf32>
    %133 = arith.mulf %128, %132 : vector<1x128xf32>
    %c5_82 = arith.constant 5 : index
    %c0_83 = arith.constant 0 : index
    %134 = vector.load %arg7[%c5_82, %c0_83] : memref<8x128xf32, #tpu.memory_space<vmem>>, vector<1x128xf32>
    tpu.vector_store %arg7[%c5_82, %c0_83], %133 {strides = array<i32>} : memref<8x128xf32, #tpu.memory_space<vmem>>, vector<1x128xf32>,
    %cst_84 = arith.constant dense<0.000000e+00> : vector<1x128xf32>
    %135 = tpu.matmul %133, %116, %cst_84 {dimension_numbers = #tpu.dot_dimension_numbers<[1], [0], [0], [1], [0, 0, 1, 1], [], []>} : vector<1x128xf32>, vector<128x128xf32>, vector<1x128xf32> -> vector<1x128xf32>
    %c5_85 = arith.constant 5 : index
    %c0_86 = arith.constant 0 : index
    %136 = vector.load %arg8[%c5_85, %c0_86] : memref<8x128xf32, #tpu.memory_space<vmem>>, vector<1x128xf32>
    tpu.vector_store %arg8[%c5_85, %c0_86], %135 {strides = array<i32>} : memref<8x128xf32, #tpu.memory_space<vmem>>, vector<1x128xf32>,
    %c6 = arith.constant 6 : index
    %c0_87 = arith.constant 0 : index
    %c0_88 = arith.constant 0 : index
    %137 = vector.load %arg2[%c6, %c0_87, %c0_88] : memref<8x128x128xf32, #tpu.memory_space<vmem>>, vector<1x128x128xf32>
    %138 = vector.shape_cast %137 : vector<1x128x128xf32> to vector<128x128xf32>
    %139 = vector.extract_strided_slice %3 {offsets = [6, 0], sizes = [1, 128], strides = [1, 1]} : vector<8x128xf32> to vector<1x128xf32>
    %cst_89 = arith.constant dense<0.000000e+00> : vector<1x128xf32>
    %140 = tpu.matmul %139, %138, %cst_89 {dimension_numbers = #tpu.dot_dimension_numbers<[1], [1], [0], [0], [0, 0, 1, 0], [], []>} : vector<1x128xf32>, vector<128x128xf32>, vector<1x128xf32> -> vector<1x128xf32>
    %c6_90 = arith.constant 6 : index
    %c0_91 = arith.constant 0 : index
    %141 = vector.load %arg3[%c6_90, %c0_91] : memref<8x128xi32, #tpu.memory_space<vmem>>, vector<1x128xi32>
    %c0_i32_92 = arith.constant 0 : i32
    %142 = vector.broadcast %c0_i32_92 : i32 to vector<1x128xi32>
    %143 = arith.cmpi ne, %141, %142 : vector<1x128xi32>
    %cst_93 = arith.constant -1.000000e+30 : f32
    %144 = vector.broadcast %cst_93 : f32 to vector<1x128xf32>
    %145 = arith.select %143, %144, %140 : vector<1x128xi1>, vector<1x128xf32>
    %cst_94 = arith.constant dense<0xFF800000> : vector<1xf32>
    %146 = vector.multi_reduction <maximumf>, %145, %cst_94 [1] : vector<1x128xf32> to vector<1xf32>
    %147 = vector.shape_cast %146 : vector<1xf32> to vector<1x1xf32>
    %148 = vector.broadcast %147 : vector<1x1xf32> to vector<1x128xf32>
    %149 = arith.subf %145, %148 : vector<1x128xf32>
    %150 = math.exp %149 : vector<1x128xf32>
    %cst_95 = arith.constant dense<0.000000e+00> : vector<1xf32>
    %151 = vector.multi_reduction <add>, %150, %cst_95 [1] : vector<1x128xf32> to vector<1xf32>
    %152 = vector.shape_cast %151 : vector<1xf32> to vector<1x1xf32>
    %153 = tpu.reciprocal %152 : vector<1x1xf32> -> vector<1x1xf32>
    %154 = vector.broadcast %153 : vector<1x1xf32> to vector<1x128xf32>
    %155 = arith.mulf %150, %154 : vector<1x128xf32>
    %c6_96 = arith.constant 6 : index
    %c0_97 = arith.constant 0 : index
    %156 = vector.load %arg7[%c6_96, %c0_97] : memref<8x128xf32, #tpu.memory_space<vmem>>, vector<1x128xf32>
    tpu.vector_store %arg7[%c6_96, %c0_97], %155 {strides = array<i32>} : memref<8x128xf32, #tpu.memory_space<vmem>>, vector<1x128xf32>,
    %cst_98 = arith.constant dense<0.000000e+00> : vector<1x128xf32>
    %157 = tpu.matmul %155, %138, %cst_98 {dimension_numbers = #tpu.dot_dimension_numbers<[1], [0], [0], [1], [0, 0, 1, 1], [], []>} : vector<1x128xf32>, vector<128x128xf32>, vector<1x128xf32> -> vector<1x128xf32>
    %c6_99 = arith.constant 6 : index
    %c0_100 = arith.constant 0 : index
    %158 = vector.load %arg8[%c6_99, %c0_100] : memref<8x128xf32, #tpu.memory_space<vmem>>, vector<1x128xf32>
    tpu.vector_store %arg8[%c6_99, %c0_100], %157 {strides = array<i32>} : memref<8x128xf32, #tpu.memory_space<vmem>>, vector<1x128xf32>,
    %c7 = arith.constant 7 : index
    %c0_101 = arith.constant 0 : index
    %c0_102 = arith.constant 0 : index
    %159 = vector.load %arg2[%c7, %c0_101, %c0_102] : memref<8x128x128xf32, #tpu.memory_space<vmem>>, vector<1x128x128xf32>
    %160 = vector.shape_cast %159 : vector<1x128x128xf32> to vector<128x128xf32>
    %161 = vector.extract_strided_slice %3 {offsets = [7, 0], sizes = [1, 128], strides = [1, 1]} : vector<8x128xf32> to vector<1x128xf32>
    %cst_103 = arith.constant dense<0.000000e+00> : vector<1x128xf32>
    %162 = tpu.matmul %161, %160, %cst_103 {dimension_numbers = #tpu.dot_dimension_numbers<[1], [1], [0], [0], [0, 0, 1, 0], [], []>} : vector<1x128xf32>, vector<128x128xf32>, vector<1x128xf32> -> vector<1x128xf32>
    %c7_104 = arith.constant 7 : index
    %c0_105 = arith.constant 0 : index
    %163 = vector.load %arg3[%c7_104, %c0_105] : memref<8x128xi32, #tpu.memory_space<vmem>>, vector<1x128xi32>
    %c0_i32_106 = arith.constant 0 : i32
    %164 = vector.broadcast %c0_i32_106 : i32 to vector<1x128xi32>
    %165 = arith.cmpi ne, %163, %164 : vector<1x128xi32>
    %cst_107 = arith.constant -1.000000e+30 : f32
    %166 = vector.broadcast %cst_107 : f32 to vector<1x128xf32>
    %167 = arith.select %165, %166, %162 : vector<1x128xi1>, vector<1x128xf32>
    %cst_108 = arith.constant dense<0xFF800000> : vector<1xf32>
    %168 = vector.multi_reduction <maximumf>, %167, %cst_108 [1] : vector<1x128xf32> to vector<1xf32>
    %169 = vector.shape_cast %168 : vector<1xf32> to vector<1x1xf32>
    %170 = vector.broadcast %169 : vector<1x1xf32> to vector<1x128xf32>
    %171 = arith.subf %167, %170 : vector<1x128xf32>
    %172 = math.exp %171 : vector<1x128xf32>
    %cst_109 = arith.constant dense<0.000000e+00> : vector<1xf32>
    %173 = vector.multi_reduction <add>, %172, %cst_109 [1] : vector<1x128xf32> to vector<1xf32>
    %174 = vector.shape_cast %173 : vector<1xf32> to vector<1x1xf32>
    %175 = tpu.reciprocal %174 : vector<1x1xf32> -> vector<1x1xf32>
    %176 = vector.broadcast %175 : vector<1x1xf32> to vector<1x128xf32>
    %177 = arith.mulf %172, %176 : vector<1x128xf32>
    %c7_110 = arith.constant 7 : index
    %c0_111 = arith.constant 0 : index
    %178 = vector.load %arg7[%c7_110, %c0_111] : memref<8x128xf32, #tpu.memory_space<vmem>>, vector<1x128xf32>
    tpu.vector_store %arg7[%c7_110, %c0_111], %177 {strides = array<i32>} : memref<8x128xf32, #tpu.memory_space<vmem>>, vector<1x128xf32>,
    %cst_112 = arith.constant dense<0.000000e+00> : vector<1x128xf32>
    %179 = tpu.matmul %177, %160, %cst_112 {dimension_numbers = #tpu.dot_dimension_numbers<[1], [0], [0], [1], [0, 0, 1, 1], [], []>} : vector<1x128xf32>, vector<128x128xf32>, vector<1x128xf32> -> vector<1x128xf32>
    %c7_113 = arith.constant 7 : index
    %c0_114 = arith.constant 0 : index
    %180 = vector.load %arg8[%c7_113, %c0_114] : memref<8x128xf32, #tpu.memory_space<vmem>>, vector<1x128xf32>
    tpu.vector_store %arg8[%c7_113, %c0_114], %179 {strides = array<i32>} : memref<8x128xf32, #tpu.memory_space<vmem>>, vector<1x128xf32>,
    %c0_115 = arith.constant 0 : index
    %c0_116 = arith.constant 0 : index
    %181 = vector.load %arg8[%c0_115, %c0_116] : memref<8x128xf32, #tpu.memory_space<vmem>>, vector<8x128xf32>
    %c0_117 = arith.constant 0 : index
    %c0_118 = arith.constant 0 : index
    %182 = vector.load %arg5[%c0_117, %c0_118] : memref<128x128xf32, #tpu.memory_space<vmem>>, vector<128x128xf32>
    %cst_119 = arith.constant dense<0.000000e+00> : vector<8x128xf32>
    %183 = tpu.matmul %181, %182, %cst_119 {dimension_numbers = #tpu.dot_dimension_numbers<[1], [0], [0], [1], [0, 0, 1, 1], [], []>} : vector<8x128xf32>, vector<128x128xf32>, vector<8x128xf32> -> vector<8x128xf32>
    %184 = arith.addf %183, %4 : vector<8x128xf32>
    %185 = math.tanh %184 : vector<8x128xf32>
    %c0_120 = arith.constant 0 : index
    %c0_121 = arith.constant 0 : index
    %186 = vector.load %arg6[%c0_120, %c0_121] : memref<8x128xf32, #tpu.memory_space<vmem>>, vector<8x128xf32>
    tpu.vector_store %arg6[%c0_120, %c0_121], %185 {strides = array<i32>} : memref<8x128xf32, #tpu.memory_space<vmem>>, vector<8x128xf32>,
    return
  }
  func.func @transform_0(%arg0: i32) -> (i32, i32) {
    %c0_i32 = arith.constant 0 : i32
    %c0_i32_0 = arith.constant 0 : i32
    return %arg0, %c0_i32 : i32, i32
  }
  func.func @transform_1(%arg0: i32) -> (i32, i32, i32) {
    %c0_i32 = arith.constant 0 : i32
    %c0_i32_0 = arith.constant 0 : i32
    %c0_i32_1 = arith.constant 0 : i32
    return %arg0, %c0_i32, %c0_i32_0 : i32, i32, i32
  }
  func.func @transform_2(%arg0: i32) -> (i32, i32) {
    %c0_i32 = arith.constant 0 : i32
    %c0_i32_0 = arith.constant 0 : i32
    return %arg0, %c0_i32 : i32, i32
  }
  func.func @transform_3(%arg0: i32) -> (i32, i32) {
    %c0_i32 = arith.constant 0 : i32
    %c0_i32_0 = arith.constant 0 : i32
    %c0_i32_1 = arith.constant 0 : i32
    return %c0_i32, %c0_i32_0 : i32, i32
  }
  func.func @transform_4(%arg0: i32) -> (i32, i32) {
    %c0_i32 = arith.constant 0 : i32
    %c0_i32_0 = arith.constant 0 : i32
    %c0_i32_1 = arith.constant 0 : i32
    return %c0_i32, %c0_i32_0 : i32, i32
  }
  func.func @transform_5(%arg0: i32) -> (i32, i32) {
    %c0_i32 = arith.constant 0 : i32
    %c0_i32_0 = arith.constant 0 : i32
    return %arg0, %c0_i32 : i32, i32
  }
  func.func @transform_6(%arg0: i32) -> (i32, i32) {
    %c0_i32 = arith.constant 0 : i32
    %c0_i32_0 = arith.constant 0 : i32
    return %arg0, %c0_i32 : i32, i32
  }
}

module attributes {stable_mosaic.version = 11 : i64} {
  func.func @_softdot_kernel(%arg0: i32, %arg1: memref<8x128xf32, #tpu.memory_space<vmem>>, %arg2: memref<8x128x128xf32, #tpu.memory_space<vmem>>, %arg3: memref<8x128xi32, #tpu.memory_space<vmem>>, %arg4: memref<128x256xf32, #tpu.memory_space<vmem>>, %arg5: memref<128x128xf32, #tpu.memory_space<vmem>>, %arg6: memref<8x128xf32, #tpu.memory_space<vmem>>, %arg7: memref<8x128xf32, #tpu.memory_space<vmem>>, %arg8: memref<8x128xf32, #tpu.memory_space<vmem>>) attributes {dimension_semantics = [#tpu.dimension_semantics<parallel>], iteration_bounds = array<i64: 1>, scalar_prefetch = 0 : i64, scratch_operands = 1 : i64, tpu.core_type = #tpu.core_type<tc>, window_params = [{transform_indices = @transform_0, window_bounds = array<i64: 8, 128>}, {transform_indices = @transform_1, window_bounds = array<i64: 8, 128, 128>}, {transform_indices = @transform_2, window_bounds = array<i64: 8, 128>}, {pipeline_mode = #tpu.pipeline_mode<synchronous>, transform_indices = @transform_3, window_bounds = array<i64: 128, 256>}, {pipeline_mode = #tpu.pipeline_mode<synchronous>, transform_indices = @transform_4, window_bounds = array<i64: 128, 128>}, {transform_indices = @transform_5, window_bounds = array<i64: 8, 128>}, {transform_indices = @transform_6, window_bounds = array<i64: 8, 128>}]} {
    %c0 = arith.constant 0 : index
    %c0_0 = arith.constant 0 : index
    %0 = vector.load %arg1[%c0, %c0_0] : memref<8x128xf32, #tpu.memory_space<vmem>>, vector<8x128xf32>
    %c0_1 = arith.constant 0 : index
    %c0_2 = arith.constant 0 : index
    %1 = vector.load %arg4[%c0_1, %c0_2] : memref<128x256xf32, #tpu.memory_space<vmem>>, vector<128x256xf32>
    %cst = arith.constant dense<0.000000e+00> : vector<8x256xf32>
    %2 = tpu.matmul %0, %1, %cst {dimension_numbers = #tpu.dot_dimension_numbers<[1], [0], [0], [1], [0, 0, 1, 1], [], []>} : vector<8x128xf32>, vector<128x256xf32>, vector<8x256xf32> -> vector<8x256xf32>
    %3 = vector.extract_strided_slice %2 {offsets = [0, 0], sizes = [8, 128], strides = [1, 1]} : vector<8x256xf32> to vector<8x128xf32>
    %4 = vector.extract_strided_slice %2 {offsets = [0, 128], sizes = [8, 128], strides = [1, 1]} : vector<8x256xf32> to vector<8x128xf32>
    %c0_3 = arith.constant 0 : index
    %c0_4 = arith.constant 0 : index
    %c0_5 = arith.constant 0 : index
    %5 = vector.load %arg2[%c0_3, %c0_4, %c0_5] : memref<8x128x128xf32, #tpu.memory_space<vmem>>, vector<1x128x128xf32>
    %6 = vector.shape_cast %5 : vector<1x128x128xf32> to vector<128x128xf32>
    %7 = vector.extract_strided_slice %3 {offsets = [0, 0], sizes = [1, 128], strides = [1, 1]} : vector<8x128xf32> to vector<1x128xf32>
    %cst_6 = arith.constant dense<0.000000e+00> : vector<1x128xf32>
    %8 = tpu.matmul %7, %6, %cst_6 {dimension_numbers = #tpu.dot_dimension_numbers<[1], [1], [0], [0], [0, 0, 1, 0], [], []>} : vector<1x128xf32>, vector<128x128xf32>, vector<1x128xf32> -> vector<1x128xf32>
    %c0_7 = arith.constant 0 : index
    %c0_8 = arith.constant 0 : index
    %9 = vector.load %arg3[%c0_7, %c0_8] : memref<8x128xi32, #tpu.memory_space<vmem>>, vector<1x128xi32>
    %c0_i32 = arith.constant 0 : i32
    %10 = vector.broadcast %c0_i32 : i32 to vector<1x128xi32>
    %11 = arith.cmpi ne, %9, %10 : vector<1x128xi32>
    %cst_9 = arith.constant -1.000000e+30 : f32
    %12 = vector.broadcast %cst_9 : f32 to vector<1x128xf32>
    %13 = arith.select %11, %12, %8 : vector<1x128xi1>, vector<1x128xf32>
    %cst_10 = arith.constant dense<0xFF800000> : vector<1xf32>
    %14 = vector.multi_reduction <maximumf>, %13, %cst_10 [1] : vector<1x128xf32> to vector<1xf32>
    %15 = vector.shape_cast %14 : vector<1xf32> to vector<1x1xf32>
    %16 = vector.broadcast %15 : vector<1x1xf32> to vector<1x128xf32>
    %17 = arith.subf %13, %16 : vector<1x128xf32>
    %18 = math.exp %17 : vector<1x128xf32>
    %cst_11 = arith.constant dense<0.000000e+00> : vector<1xf32>
    %19 = vector.multi_reduction <add>, %18, %cst_11 [1] : vector<1x128xf32> to vector<1xf32>
    %20 = vector.shape_cast %19 : vector<1xf32> to vector<1x1xf32>
    %21 = tpu.reciprocal %20 : vector<1x1xf32> -> vector<1x1xf32>
    %22 = vector.broadcast %21 : vector<1x1xf32> to vector<1x128xf32>
    %23 = arith.mulf %18, %22 : vector<1x128xf32>
    %c0_12 = arith.constant 0 : index
    %c0_13 = arith.constant 0 : index
    %24 = vector.load %arg7[%c0_12, %c0_13] : memref<8x128xf32, #tpu.memory_space<vmem>>, vector<1x128xf32>
    tpu.vector_store %arg7[%c0_12, %c0_13], %23 {strides = array<i32>} : memref<8x128xf32, #tpu.memory_space<vmem>>, vector<1x128xf32>,
    %cst_14 = arith.constant dense<0.000000e+00> : vector<1x128xf32>
    %25 = tpu.matmul %23, %6, %cst_14 {dimension_numbers = #tpu.dot_dimension_numbers<[1], [0], [0], [1], [0, 0, 1, 1], [], []>} : vector<1x128xf32>, vector<128x128xf32>, vector<1x128xf32> -> vector<1x128xf32>
    %c0_15 = arith.constant 0 : index
    %c0_16 = arith.constant 0 : index
    %26 = vector.load %arg8[%c0_15, %c0_16] : memref<8x128xf32, #tpu.memory_space<vmem>>, vector<1x128xf32>
    tpu.vector_store %arg8[%c0_15, %c0_16], %25 {strides = array<i32>} : memref<8x128xf32, #tpu.memory_space<vmem>>, vector<1x128xf32>,
    %c1 = arith.constant 1 : index
    %c0_17 = arith.constant 0 : index
    %c0_18 = arith.constant 0 : index
    %27 = vector.load %arg2[%c1, %c0_17, %c0_18] : memref<8x128x128xf32, #tpu.memory_space<vmem>>, vector<1x128x128xf32>
    %28 = vector.shape_cast %27 : vector<1x128x128xf32> to vector<128x128xf32>
    %29 = vector.extract_strided_slice %3 {offsets = [1, 0], sizes = [1, 128], strides = [1, 1]} : vector<8x128xf32> to vector<1x128xf32>
    %cst_19 = arith.constant dense<0.000000e+00> : vector<1x128xf32>
    %30 = tpu.matmul %29, %28, %cst_19 {dimension_numbers = #tpu.dot_dimension_numbers<[1], [1], [0], [0], [0, 0, 1, 0], [], []>} : vector<1x128xf32>, vector<128x128xf32>, vector<1x128xf32> -> vector<1x128xf32>
    %c1_20 = arith.constant 1 : index
    %c0_21 = arith.constant 0 : index
    %31 = vector.load %arg3[%c1_20, %c0_21] : memref<8x128xi32, #tpu.memory_space<vmem>>, vector<1x128xi32>
    %c0_i32_22 = arith.constant 0 : i32
    %32 = vector.broadcast %c0_i32_22 : i32 to vector<1x128xi32>
    %33 = arith.cmpi ne, %31, %32 : vector<1x128xi32>
    %cst_23 = arith.constant -1.000000e+30 : f32
    %34 = vector.broadcast %cst_23 : f32 to vector<1x128xf32>
    %35 = arith.select %33, %34, %30 : vector<1x128xi1>, vector<1x128xf32>
    %cst_24 = arith.constant dense<0xFF800000> : vector<1xf32>
    %36 = vector.multi_reduction <maximumf>, %35, %cst_24 [1] : vector<1x128xf32> to vector<1xf32>
    %37 = vector.shape_cast %36 : vector<1xf32> to vector<1x1xf32>
    %38 = vector.broadcast %37 : vector<1x1xf32> to vector<1x128xf32>
    %39 = arith.subf %35, %38 : vector<1x128xf32>
    %40 = math.exp %39 : vector<1x128xf32>
    %cst_25 = arith.constant dense<0.000000e+00> : vector<1xf32>
    %41 = vector.multi_reduction <add>, %40, %cst_25 [1] : vector<1x128xf32> to vector<1xf32>
    %42 = vector.shape_cast %41 : vector<1xf32> to vector<1x1xf32>
    %43 = tpu.reciprocal %42 : vector<1x1xf32> -> vector<1x1xf32>
    %44 = vector.broadcast %43 : vector<1x1xf32> to vector<1x128xf32>
    %45 = arith.mulf %40, %44 : vector<1x128xf32>
    %c1_26 = arith.constant 1 : index
    %c0_27 = arith.constant 0 : index
    %46 = vector.load %arg7[%c1_26, %c0_27] : memref<8x128xf32, #tpu.memory_space<vmem>>, vector<1x128xf32>
    tpu.vector_store %arg7[%c1_26, %c0_27], %45 {strides = array<i32>} : memref<8x128xf32, #tpu.memory_space<vmem>>, vector<1x128xf32>,
    %cst_28 = arith.constant dense<0.000000e+00> : vector<1x128xf32>
    %47 = tpu.matmul %45, %28, %cst_28 {dimension_numbers = #tpu.dot_dimension_numbers<[1], [0], [0], [1], [0, 0, 1, 1], [], []>} : vector<1x128xf32>, vector<128x128xf32>, vector<1x128xf32> -> vector<1x128xf32>
    %c1_29 = arith.constant 1 : index
    %c0_30 = arith.constant 0 : index
    %48 = vector.load %arg8[%c1_29, %c0_30] : memref<8x128xf32, #tpu.memory_space<vmem>>, vector<1x128xf32>
    tpu.vector_store %arg8[%c1_29, %c0_30], %47 {strides = array<i32>} : memref<8x128xf32, #tpu.memory_space<vmem>>, vector<1x128xf32>,
    %c2 = arith.constant 2 : index
    %c0_31 = arith.constant 0 : index
    %c0_32 = arith.constant 0 : index
    %49 = vector.load %arg2[%c2, %c0_31, %c0_32] : memref<8x128x128xf32, #tpu.memory_space<vmem>>, vector<1x128x128xf32>
    %50 = vector.shape_cast %49 : vector<1x128x128xf32> to vector<128x128xf32>
    %51 = vector.extract_strided_slice %3 {offsets = [2, 0], sizes = [1, 128], strides = [1, 1]} : vector<8x128xf32> to vector<1x128xf32>
    %cst_33 = arith.constant dense<0.000000e+00> : vector<1x128xf32>
    %52 = tpu.matmul %51, %50, %cst_33 {dimension_numbers = #tpu.dot_dimension_numbers<[1], [1], [0], [0], [0, 0, 1, 0], [], []>} : vector<1x128xf32>, vector<128x128xf32>, vector<1x128xf32> -> vector<1x128xf32>
    %c2_34 = arith.constant 2 : index
    %c0_35 = arith.constant 0 : index
    %53 = vector.load %arg3[%c2_34, %c0_35] : memref<8x128xi32, #tpu.memory_space<vmem>>, vector<1x128xi32>
    %c0_i32_36 = arith.constant 0 : i32
    %54 = vector.broadcast %c0_i32_36 : i32 to vector<1x128xi32>
    %55 = arith.cmpi ne, %53, %54 : vector<1x128xi32>
    %cst_37 = arith.constant -1.000000e+30 : f32
    %56 = vector.broadcast %cst_37 : f32 to vector<1x128xf32>
    %57 = arith.select %55, %56, %52 : vector<1x128xi1>, vector<1x128xf32>
    %cst_38 = arith.constant dense<0xFF800000> : vector<1xf32>
    %58 = vector.multi_reduction <maximumf>, %57, %cst_38 [1] : vector<1x128xf32> to vector<1xf32>
    %59 = vector.shape_cast %58 : vector<1xf32> to vector<1x1xf32>
    %60 = vector.broadcast %59 : vector<1x1xf32> to vector<1x128xf32>
    %61 = arith.subf %57, %60 : vector<1x128xf32>
    %62 = math.exp %61 : vector<1x128xf32>
    %cst_39 = arith.constant dense<0.000000e+00> : vector<1xf32>
    %63 = vector.multi_reduction <add>, %62, %cst_39 [1] : vector<1x128xf32> to vector<1xf32>
    %64 = vector.shape_cast %63 : vector<1xf32> to vector<1x1xf32>
    %65 = tpu.reciprocal %64 : vector<1x1xf32> -> vector<1x1xf32>
    %66 = vector.broadcast %65 : vector<1x1xf32> to vector<1x128xf32>
    %67 = arith.mulf %62, %66 : vector<1x128xf32>
    %c2_40 = arith.constant 2 : index
    %c0_41 = arith.constant 0 : index
    %68 = vector.load %arg7[%c2_40, %c0_41] : memref<8x128xf32, #tpu.memory_space<vmem>>, vector<1x128xf32>
    tpu.vector_store %arg7[%c2_40, %c0_41], %67 {strides = array<i32>} : memref<8x128xf32, #tpu.memory_space<vmem>>, vector<1x128xf32>,
    %cst_42 = arith.constant dense<0.000000e+00> : vector<1x128xf32>
    %69 = tpu.matmul %67, %50, %cst_42 {dimension_numbers = #tpu.dot_dimension_numbers<[1], [0], [0], [1], [0, 0, 1, 1], [], []>} : vector<1x128xf32>, vector<128x128xf32>, vector<1x128xf32> -> vector<1x128xf32>
    %c2_43 = arith.constant 2 : index
    %c0_44 = arith.constant 0 : index
    %70 = vector.load %arg8[%c2_43, %c0_44] : memref<8x128xf32, #tpu.memory_space<vmem>>, vector<1x128xf32>
    tpu.vector_store %arg8[%c2_43, %c0_44], %69 {strides = array<i32>} : memref<8x128xf32, #tpu.memory_space<vmem>>, vector<1x128xf32>,
    %c3 = arith.constant 3 : index
    %c0_45 = arith.constant 0 : index
    %c0_46 = arith.constant 0 : index
    %71 = vector.load %arg2[%c3, %c0_45, %c0_46] : memref<8x128x128xf32, #tpu.memory_space<vmem>>, vector<1x128x128xf32>
    %72 = vector.shape_cast %71 : vector<1x128x128xf32> to vector<128x128xf32>
    %73 = vector.extract_strided_slice %3 {offsets = [3, 0], sizes = [1, 128], strides = [1, 1]} : vector<8x128xf32> to vector<1x128xf32>
    %cst_47 = arith.constant dense<0.000000e+00> : vector<1x128xf32>
    %74 = tpu.matmul %73, %72, %cst_47 {dimension_numbers = #tpu.dot_dimension_numbers<[1], [1], [0], [0], [0, 0, 1, 0], [], []>} : vector<1x128xf32>, vector<128x128xf32>, vector<1x128xf32> -> vector<1x128xf32>
    %c3_48 = arith.constant 3 : index
    %c0_49 = arith.constant 0 : index
    %75 = vector.load %arg3[%c3_48, %c0_49] : memref<8x128xi32, #tpu.memory_space<vmem>>, vector<1x128xi32>
    %c0_i32_50 = arith.constant 0 : i32
    %76 = vector.broadcast %c0_i32_50 : i32 to vector<1x128xi32>
    %77 = arith.cmpi ne, %75, %76 : vector<1x128xi32>
    %cst_51 = arith.constant -1.000000e+30 : f32
    %78 = vector.broadcast %cst_51 : f32 to vector<1x128xf32>
    %79 = arith.select %77, %78, %74 : vector<1x128xi1>, vector<1x128xf32>
    %cst_52 = arith.constant dense<0xFF800000> : vector<1xf32>
    %80 = vector.multi_reduction <maximumf>, %79, %cst_52 [1] : vector<1x128xf32> to vector<1xf32>
    %81 = vector.shape_cast %80 : vector<1xf32> to vector<1x1xf32>
    %82 = vector.broadcast %81 : vector<1x1xf32> to vector<1x128xf32>
    %83 = arith.subf %79, %82 : vector<1x128xf32>
    %84 = math.exp %83 : vector<1x128xf32>
    %cst_53 = arith.constant dense<0.000000e+00> : vector<1xf32>
    %85 = vector.multi_reduction <add>, %84, %cst_53 [1] : vector<1x128xf32> to vector<1xf32>
    %86 = vector.shape_cast %85 : vector<1xf32> to vector<1x1xf32>
    %87 = tpu.reciprocal %86 : vector<1x1xf32> -> vector<1x1xf32>
    %88 = vector.broadcast %87 : vector<1x1xf32> to vector<1x128xf32>
    %89 = arith.mulf %84, %88 : vector<1x128xf32>
    %c3_54 = arith.constant 3 : index
    %c0_55 = arith.constant 0 : index
    %90 = vector.load %arg7[%c3_54, %c0_55] : memref<8x128xf32, #tpu.memory_space<vmem>>, vector<1x128xf32>
    tpu.vector_store %arg7[%c3_54, %c0_55], %89 {strides = array<i32>} : memref<8x128xf32, #tpu.memory_space<vmem>>, vector<1x128xf32>,
    %cst_56 = arith.constant dense<0.000000e+00> : vector<1x128xf32>
    %91 = tpu.matmul %89, %72, %cst_56 {dimension_numbers = #tpu.dot_dimension_numbers<[1], [0], [0], [1], [0, 0, 1, 1], [], []>} : vector<1x128xf32>, vector<128x128xf32>, vector<1x128xf32> -> vector<1x128xf32>
    %c3_57 = arith.constant 3 : index
    %c0_58 = arith.constant 0 : index
    %92 = vector.load %arg8[%c3_57, %c0_58] : memref<8x128xf32, #tpu.memory_space<vmem>>, vector<1x128xf32>
    tpu.vector_store %arg8[%c3_57, %c0_58], %91 {strides = array<i32>} : memref<8x128xf32, #tpu.memory_space<vmem>>, vector<1x128xf32>,
    %c4 = arith.constant 4 : index
    %c0_59 = arith.constant 0 : index
    %c0_60 = arith.constant 0 : index
    %93 = vector.load %arg2[%c4, %c0_59, %c0_60] : memref<8x128x128xf32, #tpu.memory_space<vmem>>, vector<1x128x128xf32>
    %94 = vector.shape_cast %93 : vector<1x128x128xf32> to vector<128x128xf32>
    %95 = vector.extract_strided_slice %3 {offsets = [4, 0], sizes = [1, 128], strides = [1, 1]} : vector<8x128xf32> to vector<1x128xf32>
    %cst_61 = arith.constant dense<0.000000e+00> : vector<1x128xf32>
    %96 = tpu.matmul %95, %94, %cst_61 {dimension_numbers = #tpu.dot_dimension_numbers<[1], [1], [0], [0], [0, 0, 1, 0], [], []>} : vector<1x128xf32>, vector<128x128xf32>, vector<1x128xf32> -> vector<1x128xf32>
    %c4_62 = arith.constant 4 : index
    %c0_63 = arith.constant 0 : index
    %97 = vector.load %arg3[%c4_62, %c0_63] : memref<8x128xi32, #tpu.memory_space<vmem>>, vector<1x128xi32>
    %c0_i32_64 = arith.constant 0 : i32
    %98 = vector.broadcast %c0_i32_64 : i32 to vector<1x128xi32>
    %99 = arith.cmpi ne, %97, %98 : vector<1x128xi32>
    %cst_65 = arith.constant -1.000000e+30 : f32
    %100 = vector.broadcast %cst_65 : f32 to vector<1x128xf32>
    %101 = arith.select %99, %100, %96 : vector<1x128xi1>, vector<1x128xf32>
    %cst_66 = arith.constant dense<0xFF800000> : vector<1xf32>
    %102 = vector.multi_reduction <maximumf>, %101, %cst_66 [1] : vector<1x128xf32> to vector<1xf32>
    %103 = vector.shape_cast %102 : vector<1xf32> to vector<1x1xf32>
    %104 = vector.broadcast %103 : vector<1x1xf32> to vector<1x128xf32>
    %105 = arith.subf %101, %104 : vector<1x128xf32>
    %106 = math.exp %105 : vector<1x128xf32>
    %cst_67 = arith.constant dense<0.000000e+00> : vector<1xf32>
    %107 = vector.multi_reduction <add>, %106, %cst_67 [1] : vector<1x128xf32> to vector<1xf32>
    %108 = vector.shape_cast %107 : vector<1xf32> to vector<1x1xf32>
    %109 = tpu.reciprocal %108 : vector<1x1xf32> -> vector<1x1xf32>
    %110 = vector.broadcast %109 : vector<1x1xf32> to vector<1x128xf32>
    %111 = arith.mulf %106, %110 : vector<1x128xf32>
    %c4_68 = arith.constant 4 : index
    %c0_69 = arith.constant 0 : index
    %112 = vector.load %arg7[%c4_68, %c0_69] : memref<8x128xf32, #tpu.memory_space<vmem>>, vector<1x128xf32>
    tpu.vector_store %arg7[%c4_68, %c0_69], %111 {strides = array<i32>} : memref<8x128xf32, #tpu.memory_space<vmem>>, vector<1x128xf32>,
    %cst_70 = arith.constant dense<0.000000e+00> : vector<1x128xf32>
    %113 = tpu.matmul %111, %94, %cst_70 {dimension_numbers = #tpu.dot_dimension_numbers<[1], [0], [0], [1], [0, 0, 1, 1], [], []>} : vector<1x128xf32>, vector<128x128xf32>, vector<1x128xf32> -> vector<1x128xf32>
    %c4_71 = arith.constant 4 : index
    %c0_72 = arith.constant 0 : index
    %114 = vector.load %arg8[%c4_71, %c0_72] : memref<8x128xf32, #tpu.memory_space<vmem>>, vector<1x128xf32>
    tpu.vector_store %arg8[%c4_71, %c0_72], %113 {strides = array<i32>} : memref<8x128xf32, #tpu.memory_space<vmem>>, vector<1x128xf32>,
    %c5 = arith.constant 5 : index
    %c0_73 = arith.constant 0 : index
    %c0_74 = arith.constant 0 : index
    %115 = vector.load %arg2[%c5, %c0_73, %c0_74] : memref<8x128x128xf32, #tpu.memory_space<vmem>>, vector<1x128x128xf32>
    %116 = vector.shape_cast %115 : vector<1x128x128xf32> to vector<128x128xf32>
    %117 = vector.extract_strided_slice %3 {offsets = [5, 0], sizes = [1, 128], strides = [1, 1]} : vector<8x128xf32> to vector<1x128xf32>
    %cst_75 = arith.constant dense<0.000000e+00> : vector<1x128xf32>
    %118 = tpu.matmul %117, %116, %cst_75 {dimension_numbers = #tpu.dot_dimension_numbers<[1], [1], [0], [0], [0, 0, 1, 0], [], []>} : vector<1x128xf32>, vector<128x128xf32>, vector<1x128xf32> -> vector<1x128xf32>
    %c5_76 = arith.constant 5 : index
    %c0_77 = arith.constant 0 : index
    %119 = vector.load %arg3[%c5_76, %c0_77] : memref<8x128xi32, #tpu.memory_space<vmem>>, vector<1x128xi32>
    %c0_i32_78 = arith.constant 0 : i32
    %120 = vector.broadcast %c0_i32_78 : i32 to vector<1x128xi32>
    %121 = arith.cmpi ne, %119, %120 : vector<1x128xi32>
    %cst_79 = arith.constant -1.000000e+30 : f32
    %122 = vector.broadcast %cst_79 : f32 to vector<1x128xf32>
    %123 = arith.select %121, %122, %118 : vector<1x128xi1>, vector<1x128xf32>
    %cst_80 = arith.constant dense<0xFF800000> : vector<1xf32>
    %124 = vector.multi_reduction <maximumf>, %123, %cst_80 [1] : vector<1x128xf32> to vector<1xf32>
    %125 = vector.shape_cast %124 : vector<1xf32> to vector<1x1xf32>
    %126 = vector.broadcast %125 : vector<1x1xf32> to vector<1x128xf32>
    %127 = arith.subf %123, %126 : vector<1x128xf32>
    %128 = math.exp %127 : vector<1x128xf32>
    %cst_81 = arith.constant dense<0.000000e+00> : vector<1xf32>
    %129 = vector.multi_reduction <add>, %128, %cst_81 [1] : vector<1x128xf32> to vector<1xf32>
    %130 = vector.shape_cast %129 : vector<1xf32> to vector<1x1xf32>
    %131 = tpu.reciprocal %130 : vector<1x1xf32> -> vector<1x1xf32>
    %132 = vector.broadcast %131 : vector<1x1xf32> to vector<1x128xf32>
    %133 = arith.mulf %128, %132 : vector<1x128xf32>
    %c5_82 = arith.constant 5 : index
    %c0_83 = arith.constant 0 : index
    %134 = vector.load %arg7[%c5_82, %c0_83] : memref<8x128xf32, #tpu.memory_space<vmem>>, vector<1x128xf32>
    tpu.vector_store %arg7[%c5_82, %c0_83], %133 {strides = array<i32>} : memref<8x128xf32, #tpu.memory_space<vmem>>, vector<1x128xf32>,
    %cst_84 = arith.constant dense<0.000000e+00> : vector<1x128xf32>
    %135 = tpu.matmul %133, %116, %cst_84 {dimension_numbers = #tpu.dot_dimension_numbers<[1], [0], [0], [1], [0, 0, 1, 1], [], []>} : vector<1x128xf32>, vector<128x128xf32>, vector<1x128xf32> -> vector<1x128xf32>
    %c5_85 = arith.constant 5 : index
    %c0_86 = arith.constant 0 : index
    %136 = vector.load %arg8[%c5_85, %c0_86] : memref<8x128xf32, #tpu.memory_space<vmem>>, vector<1x128xf32>
    tpu.vector_store %arg8[%c5_85, %c0_86], %135 {strides = array<i32>} : memref<8x128xf32, #tpu.memory_space<vmem>>, vector<1x128xf32>,
    %c6 = arith.constant 6 : index
    %c0_87 = arith.constant 0 : index
    %c0_88 = arith.constant 0 : index
    %137 = vector.load %arg2[%c6, %c0_87, %c0_88] : memref<8x128x128xf32, #tpu.memory_space<vmem>>, vector<1x128x128xf32>
    %138 = vector.shape_cast %137 : vector<1x128x128xf32> to vector<128x128xf32>
    %139 = vector.extract_strided_slice %3 {offsets = [6, 0], sizes = [1, 128], strides = [1, 1]} : vector<8x128xf32> to vector<1x128xf32>
    %cst_89 = arith.constant dense<0.000000e+00> : vector<1x128xf32>
    %140 = tpu.matmul %139, %138, %cst_89 {dimension_numbers = #tpu.dot_dimension_numbers<[1], [1], [0], [0], [0, 0, 1, 0], [], []>} : vector<1x128xf32>, vector<128x128xf32>, vector<1x128xf32> -> vector<1x128xf32>
    %c6_90 = arith.constant 6 : index
    %c0_91 = arith.constant 0 : index
    %141 = vector.load %arg3[%c6_90, %c0_91] : memref<8x128xi32, #tpu.memory_space<vmem>>, vector<1x128xi32>
    %c0_i32_92 = arith.constant 0 : i32
    %142 = vector.broadcast %c0_i32_92 : i32 to vector<1x128xi32>
    %143 = arith.cmpi ne, %141, %142 : vector<1x128xi32>
    %cst_93 = arith.constant -1.000000e+30 : f32
    %144 = vector.broadcast %cst_93 : f32 to vector<1x128xf32>
    %145 = arith.select %143, %144, %140 : vector<1x128xi1>, vector<1x128xf32>
    %cst_94 = arith.constant dense<0xFF800000> : vector<1xf32>
    %146 = vector.multi_reduction <maximumf>, %145, %cst_94 [1] : vector<1x128xf32> to vector<1xf32>
    %147 = vector.shape_cast %146 : vector<1xf32> to vector<1x1xf32>
    %148 = vector.broadcast %147 : vector<1x1xf32> to vector<1x128xf32>
    %149 = arith.subf %145, %148 : vector<1x128xf32>
    %150 = math.exp %149 : vector<1x128xf32>
    %cst_95 = arith.constant dense<0.000000e+00> : vector<1xf32>
    %151 = vector.multi_reduction <add>, %150, %cst_95 [1] : vector<1x128xf32> to vector<1xf32>
    %152 = vector.shape_cast %151 : vector<1xf32> to vector<1x1xf32>
    %153 = tpu.reciprocal %152 : vector<1x1xf32> -> vector<1x1xf32>
    %154 = vector.broadcast %153 : vector<1x1xf32> to vector<1x128xf32>
    %155 = arith.mulf %150, %154 : vector<1x128xf32>
    %c6_96 = arith.constant 6 : index
    %c0_97 = arith.constant 0 : index
    %156 = vector.load %arg7[%c6_96, %c0_97] : memref<8x128xf32, #tpu.memory_space<vmem>>, vector<1x128xf32>
    tpu.vector_store %arg7[%c6_96, %c0_97], %155 {strides = array<i32>} : memref<8x128xf32, #tpu.memory_space<vmem>>, vector<1x128xf32>,
    %cst_98 = arith.constant dense<0.000000e+00> : vector<1x128xf32>
    %157 = tpu.matmul %155, %138, %cst_98 {dimension_numbers = #tpu.dot_dimension_numbers<[1], [0], [0], [1], [0, 0, 1, 1], [], []>} : vector<1x128xf32>, vector<128x128xf32>, vector<1x128xf32> -> vector<1x128xf32>
    %c6_99 = arith.constant 6 : index
    %c0_100 = arith.constant 0 : index
    %158 = vector.load %arg8[%c6_99, %c0_100] : memref<8x128xf32, #tpu.memory_space<vmem>>, vector<1x128xf32>
    tpu.vector_store %arg8[%c6_99, %c0_100], %157 {strides = array<i32>} : memref<8x128xf32, #tpu.memory_space<vmem>>, vector<1x128xf32>,
    %c7 = arith.constant 7 : index
    %c0_101 = arith.constant 0 : index
    %c0_102 = arith.constant 0 : index
    %159 = vector.load %arg2[%c7, %c0_101, %c0_102] : memref<8x128x128xf32, #tpu.memory_space<vmem>>, vector<1x128x128xf32>
    %160 = vector.shape_cast %159 : vector<1x128x128xf32> to vector<128x128xf32>
    %161 = vector.extract_strided_slice %3 {offsets = [7, 0], sizes = [1, 128], strides = [1, 1]} : vector<8x128xf32> to vector<1x128xf32>
    %cst_103 = arith.constant dense<0.000000e+00> : vector<1x128xf32>
    %162 = tpu.matmul %161, %160, %cst_103 {dimension_numbers = #tpu.dot_dimension_numbers<[1], [1], [0], [0], [0, 0, 1, 0], [], []>} : vector<1x128xf32>, vector<128x128xf32>, vector<1x128xf32> -> vector<1x128xf32>
    %c7_104 = arith.constant 7 : index
    %c0_105 = arith.constant 0 : index
    %163 = vector.load %arg3[%c7_104, %c0_105] : memref<8x128xi32, #tpu.memory_space<vmem>>, vector<1x128xi32>
    %c0_i32_106 = arith.constant 0 : i32
    %164 = vector.broadcast %c0_i32_106 : i32 to vector<1x128xi32>
    %165 = arith.cmpi ne, %163, %164 : vector<1x128xi32>
    %cst_107 = arith.constant -1.000000e+30 : f32
    %166 = vector.broadcast %cst_107 : f32 to vector<1x128xf32>
    %167 = arith.select %165, %166, %162 : vector<1x128xi1>, vector<1x128xf32>
    %cst_108 = arith.constant dense<0xFF800000> : vector<1xf32>
    %168 = vector.multi_reduction <maximumf>, %167, %cst_108 [1] : vector<1x128xf32> to vector<1xf32>
    %169 = vector.shape_cast %168 : vector<1xf32> to vector<1x1xf32>
    %170 = vector.broadcast %169 : vector<1x1xf32> to vector<1x128xf32>
    %171 = arith.subf %167, %170 : vector<1x128xf32>
    %172 = math.exp %171 : vector<1x128xf32>
    %cst_109 = arith.constant dense<0.000000e+00> : vector<1xf32>
    %173 = vector.multi_reduction <add>, %172, %cst_109 [1] : vector<1x128xf32> to vector<1xf32>
    %174 = vector.shape_cast %173 : vector<1xf32> to vector<1x1xf32>
    %175 = tpu.reciprocal %174 : vector<1x1xf32> -> vector<1x1xf32>
    %176 = vector.broadcast %175 : vector<1x1xf32> to vector<1x128xf32>
    %177 = arith.mulf %172, %176 : vector<1x128xf32>
    %c7_110 = arith.constant 7 : index
    %c0_111 = arith.constant 0 : index
    %178 = vector.load %arg7[%c7_110, %c0_111] : memref<8x128xf32, #tpu.memory_space<vmem>>, vector<1x128xf32>
    tpu.vector_store %arg7[%c7_110, %c0_111], %177 {strides = array<i32>} : memref<8x128xf32, #tpu.memory_space<vmem>>, vector<1x128xf32>,
    %cst_112 = arith.constant dense<0.000000e+00> : vector<1x128xf32>
    %179 = tpu.matmul %177, %160, %cst_112 {dimension_numbers = #tpu.dot_dimension_numbers<[1], [0], [0], [1], [0, 0, 1, 1], [], []>} : vector<1x128xf32>, vector<128x128xf32>, vector<1x128xf32> -> vector<1x128xf32>
    %c7_113 = arith.constant 7 : index
    %c0_114 = arith.constant 0 : index
    %180 = vector.load %arg8[%c7_113, %c0_114] : memref<8x128xf32, #tpu.memory_space<vmem>>, vector<1x128xf32>
    tpu.vector_store %arg8[%c7_113, %c0_114], %179 {strides = array<i32>} : memref<8x128xf32, #tpu.memory_space<vmem>>, vector<1x128xf32>,
    %c0_115 = arith.constant 0 : index
    %c0_116 = arith.constant 0 : index
    %181 = vector.load %arg8[%c0_115, %c0_116] : memref<8x128xf32, #tpu.memory_space<vmem>>, vector<8x128xf32>
    %c0_117 = arith.constant 0 : index
    %c0_118 = arith.constant 0 : index
    %182 = vector.load %arg5[%c0_117, %c0_118] : memref<128x128xf32, #tpu.memory_space<vmem>>, vector<128x128xf32>
    %cst_119 = arith.constant dense<0.000000e+00> : vector<8x128xf32>
    %183 = tpu.matmul %181, %182, %cst_119 {dimension_numbers = #tpu.dot_dimension_numbers<[1], [0], [0], [1], [0, 0, 1, 1], [], []>} : vector<8x128xf32>, vector<128x128xf32>, vector<8x128xf32> -> vector<8x128xf32>
    %184 = arith.addf %183, %4 : vector<8x128xf32>
    %185 = math.tanh %184 : vector<8x128xf32>
    %c0_120 = arith.constant 0 : index
    %c0_121 = arith.constant 0 : index
    %186 = vector.load %arg6[%c0_120, %c0_121] : memref<8x128xf32, #tpu.memory_space<vmem>>, vector<8x128xf32>
    tpu.vector_store %arg6[%c0_120, %c0_121], %185 {strides = array<i32>} : memref<8x128xf32, #tpu.memory_space<vmem>>, vector<8x128xf32>,
    return
  }
  func.func @transform_0(%arg0: i32) -> (i32, i32) {
    %c0_i32 = arith.constant 0 : i32
    %c0_i32_0 = arith.constant 0 : i32
    return %arg0, %c0_i32 : i32, i32
  }
  func.func @transform_1(%arg0: i32) -> (i32, i32, i32) {
    %c0_i32 = arith.constant 0 : i32
    %c0_i32_0 = arith.constant 0 : i32
    %c0_i32_1 = arith.constant 0 : i32
    return %arg0, %c0_i32, %c0_i32_0 : i32, i32, i32
  }
  func.func @transform_2(%arg0: i32) -> (i32, i32) {
    %c0_i32 = arith.constant 0 : i32
    %c0_i32_0 = arith.constant 0 : i32
    return %arg0, %c0_i32 : i32, i32
  }
  func.func @transform_3(%arg0: i32) -> (i32, i32) {
    %c0_i32 = arith.constant 0 : i32
    %c0_i32_0 = arith.constant 0 : i32
    %c0_i32_1 = arith.constant 0 : i32
    return %c0_i32, %c0_i32_0 : i32, i32
  }
  func.func @transform_4(%arg0: i32) -> (i32, i32) {
    %c0_i32 = arith.constant 0 : i32
    %c0_i32_0 = arith.constant 0 : i32
    %c0_i32_1 = arith.constant 0 : i32
    return %c0_i32, %c0_i32_0 : i32, i32
  }
  func.func @transform_5(%arg0: i32) -> (i32, i32) {
    %c0_i32 = arith.constant 0 : i32
    %c0_i32_0 = arith.constant 0 : i32
    return %arg0, %c0_i32 : i32, i32
  }
  func.func @transform_6(%arg0: i32) -> (i32, i32) {
    %c0_i32 = arith.constant 0 : i32
    %c0_i32_0 = arith.constant 0 : i32
    return %arg0, %c0_i32 : i32, i32
  }
}

</mosaic_0001>

<bundles_post_ra>
// kernel: _soft_dot_attention_impl.1
= control target key start
LH: loop header
LB: loop body
LE: loop exit
PB: predicated region body
PF: predicated region fallthrough
CT: control target
= control target key end

     0   :  { %v2654_v3 = vmov 0.0   ;;  %vm2655_vm0 = vmmov 0   ;;  %vm215_vm2 = vcmask 1040384   ;;  %s3609_s3 = inlined_call_operand.vmem [shape: f32[128,256], index: 3, kind: input, shape index: {}]   ;;  %s3610_s1 = inlined_call_operand.vmem [shape: f32[8,128,128], index: 1, kind: input, shape index: {}]   ;;  %s3611_s0 = inlined_call_operand.vmem [shape: f32[8,128], index: 0, kind: input, shape index: {}]   ;;  %s3612_s2 = inlined_call_operand.vmem [shape: s32[8,128], index: 2, kind: input, shape index: {}]   ;;  %s3613_s6 = inlined_call_operand.vmem [shape: f32[8,128], index: 6, kind: output, shape index: {1}]   ;;  %s3614_s4 = inlined_call_operand.vmem [shape: f32[128,128], index: 4, kind: input, shape index: {}]   ;;  %s3615_s5 = inlined_call_operand.vmem [shape: f32[8,128], index: 5, kind: output, shape index: {0}]  }
   0x1   :  { %v54_v0 = vld [vmem:[%s3609_s3 + $0xf8] sm:$0xff]  ;;  %v53_v1 = vld [vmem:[%s3609_s3 + $0xf0] sm:$0xff]  ;;  %v52_v2 = vld [vmem:[%s3609_s3 + $0xe8] sm:$0xff]  ;;  %119 = vmatprep.mubr.f32.mxu0 %v2654_v3  ;;  %2023 = vmatprep.subr.mxu1 %v2654_v3 }
   0x2   :  { %55 = vmatprep.subr.mxu0 %v54_v0  ;;  %v51_v4 = vld [vmem:[%s3609_s3 + $0xe0] sm:$0xff]  ;;  %v50_v5 = vld [vmem:[%s3609_s3 + $0xd8] sm:$0xff]  ;;  %v49_v6 = vld [vmem:[%s3609_s3 + $0xd0] sm:$0xff]  ;;  %2055 = vmatprep.mubr.msk.f32.mxu1 %vm2655_vm0, %v2654_v3 }
   0x3   :  { %56 = vmatpush1.msra.mxu0 %v53_v1  ;;  %v48_v7 = vld [vmem:[%s3609_s3 + $0xc8] sm:$0xff]  ;;  %v47_v8 = vld [vmem:[%s3609_s3 + $0xc0] sm:$0xff]  ;;  %v46_v9 = vld [vmem:[%s3609_s3 + $0xb8] sm:$0xff] }
   0x4   :  { %57 = vmatprep.subr.mxu0 %v52_v2  ;;  %v45_v10 = vld [vmem:[%s3609_s3 + $0xb0] sm:$0xff]  ;;  %v44_v11 = vld [vmem:[%s3609_s3 + $0xa8] sm:$0xff]  ;;  %v43_v12 = vld [vmem:[%s3609_s3 + $0xa0] sm:$0xff] }
   0x5   :  { %58 = vmatpush1.msra.mxu0 %v51_v4  ;;  %v42_v13 = vld [vmem:[%s3609_s3 + $0x98] sm:$0xff]  ;;  %v41_v14 = vld [vmem:[%s3609_s3 + $0x90] sm:$0xff]  ;;  %v40_v16 = vld [vmem:[%s3609_s3 + $0x88] sm:$0xff] }
   0x6   :  { %59 = vmatprep.subr.mxu0 %v50_v5  ;;  %v141_v15 = vld [vmem:[%s3610_s1 + $0x78] sm:$0xff]  ;;  %v39_v17 = vld [vmem:[%s3609_s3 + $0x80] sm:$0xff]  ;;  %v140_v18 = vld [vmem:[%s3610_s1 + $0x70] sm:$0xff] }
   0x7   :  { %60 = vmatpush1.msra.mxu0 %v49_v6  ;;  %2024 = vmatpush3.xpose.msra.mxu1 %v141_v15  ;;  %v38_v19 = vld [vmem:[%s3609_s3 + $0x78] sm:$0xff]  ;;  %v37_v20 = vld [vmem:[%s3609_s3 + $0x70] sm:$0xff]  ;;  %v36_v21 = vld [vmem:[%s3609_s3 + $0x68] sm:$0xff] }
   0x8   :  { %61 = vmatprep.subr.mxu0 %v48_v7  ;;  %2025 = vmatprep.subr.mxu1 %v2654_v3  ;;  %v35_v22 = vld [vmem:[%s3609_s3 + $0x60] sm:$0xff]  ;;  %v139_v23 = vld [vmem:[%s3610_s1 + $0x68] sm:$0xff]  ;;  %v34_v24 = vld [vmem:[%s3609_s3 + $0x58] sm:$0xff] }
   0x9   :  { %62 = vmatpush1.msra.mxu0 %v47_v8  ;;  %v33_v25 = vld [vmem:[%s3609_s3 + $0x50] sm:$0xff]  ;;  %v32_v26 = vld [vmem:[%s3609_s3 + $0x48] sm:$0xff]  ;;  %v31_v27 = vld [vmem:[%s3609_s3 + $0x40] sm:$0xff] }
   0xa   :  { %63 = vmatprep.subr.mxu0 %v46_v9  ;;  %v138_v28 = vld [vmem:[%s3610_s1 + $0x60] sm:$0xff]  ;;  %v30_v29 = vld [vmem:[%s3609_s3 + $0x38] sm:$0xff]  ;;  %v29_v30 = vld [vmem:[%s3609_s3 + $0x30] sm:$0xff] }
   0xb   :  { %64 = vmatpush1.msra.mxu0 %v45_v10  ;;  %2026 = vmatpush3.xpose.msra.mxu1 %v140_v18  ;;  %v28_v31 = vld [vmem:[%s3609_s3 + $0x28] sm:$0xff]  ;;  %v27_v32 = vld [vmem:[%s3609_s3 + $0x20] sm:$0xff]  ;;  %v137_v33 = vld [vmem:[%s3610_s1 + $0x58] sm:$0xff] }
   0xc   :  { %65 = vmatprep.subr.mxu0 %v44_v11  ;;  %2027 = vmatprep.subr.mxu1 %v2654_v3  ;;  %v26_v34 = vld [vmem:[%s3609_s3 + $0x18] sm:$0xff]  ;;  %v25_v35 = vld [vmem:[%s3609_s3 + $0x10] sm:$0xff]  ;;  %v24_v36 = vld [vmem:[%s3609_s3 + $0x8] sm:$0xff] }
   0xd   :  { %66 = vmatpush1.msra.mxu0 %v43_v12  ;;  %v23_v37 = vld [vmem:[%s3609_s3] sm:$0xff]  ;;  %v136_v38 = vld [vmem:[%s3610_s1 + $0x50] sm:$0xff]  ;;  %v135_v40 = vld [vmem:[%s3610_s1 + $0x48] sm:$0xff] }
   0xe   :  { %67 = vmatprep.subr.mxu0 %v42_v13  ;;  %v22_v39 = vld [vmem:[%s3611_s0] sm:$0xff]  ;;  %v133_v42 = vld [vmem:[%s3610_s1 + $0x38] sm:$0xff]  ;;  %v132_v43 = vld [vmem:[%s3610_s1 + $0x30] sm:$0xff] }
   0xf   :  { %68 = vmatpush1.msra.mxu0 %v41_v14  ;;  %2028 = vmatpush3.xpose.msra.mxu1 %v139_v23  ;;  %v134_v41 = vld [vmem:[%s3610_s1 + $0x40] sm:$0xff]  ;;  %v131_v44 = vld [vmem:[%s3610_s1 + $0x28] sm:$0xff]  ;;  %v129_v46 = vld [vmem:[%s3610_s1 + $0x18] sm:$0xff] }
  0x10   :  { %69 = vmatprep.subr.mxu0 %v40_v16  ;;  %2029 = vmatprep.subr.mxu1 %v2654_v3  ;;  %v130_v45 = vld [vmem:[%s3610_s1 + $0x20] sm:$0xff]  ;;  %v128_v47 = vld [vmem:[%s3610_s1 + $0x10] sm:$0xff]  ;;  %v127_v48 = vld [vmem:[%s3610_s1 + $0x8] sm:$0xff] }
  0x11   :  { %70 = vmatpush1.msra.mxu0 %v39_v17  ;;  %v126_v49 = vld [vmem:[%s3610_s1] sm:$0xff]  ;;  %v1637_v61 = vld [vmem:[%s3610_s1 + $0xf8] sm:$0xff]  ;;  %v1636_v62 = vld [vmem:[%s3610_s1 + $0xf0] sm:$0xff] }
  0x12   :  { %71 = vmatprep.subr.mxu0 %v38_v19  ;;  %v212_v51 = vld [vmem:[%s3612_s2] sm:$0x1]  ;;  %v1635_v63 = vld [vmem:[%s3610_s1 + $0xe8] sm:$0xff]  ;;  %v1633_v1 = vld [vmem:[%s3610_s1 + $0xd8] sm:$0xff] }
  0x13   :  { %72 = vmatpush1.msra.mxu0 %v37_v20  ;;  %2030 = vmatpush3.xpose.msra.mxu1 %v138_v28  ;;  %vm213_vm1 = vcmp.ne.s32.totalorder %v212_v51, 0  ;;  %v1634_v0 = vld [vmem:[%s3610_s1 + $0xe0] sm:$0xff]  ;;  %v1632_v2 = vld [vmem:[%s3610_s1 + $0xd0] sm:$0xff]  ;;  %v1631_v4 = vld [vmem:[%s3610_s1 + $0xc8] sm:$0xff] }
  0x14   :  { %73 = vmatprep.subr.mxu0 %v36_v21  ;;  %2031 = vmatprep.subr.mxu1 %v2654_v3  ;;  %v1630_v5 = vld [vmem:[%s3610_s1 + $0xc0] sm:$0xff]  ;;  %v1629_v6 = vld [vmem:[%s3610_s1 + $0xb8] sm:$0xff]  ;;  %v1628_v7 = vld [vmem:[%s3610_s1 + $0xb0] sm:$0xff] }
  0x15   :  { %74 = vmatpush1.msra.mxu0 %v35_v22  ;;  %v1627_v8 = vld [vmem:[%s3610_s1 + $0xa8] sm:$0xff]  ;;  %v1626_v9 = vld [vmem:[%s3610_s1 + $0xa0] sm:$0xff]  ;;  %v1625_v10 = vld [vmem:[%s3610_s1 + $0x98] sm:$0xff] }
  0x16   :  { %75 = vmatprep.subr.mxu0 %v34_v24  ;;  %v1624_v11 = vld [vmem:[%s3610_s1 + $0x90] sm:$0xff]  ;;  %v1623_v12 = vld [vmem:[%s3610_s1 + $0x88] sm:$0xff]  ;;  %v1622_v13 = vld [vmem:[%s3610_s1 + $0x80] sm:$0xff] }
  0x17   :  { %76 = vmatpush1.msra.mxu0 %v33_v25  ;;  %2032 = vmatpush3.xpose.msra.mxu1 %v137_v33  ;;  %v389_v21 = vld [vmem:[%s3612_s2 + $0x1] sm:$0x1] }
  0x18   :  { %77 = vmatprep.subr.mxu0 %v32_v26  ;;  %2033 = vmatprep.subr.mxu1 %v2654_v3  ;;  %vm390_vm3 = vcmp.ne.s32.totalorder %v389_v21, 0 }
  0x19   :  { %78 = vmatpush1.msra.mxu0 %v31_v27 }
  0x1a   :  { %79 = vmatprep.subr.mxu0 %v30_v29 }
  0x1b   :  { %80 = vmatpush1.msra.mxu0 %v29_v30  ;;  %2034 = vmatpush3.xpose.msra.mxu1 %v136_v38 }
  0x1c   :  { %81 = vmatprep.subr.mxu0 %v28_v31  ;;  %2035 = vmatprep.subr.mxu1 %v2654_v3  ;;  %v1653_v31 = vld [vmem:[%s3610_s1 + $0x178] sm:$0xff] }
  0x1d   :  { %82 = vmatpush1.msra.mxu0 %v27_v32  ;;  %v1652_v32 = vld [vmem:[%s3610_s1 + $0x170] sm:$0xff] }
  0x1e   :  { %83 = vmatprep.subr.mxu0 %v26_v34  ;;  %v1650_v34 = vld [vmem:[%s3610_s1 + $0x160] sm:$0xff] }
  0x1f   :  { %84 = vmatpush1.msra.mxu0 %v25_v35  ;;  %2036 = vmatpush3.xpose.msra.mxu1 %v135_v40  ;;  %v1649_v35 = vld [vmem:[%s3610_s1 + $0x158] sm:$0xff] }
  0x20   :  { %85 = vmatprep.subr.mxu0 %v24_v36  ;;  %2037 = vmatprep.subr.mxu1 %v2654_v3  ;;  %v1648_v36 = vld [vmem:[%s3610_s1 + $0x150] sm:$0xff] }
  0x21   :  { %86 = vmatpush1.msra.mxu0 %v23_v37  ;;  %v1647_v37 = vld [vmem:[%s3610_s1 + $0x148] sm:$0xff] }
  0x22   :  { %120 = vmatmul.mubr.f32.vlgmr.msra.gmra.mxu0 %v22_v39  ;;  %2058 = vmatprep.subr.mxu0 %v2654_v3  ;;  %v1645_v39 = vld [vmem:[%s3610_s1 + $0x138] sm:$0xff] }
  0x23   :  { %2059 = vmatpush3.msra.mxu0 %v141_v15  ;;  %2038 = vmatpush3.xpose.msra.mxu1 %v134_v41 }
  0x24   :  { %2060 = vmatprep.subr.mxu0 %v2654_v3  ;;  %2039 = vmatprep.subr.mxu1 %v2654_v3 }
  0x25   :  { %2061 = vmatpush3.msra.mxu0 %v140_v18  ;;  %2090 = vmatprep.mubr.msk.f32.mxu0 %vm2655_vm0, %v2654_v3 }
  0x26   :  { %2062 = vmatprep.subr.mxu0 %v2654_v3 }
  0x27   :  { %2063 = vmatpush3.msra.mxu0 %v139_v23  ;;  %2040 = vmatpush3.xpose.msra.mxu1 %v133_v42 }
  0x28   :  { %2064 = vmatprep.subr.mxu0 %v2654_v3  ;;  %2041 = vmatprep.subr.mxu1 %v2654_v3 }
  0x29   :  { %2065 = vmatpush3.msra.mxu0 %v138_v28 }
  0x2a   :  { %2066 = vmatprep.subr.mxu0 %v2654_v3 }
  0x2b   :  { %2067 = vmatpush3.msra.mxu0 %v137_v33  ;;  %2042 = vmatpush3.xpose.msra.mxu1 %v132_v43  ;;  %v1651_v33 = vld [vmem:[%s3610_s1 + $0x168] sm:$0xff] }
  0x2c   :  { %2068 = vmatprep.subr.mxu0 %v2654_v3  ;;  %2043 = vmatprep.subr.mxu1 %v2654_v3 }
  0x2d   :  { %2069 = vmatpush3.msra.mxu0 %v136_v38  ;;  %v1646_v38 = vld [vmem:[%s3610_s1 + $0x140] sm:$0xff] }
  0x2e   :  { %2070 = vmatprep.subr.mxu0 %v2654_v3 }
  0x2f   :  { %2071 = vmatpush3.msra.mxu0 %v135_v40  ;;  %2044 = vmatpush3.xpose.msra.mxu1 %v131_v44  ;;  %v1644_v40 = vld [vmem:[%s3610_s1 + $0x130] sm:$0xff] }
  0x30   :  { %2072 = vmatprep.subr.mxu0 %v2654_v3  ;;  %2045 = vmatprep.subr.mxu1 %v2654_v3 }
  0x31   :  { %2073 = vmatpush3.msra.mxu0 %v134_v41  ;;  %v1643_v41 = vld [vmem:[%s3610_s1 + $0x128] sm:$0xff] }
  0x32   :  { %2074 = vmatprep.subr.mxu0 %v2654_v3 }
  0x33   :  { %2075 = vmatpush3.msra.mxu0 %v133_v42  ;;  %2046 = vmatpush3.xpose.msra.mxu1 %v130_v45  ;;  %v1642_v42 = vld [vmem:[%s3610_s1 + $0x120] sm:$0xff] }
  0x34   :  { %2076 = vmatprep.subr.mxu0 %v2654_v3  ;;  %2047 = vmatprep.subr.mxu1 %v2654_v3 }
  0x35   :  { %2077 = vmatpush3.msra.mxu0 %v132_v43  ;;  %v1641_v43 = vld [vmem:[%s3610_s1 + $0x118] sm:$0xff] }
  0x36   :  { %2078 = vmatprep.subr.mxu0 %v2654_v3 }
  0x37   :  { %2079 = vmatpush3.msra.mxu0 %v131_v44  ;;  %2048 = vmatpush3.xpose.msra.mxu1 %v129_v46  ;;  %v1640_v44 = vld [vmem:[%s3610_s1 + $0x110] sm:$0xff] }
  0x38   :  { %2080 = vmatprep.subr.mxu0 %v2654_v3  ;;  %2049 = vmatprep.subr.mxu1 %v2654_v3 }
  0x39   :  { %2081 = vmatpush3.msra.mxu0 %v130_v45  ;;  %v1639_v45 = vld [vmem:[%s3610_s1 + $0x108] sm:$0xff] }
  0x3a   :  { %2082 = vmatprep.subr.mxu0 %v2654_v3 }
  0x3b   :  { %2083 = vmatpush3.msra.mxu0 %v129_v46  ;;  %2050 = vmatpush3.xpose.msra.mxu1 %v128_v47  ;;  %v1638_v46 = vld [vmem:[%s3610_s1 + $0x100] sm:$0xff] }
  0x3c   :  { %2084 = vmatprep.subr.mxu0 %v2654_v3  ;;  %2051 = vmatprep.subr.mxu1 %v2654_v3 }
  0x3d   :  { %2085 = vmatpush3.msra.mxu0 %v128_v47 }
  0x3e   :  { %2086 = vmatprep.subr.mxu0 %v2654_v3 }
  0x3f   :  { %2087 = vmatpush3.msra.mxu0 %v127_v48  ;;  %2052 = vmatpush3.xpose.msra.mxu1 %v127_v48 }
  0x40   :  { %2088 = vmatprep.subr.mxu0 %v2654_v3  ;;  %2053 = vmatprep.subr.mxu1 %v2654_v3 }
  0x41   :  { %2089 = vmatpush3.msra.mxu0 %v126_v49 }
  0x42   :  { %2093 = vmatprep.subr.mxu0 %v2654_v3 }
  0x43   :  { %2054 = vmatpush3.xpose.msra.mxu1 %v126_v49 }
  0x44   :  { %2128 = vmatprep.subr.mxu1 %v2654_v3 }
  0xe2   :  { %v2877_v50 = vpop.f32.mrf.mxu0 }
  0xe3   :  { %2056 = vmatmul.mubr.f32.vlgmr.msra.gmra.mxu1 %v2877_v50  ;;  %v317_v17 = vrot.slane %v2877_v50, 1  ;;  %v492_v51 = vrot.slane %v2877_v50, 2  ;;  %v667_v21 = vrot.slane %v2877_v50, 3 }
  0xe4   :  { %2160 = vmatprep.mubr.msk.f32.mxu1 %vm2655_vm0, %v2654_v3  ;;  %2129 = vmatpush3.msra.mxu1 %v1637_v61  ;;  %v2975_v18 = vpop.f32.mrf.mxu0 }
  0xe5   :  { %2130 = vmatprep.subr.mxu1 %v2654_v3 }
  0xe6   :  { %2131 = vmatpush3.msra.mxu1 %v1636_v62 }
  0xe7   :  { %2132 = vmatprep.subr.mxu1 %v2654_v3 }
  0xe8   :  { %2133 = vmatpush3.msra.mxu1 %v1635_v63 }
  0xe9   :  { %2134 = vmatprep.subr.mxu1 %v2654_v3 }
  0xea   :  { %2135 = vmatpush3.msra.mxu1 %v1634_v0 }
  0xeb   :  { %2136 = vmatprep.subr.mxu1 %v2654_v3 }
  0xec   :  { %2137 = vmatpush3.msra.mxu1 %v1633_v1 }
  0xed   :  { %2138 = vmatprep.subr.mxu1 %v2654_v3 }
  0xee   :  { %2139 = vmatpush3.msra.mxu1 %v1632_v2 }
  0xef   :  { %2140 = vmatprep.subr.mxu1 %v2654_v3 }
  0xf0   :  { %2141 = vmatpush3.msra.mxu1 %v1631_v4 }
  0xf1   :  { %2142 = vmatprep.subr.mxu1 %v2654_v3 }
  0xf2   :  { %2143 = vmatpush3.msra.mxu1 %v1630_v5 }
  0xf3   :  { %2144 = vmatprep.subr.mxu1 %v2654_v3 }
  0xf4   :  { %2145 = vmatpush3.msra.mxu1 %v1629_v6 }
  0xf5   :  { %2146 = vmatprep.subr.mxu1 %v2654_v3 }
  0xf6   :  { %2147 = vmatpush3.msra.mxu1 %v1628_v7 }
  0xf7   :  { %2148 = vmatprep.subr.mxu1 %v2654_v3 }
  0xf8   :  { %2149 = vmatpush3.msra.mxu1 %v1627_v8 }
  0xf9   :  { %2150 = vmatprep.subr.mxu1 %v2654_v3 }
  0xfa   :  { %2151 = vmatpush3.msra.mxu1 %v1626_v9 }
  0xfb   :  { %2152 = vmatprep.subr.mxu1 %v2654_v3 }
  0xfc   :  { %2153 = vmatpush3.msra.mxu1 %v1625_v10 }
  0xfd   :  { %2154 = vmatprep.subr.mxu1 %v2654_v3 }
  0xfe   :  { %2155 = vmatpush3.msra.mxu1 %v1624_v11 }
  0xff   :  { %2156 = vmatprep.subr.mxu1 %v2654_v3 }
 0x100   :  { %2157 = vmatpush3.msra.mxu1 %v1623_v12 }
 0x101   :  { %2158 = vmatprep.subr.mxu1 %v2654_v3 }
 0x102   :  { %2159 = vmatpush3.msra.mxu1 %v1622_v13 }
 0x103   :  { %2163 = vmatprep.subr.mxu1 %v2654_v3 }
 0x1a3   :  { %v208_v52 = vpop.f32.mrf.mxu1 }
 0x1a4   :  { %v214_v53 = vsel %vm213_vm1, -1e+30, %v208_v52 }
 0x1a5   :  { %v2057_v54 = vpop.f32.mrf.mxu1  ;;  %v216_v55 = vsel %vm215_vm2, %v214_v53, -inf }
 0x1a6   :  { %217 = vmax.xlane.f32.xlu0 %v216_v55  ;;  %v564_v54 = vld [vmem:[%s3612_s2 + $0x2] sm:$0x1] }
 0x1a7   :  { %vm565_vm4 = vcmp.ne.s32.totalorder %v564_v54, 0  ;;  %v842_v54 = vrot.slane %v2877_v50, 4 }
 0x22f   :  { %v218_v56 = vpop.xlane.xlu0 %217 }
 0x230   :  { %v219_v57 = vsub.f32 %v214_v53, %v218_v56 }
 0x232   :  { %v220_v58 = vmul.f32 1.442695, %v219_v57 }
 0x234   :  { %2620 = vpow2.f32 %v220_v58 }
 0x241   :  { %v2621_v59 = vpop.eup %2620 }
 0x242   :  { %v222_v60 = vsel %vm215_vm2, %v2621_v59, 0.0 }
 0x243   :  { %223 = vadd.xlane.f32.xlu0 %v222_v60 }
 0x2cc   :  { %v224_v14 = vpop.xlane.xlu0 %223 }
 0x2cd   :  { %2622 = vrcp.f32 %v224_v14  ;;  %v1656_v14 = vld [vmem:[%s3610_s1 + $0x190] sm:$0xff] }
 0x2da   :  { %v2623_v15 = vpop.eup %2622 }
 0x2db   :  { %v226_v16 = vmul.f32 %v2623_v15, %v2621_v59  ;;  %v1655_v15 = vld [vmem:[%s3610_s1 + $0x188] sm:$0xff] }
 0x2dd   :  { %227 = vst [vmem:[%s3613_s6] sm:$0x1] %v226_v16  ;;  %2091 = vmatmul.mubr.f32.vlgmr.msra.gmra.mxu0 %v226_v16  ;;  %v1654_v16 = vld [vmem:[%s3610_s1 + $0x180] sm:$0xff] }
 0x2de   :  { %2094 = vmatpush3.xpose.msra.mxu0 %v1637_v61  ;;  %2125 = vmatprep.mubr.msk.f32.mxu0 %vm2655_vm0, %v2654_v3 }
 0x2df   :  { %2095 = vmatprep.subr.mxu0 %v2654_v3 }
 0x2e2   :  { %2096 = vmatpush3.xpose.msra.mxu0 %v1636_v62 }
 0x2e3   :  { %2097 = vmatprep.subr.mxu0 %v2654_v3 }
 0x2e6   :  { %2098 = vmatpush3.xpose.msra.mxu0 %v1635_v63 }
 0x2e7   :  { %2099 = vmatprep.subr.mxu0 %v2654_v3 }
 0x2ea   :  { %2100 = vmatpush3.xpose.msra.mxu0 %v1634_v0  ;;  %v1669_v0 = vld [vmem:[%s3610_s1 + $0x1f8] sm:$0xff] }
 0x2eb   :  { %2101 = vmatprep.subr.mxu0 %v2654_v3 }
 0x2ee   :  { %2102 = vmatpush3.xpose.msra.mxu0 %v1633_v1  ;;  %v1668_v1 = vld [vmem:[%s3610_s1 + $0x1f0] sm:$0xff] }
 0x2ef   :  { %2103 = vmatprep.subr.mxu0 %v2654_v3 }
 0x2f2   :  { %2104 = vmatpush3.xpose.msra.mxu0 %v1632_v2  ;;  %v1667_v2 = vld [vmem:[%s3610_s1 + $0x1e8] sm:$0xff] }
 0x2f3   :  { %2105 = vmatprep.subr.mxu0 %v2654_v3 }
 0x2f6   :  { %2106 = vmatpush3.xpose.msra.mxu0 %v1631_v4  ;;  %v1666_v4 = vld [vmem:[%s3610_s1 + $0x1e0] sm:$0xff] }
 0x2f7   :  { %2107 = vmatprep.subr.mxu0 %v2654_v3 }
 0x2fa   :  { %2108 = vmatpush3.xpose.msra.mxu0 %v1630_v5  ;;  %v1665_v5 = vld [vmem:[%s3610_s1 + $0x1d8] sm:$0xff] }
 0x2fb   :  { %2109 = vmatprep.subr.mxu0 %v2654_v3 }
 0x2fe   :  { %2110 = vmatpush3.xpose.msra.mxu0 %v1629_v6  ;;  %v1664_v6 = vld [vmem:[%s3610_s1 + $0x1d0] sm:$0xff] }
 0x2ff   :  { %2111 = vmatprep.subr.mxu0 %v2654_v3 }
 0x302   :  { %2112 = vmatpush3.xpose.msra.mxu0 %v1628_v7  ;;  %v1663_v7 = vld [vmem:[%s3610_s1 + $0x1c8] sm:$0xff] }
 0x303   :  { %2113 = vmatprep.subr.mxu0 %v2654_v3 }
 0x306   :  { %2114 = vmatpush3.xpose.msra.mxu0 %v1627_v8  ;;  %v1662_v8 = vld [vmem:[%s3610_s1 + $0x1c0] sm:$0xff] }
 0x307   :  { %2115 = vmatprep.subr.mxu0 %v2654_v3 }
 0x30a   :  { %2116 = vmatpush3.xpose.msra.mxu0 %v1626_v9  ;;  %v1661_v9 = vld [vmem:[%s3610_s1 + $0x1b8] sm:$0xff] }
 0x30b   :  { %2117 = vmatprep.subr.mxu0 %v2654_v3 }
 0x30e   :  { %2118 = vmatpush3.xpose.msra.mxu0 %v1625_v10  ;;  %v1660_v10 = vld [vmem:[%s3610_s1 + $0x1b0] sm:$0xff] }
 0x30f   :  { %2119 = vmatprep.subr.mxu0 %v2654_v3 }
 0x312   :  { %2120 = vmatpush3.xpose.msra.mxu0 %v1624_v11  ;;  %v1659_v11 = vld [vmem:[%s3610_s1 + $0x1a8] sm:$0xff] }
 0x313   :  { %2121 = vmatprep.subr.mxu0 %v2654_v3 }
 0x316   :  { %2122 = vmatpush3.xpose.msra.mxu0 %v1623_v12  ;;  %v1658_v12 = vld [vmem:[%s3610_s1 + $0x1a0] sm:$0xff] }
 0x317   :  { %2123 = vmatprep.subr.mxu0 %v2654_v3 }
 0x31a   :  { %2124 = vmatpush3.xpose.msra.mxu0 %v1622_v13  ;;  %v1657_v13 = vld [vmem:[%s3610_s1 + $0x198] sm:$0xff] }
 0x31b   :  { %2198 = vmatprep.subr.mxu0 %v2654_v3 }
 0x31d   :  { %2126 = vmatmul.mubr.f32.vlgmr.msra.gmra.mxu0 %v317_v17 }
 0x31e   :  { %2230 = vmatprep.mubr.msk.f32.mxu0 %vm2655_vm0, %v2654_v3  ;;  %2199 = vmatpush3.msra.mxu0 %v1653_v31 }
 0x31f   :  { %2200 = vmatprep.subr.mxu0 %v2654_v3 }
 0x320   :  { %2201 = vmatpush3.msra.mxu0 %v1652_v32 }
 0x321   :  { %2202 = vmatprep.subr.mxu0 %v2654_v3 }
 0x322   :  { %2203 = vmatpush3.msra.mxu0 %v1651_v33 }
 0x323   :  { %2204 = vmatprep.subr.mxu0 %v2654_v3 }
 0x324   :  { %2205 = vmatpush3.msra.mxu0 %v1650_v34 }
 0x325   :  { %2206 = vmatprep.subr.mxu0 %v2654_v3 }
 0x326   :  { %2207 = vmatpush3.msra.mxu0 %v1649_v35 }
 0x327   :  { %2208 = vmatprep.subr.mxu0 %v2654_v3 }
 0x328   :  { %2209 = vmatpush3.msra.mxu0 %v1648_v36 }
 0x329   :  { %2210 = vmatprep.subr.mxu0 %v2654_v3 }
 0x32a   :  { %2211 = vmatpush3.msra.mxu0 %v1647_v37 }
 0x32b   :  { %2212 = vmatprep.subr.mxu0 %v2654_v3 }
 0x32c   :  { %2213 = vmatpush3.msra.mxu0 %v1646_v38 }
 0x32d   :  { %2214 = vmatprep.subr.mxu0 %v2654_v3 }
 0x32e   :  { %2215 = vmatpush3.msra.mxu0 %v1645_v39 }
 0x32f   :  { %2216 = vmatprep.subr.mxu0 %v2654_v3 }
 0x330   :  { %2217 = vmatpush3.msra.mxu0 %v1644_v40 }
 0x331   :  { %2218 = vmatprep.subr.mxu0 %v2654_v3 }
 0x332   :  { %2219 = vmatpush3.msra.mxu0 %v1643_v41 }
 0x333   :  { %2220 = vmatprep.subr.mxu0 %v2654_v3 }
 0x334   :  { %2221 = vmatpush3.msra.mxu0 %v1642_v42 }
 0x335   :  { %2222 = vmatprep.subr.mxu0 %v2654_v3 }
 0x336   :  { %2223 = vmatpush3.msra.mxu0 %v1641_v43 }
 0x337   :  { %2224 = vmatprep.subr.mxu0 %v2654_v3 }
 0x338   :  { %2225 = vmatpush3.msra.mxu0 %v1640_v44 }
 0x339   :  { %2226 = vmatprep.subr.mxu0 %v2654_v3 }
 0x33a   :  { %2227 = vmatpush3.msra.mxu0 %v1639_v45 }
 0x33b   :  { %2228 = vmatprep.subr.mxu0 %v2654_v3 }
 0x33c   :  { %2229 = vmatpush3.msra.mxu0 %v1638_v46 }
 0x33d   :  { %2233 = vmatprep.subr.mxu0 %v2654_v3 }
 0x39d   :  { %v294_v19 = vpop.f32.mrf.mxu0 }
 0x39e   :  { %298 = vst [vmem:[#allocation2] sm:$0x1] %v294_v19 }
 0x39f   :  { %v2092_v20 = vpop.f32.mrf.mxu0 }
 0x3dd   :  { %v385_v22 = vpop.f32.mrf.mxu0 }
 0x3de   :  { %v391_v23 = vsel %vm390_vm3, -1e+30, %v385_v22 }
 0x3df   :  { %v2127_v24 = vpop.f32.mrf.mxu0  ;;  %v392_v25 = vsel %vm215_vm2, %v391_v23, -inf }
 0x3e0   :  { %393 = vmax.xlane.f32.xlu1 %v392_v25  ;;  %v739_v24 = vld [vmem:[%s3612_s2 + $0x3] sm:$0x1] }
 0x3e1   :  { %vm740_vm5 = vcmp.ne.s32.totalorder %v739_v24, 0  ;;  %v1017_v24 = vrot.slane %v2877_v50, 5 }
 0x469   :  { %v394_v26 = vpop.xlane.xlu1 %393 }
 0x46a   :  { %v395_v27 = vsub.f32 %v391_v23, %v394_v26 }
 0x46c   :  { %v396_v28 = vmul.f32 1.442695, %v395_v27 }
 0x46e   :  { %2624 = vpow2.f32 %v396_v28 }
 0x47b   :  { %v2625_v29 = vpop.eup %2624 }
 0x47c   :  { %v398_v30 = vsel %vm215_vm2, %v2625_v29, 0.0 }
 0x47d   :  { %399 = vadd.xlane.f32.xlu1 %v398_v30 }
 0x506   :  { %v400_v47 = vpop.xlane.xlu1 %399 }
 0x507   :  { %2626 = vrcp.f32 %v400_v47  ;;  %v1672_v47 = vld [vmem:[%s3610_s1 + $0x210] sm:$0xff] }
 0x514   :  { %v2627_v48 = vpop.eup %2626 }
 0x515   :  { %v402_v49 = vmul.f32 %v2627_v48, %v2625_v29  ;;  %v1671_v48 = vld [vmem:[%s3610_s1 + $0x208] sm:$0xff] }
 0x517   :  { %403 = vst [vmem:[%s3613_s6 + $0x1] sm:$0x1] %v402_v49  ;;  %2161 = vmatmul.mubr.f32.vlgmr.msra.gmra.mxu1 %v402_v49  ;;  %v1670_v49 = vld [vmem:[%s3610_s1 + $0x200] sm:$0xff] }
 0x518   :  { %2164 = vmatpush3.xpose.msra.mxu1 %v1653_v31  ;;  %2195 = vmatprep.mubr.msk.f32.mxu1 %vm2655_vm0, %v2654_v3 }
 0x519   :  { %2165 = vmatprep.subr.mxu1 %v2654_v3 }
 0x51c   :  { %2166 = vmatpush3.xpose.msra.mxu1 %v1652_v32 }
 0x51d   :  { %2167 = vmatprep.subr.mxu1 %v2654_v3 }
 0x520   :  { %2168 = vmatpush3.xpose.msra.mxu1 %v1651_v33 }
 0x521   :  { %2169 = vmatprep.subr.mxu1 %v2654_v3 }
 0x524   :  { %2170 = vmatpush3.xpose.msra.mxu1 %v1650_v34  ;;  %v1685_v34 = vld [vmem:[%s3610_s1 + $0x278] sm:$0xff] }
 0x525   :  { %2171 = vmatprep.subr.mxu1 %v2654_v3 }
 0x528   :  { %2172 = vmatpush3.xpose.msra.mxu1 %v1649_v35  ;;  %v1684_v35 = vld [vmem:[%s3610_s1 + $0x270] sm:$0xff] }
 0x529   :  { %2173 = vmatprep.subr.mxu1 %v2654_v3 }
 0x52c   :  { %2174 = vmatpush3.xpose.msra.mxu1 %v1648_v36  ;;  %v1683_v36 = vld [vmem:[%s3610_s1 + $0x268] sm:$0xff] }
 0x52d   :  { %2175 = vmatprep.subr.mxu1 %v2654_v3 }
 0x530   :  { %2176 = vmatpush3.xpose.msra.mxu1 %v1647_v37  ;;  %v1682_v37 = vld [vmem:[%s3610_s1 + $0x260] sm:$0xff] }
 0x531   :  { %2177 = vmatprep.subr.mxu1 %v2654_v3 }
 0x534   :  { %2178 = vmatpush3.xpose.msra.mxu1 %v1646_v38  ;;  %v1681_v38 = vld [vmem:[%s3610_s1 + $0x258] sm:$0xff] }
 0x535   :  { %2179 = vmatprep.subr.mxu1 %v2654_v3 }
 0x538   :  { %2180 = vmatpush3.xpose.msra.mxu1 %v1645_v39  ;;  %v1680_v39 = vld [vmem:[%s3610_s1 + $0x250] sm:$0xff] }
 0x539   :  { %2181 = vmatprep.subr.mxu1 %v2654_v3 }
 0x53c   :  { %2182 = vmatpush3.xpose.msra.mxu1 %v1644_v40  ;;  %v1679_v40 = vld [vmem:[%s3610_s1 + $0x248] sm:$0xff] }
 0x53d   :  { %2183 = vmatprep.subr.mxu1 %v2654_v3 }
 0x540   :  { %2184 = vmatpush3.xpose.msra.mxu1 %v1643_v41  ;;  %v1678_v41 = vld [vmem:[%s3610_s1 + $0x240] sm:$0xff] }
 0x541   :  { %2185 = vmatprep.subr.mxu1 %v2654_v3 }
 0x544   :  { %2186 = vmatpush3.xpose.msra.mxu1 %v1642_v42  ;;  %v1677_v42 = vld [vmem:[%s3610_s1 + $0x238] sm:$0xff] }
 0x545   :  { %2187 = vmatprep.subr.mxu1 %v2654_v3 }
 0x548   :  { %2188 = vmatpush3.xpose.msra.mxu1 %v1641_v43  ;;  %v1676_v43 = vld [vmem:[%s3610_s1 + $0x230] sm:$0xff] }
 0x549   :  { %2189 = vmatprep.subr.mxu1 %v2654_v3 }
 0x54c   :  { %2190 = vmatpush3.xpose.msra.mxu1 %v1640_v44  ;;  %v1675_v44 = vld [vmem:[%s3610_s1 + $0x228] sm:$0xff] }
 0x54d   :  { %2191 = vmatprep.subr.mxu1 %v2654_v3 }
 0x550   :  { %2192 = vmatpush3.xpose.msra.mxu1 %v1639_v45  ;;  %v1674_v45 = vld [vmem:[%s3610_s1 + $0x220] sm:$0xff] }
 0x551   :  { %2193 = vmatprep.subr.mxu1 %v2654_v3 }
 0x554   :  { %2194 = vmatpush3.xpose.msra.mxu1 %v1638_v46  ;;  %v1673_v46 = vld [vmem:[%s3610_s1 + $0x218] sm:$0xff] }
 0x555   :  { %2268 = vmatprep.subr.mxu1 %v2654_v3 }
 0x557   :  { %2196 = vmatmul.mubr.f32.vlgmr.msra.gmra.mxu1 %v492_v51 }
 0x558   :  { %2300 = vmatprep.mubr.msk.f32.mxu1 %vm2655_vm0, %v2654_v3  ;;  %2269 = vmatpush3.msra.mxu1 %v1669_v0 }
 0x559   :  { %2270 = vmatprep.subr.mxu1 %v2654_v3 }
 0x55a   :  { %2271 = vmatpush3.msra.mxu1 %v1668_v1 }
 0x55b   :  { %2272 = vmatprep.subr.mxu1 %v2654_v3 }
 0x55c   :  { %2273 = vmatpush3.msra.mxu1 %v1667_v2 }
 0x55d   :  { %2274 = vmatprep.subr.mxu1 %v2654_v3 }
 0x55e   :  { %2275 = vmatpush3.msra.mxu1 %v1666_v4 }
 0x55f   :  { %2276 = vmatprep.subr.mxu1 %v2654_v3 }
 0x560   :  { %2277 = vmatpush3.msra.mxu1 %v1665_v5 }
 0x561   :  { %2278 = vmatprep.subr.mxu1 %v2654_v3 }
 0x562   :  { %2279 = vmatpush3.msra.mxu1 %v1664_v6 }
 0x563   :  { %2280 = vmatprep.subr.mxu1 %v2654_v3 }
 0x564   :  { %2281 = vmatpush3.msra.mxu1 %v1663_v7 }
 0x565   :  { %2282 = vmatprep.subr.mxu1 %v2654_v3 }
 0x566   :  { %2283 = vmatpush3.msra.mxu1 %v1662_v8 }
 0x567   :  { %2284 = vmatprep.subr.mxu1 %v2654_v3 }
 0x568   :  { %2285 = vmatpush3.msra.mxu1 %v1661_v9 }
 0x569   :  { %2286 = vmatprep.subr.mxu1 %v2654_v3 }
 0x56a   :  { %2287 = vmatpush3.msra.mxu1 %v1660_v10 }
 0x56b   :  { %2288 = vmatprep.subr.mxu1 %v2654_v3 }
 0x56c   :  { %2289 = vmatpush3.msra.mxu1 %v1659_v11 }
 0x56d   :  { %2290 = vmatprep.subr.mxu1 %v2654_v3 }
 0x56e   :  { %2291 = vmatpush3.msra.mxu1 %v1658_v12 }
 0x56f   :  { %2292 = vmatprep.subr.mxu1 %v2654_v3 }
 0x570   :  { %2293 = vmatpush3.msra.mxu1 %v1657_v13 }
 0x571   :  { %2294 = vmatprep.subr.mxu1 %v2654_v3 }
 0x572   :  { %2295 = vmatpush3.msra.mxu1 %v1656_v14 }
 0x573   :  { %2296 = vmatprep.subr.mxu1 %v2654_v3 }
 0x574   :  { %2297 = vmatpush3.msra.mxu1 %v1655_v15 }
 0x575   :  { %2298 = vmatprep.subr.mxu1 %v2654_v3 }
 0x576   :  { %2299 = vmatpush3.msra.mxu1 %v1654_v16 }
 0x577   :  { %2303 = vmatprep.subr.mxu1 %v2654_v3 }
 0x5d7   :  { %v470_v52 = vpop.f32.mrf.mxu1 }
 0x5d8   :  { %474 = vst [vmem:[#allocation2 + $0x1] sm:$0x1] %v470_v52 }
 0x5d9   :  { %v2162_v53 = vpop.f32.mrf.mxu1 }
 0x617   :  { %v560_v55 = vpop.f32.mrf.mxu1 }
 0x618   :  { %v566_v56 = vsel %vm565_vm4, -1e+30, %v560_v55 }
 0x619   :  { %v2197_v57 = vpop.f32.mrf.mxu1  ;;  %v567_v58 = vsel %vm215_vm2, %v566_v56, -inf }
 0x61a   :  { %568 = vmax.xlane.f32.xlu0 %v567_v58  ;;  %v914_v57 = vld [vmem:[%s3612_s2 + $0x4] sm:$0x1] }
 0x61b   :  { %vm915_vm6 = vcmp.ne.s32.totalorder %v914_v57, 0  ;;  %v1192_v57 = vrot.slane %v2877_v50, 6 }
 0x6a3   :  { %v569_v59 = vpop.xlane.xlu0 %568 }
 0x6a4   :  { %v570_v60 = vsub.f32 %v566_v56, %v569_v59 }
 0x6a6   :  { %v571_v61 = vmul.f32 1.442695, %v570_v60 }
 0x6a8   :  { %2628 = vpow2.f32 %v571_v61 }
 0x6b5   :  { %v2629_v62 = vpop.eup %2628 }
 0x6b6   :  { %v573_v63 = vsel %vm215_vm2, %v2629_v62, 0.0 }
 0x6b7   :  { %574 = vadd.xlane.f32.xlu1 %v573_v63 }
 0x740   :  { %v575_v17 = vpop.xlane.xlu1 %574 }
 0x741   :  { %2630 = vrcp.f32 %v575_v17  ;;  %v1688_v17 = vld [vmem:[%s3610_s1 + $0x290] sm:$0xff] }
 0x74e   :  { %v2631_v19 = vpop.eup %2630 }
 0x74f   :  { %v577_v20 = vmul.f32 %v2631_v19, %v2629_v62  ;;  %v1687_v19 = vld [vmem:[%s3610_s1 + $0x288] sm:$0xff] }
 0x751   :  { %578 = vst [vmem:[%s3613_s6 + $0x2] sm:$0x1] %v577_v20  ;;  %2231 = vmatmul.mubr.f32.vlgmr.msra.gmra.mxu0 %v577_v20  ;;  %v1686_v20 = vld [vmem:[%s3610_s1 + $0x280] sm:$0xff] }
 0x752   :  { %2234 = vmatpush3.xpose.msra.mxu0 %v1669_v0  ;;  %2265 = vmatprep.mubr.msk.f32.mxu0 %vm2655_vm0, %v2654_v3 }
 0x753   :  { %2235 = vmatprep.subr.mxu0 %v2654_v3 }
 0x756   :  { %2236 = vmatpush3.xpose.msra.mxu0 %v1668_v1 }
 0x757   :  { %2237 = vmatprep.subr.mxu0 %v2654_v3 }
 0x75a   :  { %2238 = vmatpush3.xpose.msra.mxu0 %v1667_v2 }
 0x75b   :  { %2239 = vmatprep.subr.mxu0 %v2654_v3 }
 0x75e   :  { %2240 = vmatpush3.xpose.msra.mxu0 %v1666_v4  ;;  %v1701_v4 = vld [vmem:[%s3610_s1 + $0x2f8] sm:$0xff] }
 0x75f   :  { %2241 = vmatprep.subr.mxu0 %v2654_v3 }
 0x762   :  { %2242 = vmatpush3.xpose.msra.mxu0 %v1665_v5  ;;  %v1700_v5 = vld [vmem:[%s3610_s1 + $0x2f0] sm:$0xff] }
 0x763   :  { %2243 = vmatprep.subr.mxu0 %v2654_v3 }
 0x766   :  { %2244 = vmatpush3.xpose.msra.mxu0 %v1664_v6  ;;  %v1699_v6 = vld [vmem:[%s3610_s1 + $0x2e8] sm:$0xff] }
 0x767   :  { %2245 = vmatprep.subr.mxu0 %v2654_v3 }
 0x76a   :  { %2246 = vmatpush3.xpose.msra.mxu0 %v1663_v7  ;;  %v1698_v7 = vld [vmem:[%s3610_s1 + $0x2e0] sm:$0xff] }
 0x76b   :  { %2247 = vmatprep.subr.mxu0 %v2654_v3 }
 0x76e   :  { %2248 = vmatpush3.xpose.msra.mxu0 %v1662_v8  ;;  %v1697_v8 = vld [vmem:[%s3610_s1 + $0x2d8] sm:$0xff] }
 0x76f   :  { %2249 = vmatprep.subr.mxu0 %v2654_v3 }
 0x772   :  { %2250 = vmatpush3.xpose.msra.mxu0 %v1661_v9  ;;  %v1696_v9 = vld [vmem:[%s3610_s1 + $0x2d0] sm:$0xff] }
 0x773   :  { %2251 = vmatprep.subr.mxu0 %v2654_v3 }
 0x776   :  { %2252 = vmatpush3.xpose.msra.mxu0 %v1660_v10  ;;  %v1695_v10 = vld [vmem:[%s3610_s1 + $0x2c8] sm:$0xff] }
 0x777   :  { %2253 = vmatprep.subr.mxu0 %v2654_v3 }
 0x77a   :  { %2254 = vmatpush3.xpose.msra.mxu0 %v1659_v11  ;;  %v1694_v11 = vld [vmem:[%s3610_s1 + $0x2c0] sm:$0xff] }
 0x77b   :  { %2255 = vmatprep.subr.mxu0 %v2654_v3 }
 0x77e   :  { %2256 = vmatpush3.xpose.msra.mxu0 %v1658_v12  ;;  %v1693_v12 = vld [vmem:[%s3610_s1 + $0x2b8] sm:$0xff] }
 0x77f   :  { %2257 = vmatprep.subr.mxu0 %v2654_v3 }
 0x782   :  { %2258 = vmatpush3.xpose.msra.mxu0 %v1657_v13  ;;  %v1692_v13 = vld [vmem:[%s3610_s1 + $0x2b0] sm:$0xff] }
 0x783   :  { %2259 = vmatprep.subr.mxu0 %v2654_v3 }
 0x786   :  { %2260 = vmatpush3.xpose.msra.mxu0 %v1656_v14  ;;  %v1691_v14 = vld [vmem:[%s3610_s1 + $0x2a8] sm:$0xff] }
 0x787   :  { %2261 = vmatprep.subr.mxu0 %v2654_v3 }
 0x78a   :  { %2262 = vmatpush3.xpose.msra.mxu0 %v1655_v15  ;;  %v1690_v15 = vld [vmem:[%s3610_s1 + $0x2a0] sm:$0xff] }
 0x78b   :  { %2263 = vmatprep.subr.mxu0 %v2654_v3 }
 0x78e   :  { %2264 = vmatpush3.xpose.msra.mxu0 %v1654_v16  ;;  %v1689_v16 = vld [vmem:[%s3610_s1 + $0x298] sm:$0xff] }
 0x78f   :  { %2338 = vmatprep.subr.mxu0 %v2654_v3 }
 0x791   :  { %2266 = vmatmul.mubr.f32.vlgmr.msra.gmra.mxu0 %v667_v21 }
 0x792   :  { %2370 = vmatprep.mubr.msk.f32.mxu0 %vm2655_vm0, %v2654_v3  ;;  %2339 = vmatpush3.msra.mxu0 %v1685_v34 }
 0x793   :  { %2340 = vmatprep.subr.mxu0 %v2654_v3 }
 0x794   :  { %2341 = vmatpush3.msra.mxu0 %v1684_v35 }
 0x795   :  { %2342 = vmatprep.subr.mxu0 %v2654_v3 }
 0x796   :  { %2343 = vmatpush3.msra.mxu0 %v1683_v36 }
 0x797   :  { %2344 = vmatprep.subr.mxu0 %v2654_v3 }
 0x798   :  { %2345 = vmatpush3.msra.mxu0 %v1682_v37 }
 0x799   :  { %2346 = vmatprep.subr.mxu0 %v2654_v3 }
 0x79a   :  { %2347 = vmatpush3.msra.mxu0 %v1681_v38 }
 0x79b   :  { %2348 = vmatprep.subr.mxu0 %v2654_v3 }
 0x79c   :  { %2349 = vmatpush3.msra.mxu0 %v1680_v39 }
 0x79d   :  { %2350 = vmatprep.subr.mxu0 %v2654_v3 }
 0x79e   :  { %2351 = vmatpush3.msra.mxu0 %v1679_v40 }
 0x79f   :  { %2352 = vmatprep.subr.mxu0 %v2654_v3 }
 0x7a0   :  { %2353 = vmatpush3.msra.mxu0 %v1678_v41 }
 0x7a1   :  { %2354 = vmatprep.subr.mxu0 %v2654_v3 }
 0x7a2   :  { %2355 = vmatpush3.msra.mxu0 %v1677_v42 }
 0x7a3   :  { %2356 = vmatprep.subr.mxu0 %v2654_v3 }
 0x7a4   :  { %2357 = vmatpush3.msra.mxu0 %v1676_v43 }
 0x7a5   :  { %2358 = vmatprep.subr.mxu0 %v2654_v3 }
 0x7a6   :  { %2359 = vmatpush3.msra.mxu0 %v1675_v44 }
 0x7a7   :  { %2360 = vmatprep.subr.mxu0 %v2654_v3 }
 0x7a8   :  { %2361 = vmatpush3.msra.mxu0 %v1674_v45 }
 0x7a9   :  { %2362 = vmatprep.subr.mxu0 %v2654_v3 }
 0x7aa   :  { %2363 = vmatpush3.msra.mxu0 %v1673_v46 }
 0x7ab   :  { %2364 = vmatprep.subr.mxu0 %v2654_v3 }
 0x7ac   :  { %2365 = vmatpush3.msra.mxu0 %v1672_v47 }
 0x7ad   :  { %2366 = vmatprep.subr.mxu0 %v2654_v3 }
 0x7ae   :  { %2367 = vmatpush3.msra.mxu0 %v1671_v48 }
 0x7af   :  { %2368 = vmatprep.subr.mxu0 %v2654_v3 }
 0x7b0   :  { %2369 = vmatpush3.msra.mxu0 %v1670_v49 }
 0x7b1   :  { %2373 = vmatprep.subr.mxu0 %v2654_v3 }
 0x811   :  { %v645_v22 = vpop.f32.mrf.mxu0 }
 0x812   :  { %649 = vst [vmem:[#allocation2 + $0x2] sm:$0x1] %v645_v22 }
 0x813   :  { %v2232_v23 = vpop.f32.mrf.mxu0 }
 0x851   :  { %v735_v25 = vpop.f32.mrf.mxu0 }
 0x852   :  { %v741_v26 = vsel %vm740_vm5, -1e+30, %v735_v25 }
 0x853   :  { %v2267_v27 = vpop.f32.mrf.mxu0  ;;  %v742_v28 = vsel %vm215_vm2, %v741_v26, -inf }
 0x854   :  { %743 = vmax.xlane.f32.xlu0 %v742_v28  ;;  %v1089_v27 = vld [vmem:[%s3612_s2 + $0x5] sm:$0x1] }
 0x855   :  { %vm1090_vm7 = vcmp.ne.s32.totalorder %v1089_v27, 0  ;;  %v1367_v27 = vrot.slane %v2877_v50, 7 }
 0x8dd   :  { %v744_v29 = vpop.xlane.xlu0 %743 }
 0x8de   :  { %v745_v30 = vsub.f32 %v741_v26, %v744_v29 }
 0x8e0   :  { %v746_v31 = vmul.f32 1.442695, %v745_v30 }
 0x8e2   :  { %2632 = vpow2.f32 %v746_v31 }
 0x8ef   :  { %v2633_v32 = vpop.eup %2632 }
 0x8f0   :  { %v748_v33 = vsel %vm215_vm2, %v2633_v32, 0.0 }
 0x8f1   :  { %749 = vadd.xlane.f32.xlu1 %v748_v33 }
 0x97a   :  { %v750_v51 = vpop.xlane.xlu1 %749 }
 0x97b   :  { %2634 = vrcp.f32 %v750_v51  ;;  %v1704_v51 = vld [vmem:[%s3610_s1 + $0x310] sm:$0xff] }
 0x988   :  { %v2635_v52 = vpop.eup %2634 }
 0x989   :  { %v752_v53 = vmul.f32 %v2635_v52, %v2633_v32  ;;  %v1703_v52 = vld [vmem:[%s3610_s1 + $0x308] sm:$0xff] }
 0x98b   :  { %753 = vst [vmem:[%s3613_s6 + $0x3] sm:$0x1] %v752_v53  ;;  %2301 = vmatmul.mubr.f32.vlgmr.msra.gmra.mxu1 %v752_v53  ;;  %v1702_v53 = vld [vmem:[%s3610_s1 + $0x300] sm:$0xff] }
 0x98c   :  { %2304 = vmatpush3.xpose.msra.mxu1 %v1685_v34  ;;  %2335 = vmatprep.mubr.msk.f32.mxu1 %vm2655_vm0, %v2654_v3 }
 0x98d   :  { %2305 = vmatprep.subr.mxu1 %v2654_v3 }
 0x990   :  { %2306 = vmatpush3.xpose.msra.mxu1 %v1684_v35 }
 0x991   :  { %2307 = vmatprep.subr.mxu1 %v2654_v3 }
 0x994   :  { %2308 = vmatpush3.xpose.msra.mxu1 %v1683_v36 }
 0x995   :  { %2309 = vmatprep.subr.mxu1 %v2654_v3 }
 0x998   :  { %2310 = vmatpush3.xpose.msra.mxu1 %v1682_v37  ;;  %v1717_v37 = vld [vmem:[%s3610_s1 + $0x378] sm:$0xff] }
 0x999   :  { %2311 = vmatprep.subr.mxu1 %v2654_v3 }
 0x99c   :  { %2312 = vmatpush3.xpose.msra.mxu1 %v1681_v38  ;;  %v1716_v38 = vld [vmem:[%s3610_s1 + $0x370] sm:$0xff] }
 0x99d   :  { %2313 = vmatprep.subr.mxu1 %v2654_v3 }
 0x9a0   :  { %2314 = vmatpush3.xpose.msra.mxu1 %v1680_v39  ;;  %v1715_v39 = vld [vmem:[%s3610_s1 + $0x368] sm:$0xff] }
 0x9a1   :  { %2315 = vmatprep.subr.mxu1 %v2654_v3 }
 0x9a4   :  { %2316 = vmatpush3.xpose.msra.mxu1 %v1679_v40  ;;  %v1714_v40 = vld [vmem:[%s3610_s1 + $0x360] sm:$0xff] }
 0x9a5   :  { %2317 = vmatprep.subr.mxu1 %v2654_v3 }
 0x9a8   :  { %2318 = vmatpush3.xpose.msra.mxu1 %v1678_v41  ;;  %v1713_v41 = vld [vmem:[%s3610_s1 + $0x358] sm:$0xff] }
 0x9a9   :  { %2319 = vmatprep.subr.mxu1 %v2654_v3 }
 0x9ac   :  { %2320 = vmatpush3.xpose.msra.mxu1 %v1677_v42  ;;  %v1712_v42 = vld [vmem:[%s3610_s1 + $0x350] sm:$0xff] }
 0x9ad   :  { %2321 = vmatprep.subr.mxu1 %v2654_v3 }
 0x9b0   :  { %2322 = vmatpush3.xpose.msra.mxu1 %v1676_v43  ;;  %v1711_v43 = vld [vmem:[%s3610_s1 + $0x348] sm:$0xff] }
 0x9b1   :  { %2323 = vmatprep.subr.mxu1 %v2654_v3 }
 0x9b4   :  { %2324 = vmatpush3.xpose.msra.mxu1 %v1675_v44  ;;  %v1710_v44 = vld [vmem:[%s3610_s1 + $0x340] sm:$0xff] }
 0x9b5   :  { %2325 = vmatprep.subr.mxu1 %v2654_v3 }
 0x9b8   :  { %2326 = vmatpush3.xpose.msra.mxu1 %v1674_v45  ;;  %v1709_v45 = vld [vmem:[%s3610_s1 + $0x338] sm:$0xff] }
 0x9b9   :  { %2327 = vmatprep.subr.mxu1 %v2654_v3 }
 0x9bc   :  { %2328 = vmatpush3.xpose.msra.mxu1 %v1673_v46  ;;  %v1708_v46 = vld [vmem:[%s3610_s1 + $0x330] sm:$0xff] }
 0x9bd   :  { %2329 = vmatprep.subr.mxu1 %v2654_v3 }
 0x9c0   :  { %2330 = vmatpush3.xpose.msra.mxu1 %v1672_v47  ;;  %v1707_v47 = vld [vmem:[%s3610_s1 + $0x328] sm:$0xff] }
 0x9c1   :  { %2331 = vmatprep.subr.mxu1 %v2654_v3 }
 0x9c4   :  { %2332 = vmatpush3.xpose.msra.mxu1 %v1671_v48  ;;  %v1706_v48 = vld [vmem:[%s3610_s1 + $0x320] sm:$0xff] }
 0x9c5   :  { %2333 = vmatprep.subr.mxu1 %v2654_v3 }
 0x9c8   :  { %2334 = vmatpush3.xpose.msra.mxu1 %v1670_v49  ;;  %v1705_v49 = vld [vmem:[%s3610_s1 + $0x318] sm:$0xff] }
 0x9c9   :  { %2408 = vmatprep.subr.mxu1 %v2654_v3 }
 0x9cb   :  { %2336 = vmatmul.mubr.f32.vlgmr.msra.gmra.mxu1 %v842_v54 }
 0x9cc   :  { %2440 = vmatprep.mubr.msk.f32.mxu1 %vm2655_vm0, %v2654_v3  ;;  %2409 = vmatpush3.msra.mxu1 %v1701_v4 }
 0x9cd   :  { %2410 = vmatprep.subr.mxu1 %v2654_v3 }
 0x9ce   :  { %2411 = vmatpush3.msra.mxu1 %v1700_v5 }
 0x9cf   :  { %2412 = vmatprep.subr.mxu1 %v2654_v3 }
 0x9d0   :  { %2413 = vmatpush3.msra.mxu1 %v1699_v6 }
 0x9d1   :  { %2414 = vmatprep.subr.mxu1 %v2654_v3 }
 0x9d2   :  { %2415 = vmatpush3.msra.mxu1 %v1698_v7 }
 0x9d3   :  { %2416 = vmatprep.subr.mxu1 %v2654_v3 }
 0x9d4   :  { %2417 = vmatpush3.msra.mxu1 %v1697_v8 }
 0x9d5   :  { %2418 = vmatprep.subr.mxu1 %v2654_v3 }
 0x9d6   :  { %2419 = vmatpush3.msra.mxu1 %v1696_v9 }
 0x9d7   :  { %2420 = vmatprep.subr.mxu1 %v2654_v3 }
 0x9d8   :  { %2421 = vmatpush3.msra.mxu1 %v1695_v10 }
 0x9d9   :  { %2422 = vmatprep.subr.mxu1 %v2654_v3 }
 0x9da   :  { %2423 = vmatpush3.msra.mxu1 %v1694_v11 }
 0x9db   :  { %2424 = vmatprep.subr.mxu1 %v2654_v3 }
 0x9dc   :  { %2425 = vmatpush3.msra.mxu1 %v1693_v12 }
 0x9dd   :  { %2426 = vmatprep.subr.mxu1 %v2654_v3 }
 0x9de   :  { %2427 = vmatpush3.msra.mxu1 %v1692_v13 }
 0x9df   :  { %2428 = vmatprep.subr.mxu1 %v2654_v3 }
 0x9e0   :  { %2429 = vmatpush3.msra.mxu1 %v1691_v14 }
 0x9e1   :  { %2430 = vmatprep.subr.mxu1 %v2654_v3 }
 0x9e2   :  { %2431 = vmatpush3.msra.mxu1 %v1690_v15 }
 0x9e3   :  { %2432 = vmatprep.subr.mxu1 %v2654_v3 }
 0x9e4   :  { %2433 = vmatpush3.msra.mxu1 %v1689_v16 }
 0x9e5   :  { %2434 = vmatprep.subr.mxu1 %v2654_v3 }
 0x9e6   :  { %2435 = vmatpush3.msra.mxu1 %v1688_v17 }
 0x9e7   :  { %2436 = vmatprep.subr.mxu1 %v2654_v3 }
 0x9e8   :  { %2437 = vmatpush3.msra.mxu1 %v1687_v19 }
 0x9e9   :  { %2438 = vmatprep.subr.mxu1 %v2654_v3 }
 0x9ea   :  { %2439 = vmatpush3.msra.mxu1 %v1686_v20 }
 0x9eb   :  { %2443 = vmatprep.subr.mxu1 %v2654_v3 }
 0xa4b   :  { %v820_v55 = vpop.f32.mrf.mxu1 }
 0xa4c   :  { %824 = vst [vmem:[#allocation2 + $0x3] sm:$0x1] %v820_v55 }
 0xa4d   :  { %v2302_v56 = vpop.f32.mrf.mxu1 }
 0xa8b   :  { %v910_v58 = vpop.f32.mrf.mxu1 }
 0xa8c   :  { %v916_v59 = vsel %vm915_vm6, -1e+30, %v910_v58 }
 0xa8d   :  { %v2337_v60 = vpop.f32.mrf.mxu1  ;;  %v917_v61 = vsel %vm215_vm2, %v916_v59, -inf }
 0xa8e   :  { %918 = vmax.xlane.f32.xlu0 %v917_v61  ;;  %v1264_v60 = vld [vmem:[%s3612_s2 + $0x6] sm:$0x1] }
 0xa8f   :  { %vm1265_vm8 = vcmp.ne.s32.totalorder %v1264_v60, 0 }
 0xb17   :  { %v919_v62 = vpop.xlane.xlu0 %918 }
 0xb18   :  { %v920_v63 = vsub.f32 %v916_v59, %v919_v62 }
 0xb1a   :  { %v921_v0 = vmul.f32 1.442695, %v920_v63 }
 0xb1c   :  { %2636 = vpow2.f32 %v921_v0 }
 0xb29   :  { %v2637_v1 = vpop.eup %2636 }
 0xb2a   :  { %v923_v2 = vsel %vm215_vm2, %v2637_v1, 0.0 }
 0xb2b   :  { %924 = vadd.xlane.f32.xlu1 %v923_v2 }
 0xbb4   :  { %v925_v21 = vpop.xlane.xlu1 %924 }
 0xbb5   :  { %2638 = vrcp.f32 %v925_v21  ;;  %v1720_v21 = vld [vmem:[%s3610_s1 + $0x390] sm:$0xff] }
 0xbc2   :  { %v2639_v22 = vpop.eup %2638 }
 0xbc3   :  { %v927_v23 = vmul.f32 %v2639_v22, %v2637_v1  ;;  %v1719_v22 = vld [vmem:[%s3610_s1 + $0x388] sm:$0xff] }
 0xbc5   :  { %928 = vst [vmem:[%s3613_s6 + $0x4] sm:$0x1] %v927_v23  ;;  %2371 = vmatmul.mubr.f32.vlgmr.msra.gmra.mxu0 %v927_v23  ;;  %v1718_v23 = vld [vmem:[%s3610_s1 + $0x380] sm:$0xff] }
 0xbc6   :  { %2374 = vmatpush3.xpose.msra.mxu0 %v1701_v4  ;;  %2405 = vmatprep.mubr.msk.f32.mxu0 %vm2655_vm0, %v2654_v3 }
 0xbc7   :  { %2375 = vmatprep.subr.mxu0 %v2654_v3 }
 0xbca   :  { %2376 = vmatpush3.xpose.msra.mxu0 %v1700_v5 }
 0xbcb   :  { %2377 = vmatprep.subr.mxu0 %v2654_v3 }
 0xbce   :  { %2378 = vmatpush3.xpose.msra.mxu0 %v1699_v6 }
 0xbcf   :  { %2379 = vmatprep.subr.mxu0 %v2654_v3 }
 0xbd2   :  { %2380 = vmatpush3.xpose.msra.mxu0 %v1698_v7  ;;  %v1733_v7 = vld [vmem:[%s3610_s1 + $0x3f8] sm:$0xff] }
 0xbd3   :  { %2381 = vmatprep.subr.mxu0 %v2654_v3 }
 0xbd6   :  { %2382 = vmatpush3.xpose.msra.mxu0 %v1697_v8  ;;  %v1732_v8 = vld [vmem:[%s3610_s1 + $0x3f0] sm:$0xff] }
 0xbd7   :  { %2383 = vmatprep.subr.mxu0 %v2654_v3 }
 0xbda   :  { %2384 = vmatpush3.xpose.msra.mxu0 %v1696_v9  ;;  %v1731_v9 = vld [vmem:[%s3610_s1 + $0x3e8] sm:$0xff] }
 0xbdb   :  { %2385 = vmatprep.subr.mxu0 %v2654_v3 }
 0xbde   :  { %2386 = vmatpush3.xpose.msra.mxu0 %v1695_v10  ;;  %v1730_v10 = vld [vmem:[%s3610_s1 + $0x3e0] sm:$0xff] }
 0xbdf   :  { %2387 = vmatprep.subr.mxu0 %v2654_v3 }
 0xbe2   :  { %2388 = vmatpush3.xpose.msra.mxu0 %v1694_v11  ;;  %v1729_v11 = vld [vmem:[%s3610_s1 + $0x3d8] sm:$0xff] }
 0xbe3   :  { %2389 = vmatprep.subr.mxu0 %v2654_v3 }
 0xbe6   :  { %2390 = vmatpush3.xpose.msra.mxu0 %v1693_v12  ;;  %v1728_v12 = vld [vmem:[%s3610_s1 + $0x3d0] sm:$0xff] }
 0xbe7   :  { %2391 = vmatprep.subr.mxu0 %v2654_v3 }
 0xbea   :  { %2392 = vmatpush3.xpose.msra.mxu0 %v1692_v13  ;;  %v1727_v13 = vld [vmem:[%s3610_s1 + $0x3c8] sm:$0xff] }
 0xbeb   :  { %2393 = vmatprep.subr.mxu0 %v2654_v3 }
 0xbee   :  { %2394 = vmatpush3.xpose.msra.mxu0 %v1691_v14  ;;  %v1726_v14 = vld [vmem:[%s3610_s1 + $0x3c0] sm:$0xff] }
 0xbef   :  { %2395 = vmatprep.subr.mxu0 %v2654_v3 }
 0xbf2   :  { %2396 = vmatpush3.xpose.msra.mxu0 %v1690_v15  ;;  %v1725_v15 = vld [vmem:[%s3610_s1 + $0x3b8] sm:$0xff] }
 0xbf3   :  { %2397 = vmatprep.subr.mxu0 %v2654_v3 }
 0xbf6   :  { %2398 = vmatpush3.xpose.msra.mxu0 %v1689_v16  ;;  %v1724_v16 = vld [vmem:[%s3610_s1 + $0x3b0] sm:$0xff] }
 0xbf7   :  { %2399 = vmatprep.subr.mxu0 %v2654_v3 }
 0xbfa   :  { %2400 = vmatpush3.xpose.msra.mxu0 %v1688_v17  ;;  %v1723_v17 = vld [vmem:[%s3610_s1 + $0x3a8] sm:$0xff] }
 0xbfb   :  { %2401 = vmatprep.subr.mxu0 %v2654_v3 }
 0xbfe   :  { %2402 = vmatpush3.xpose.msra.mxu0 %v1687_v19  ;;  %v1722_v19 = vld [vmem:[%s3610_s1 + $0x3a0] sm:$0xff] }
 0xbff   :  { %2403 = vmatprep.subr.mxu0 %v2654_v3 }
 0xc02   :  { %2404 = vmatpush3.xpose.msra.mxu0 %v1686_v20  ;;  %v1721_v20 = vld [vmem:[%s3610_s1 + $0x398] sm:$0xff] }
 0xc03   :  { %2478 = vmatprep.subr.mxu0 %v2654_v3 }
 0xc05   :  { %2406 = vmatmul.mubr.f32.vlgmr.msra.gmra.mxu0 %v1017_v24 }
 0xc06   :  { %2510 = vmatprep.mubr.msk.f32.mxu0 %vm2655_vm0, %v2654_v3  ;;  %2479 = vmatpush3.msra.mxu0 %v1717_v37 }
 0xc07   :  { %2480 = vmatprep.subr.mxu0 %v2654_v3 }
 0xc08   :  { %2481 = vmatpush3.msra.mxu0 %v1716_v38 }
 0xc09   :  { %2482 = vmatprep.subr.mxu0 %v2654_v3 }
 0xc0a   :  { %2483 = vmatpush3.msra.mxu0 %v1715_v39 }
 0xc0b   :  { %2484 = vmatprep.subr.mxu0 %v2654_v3 }
 0xc0c   :  { %2485 = vmatpush3.msra.mxu0 %v1714_v40 }
 0xc0d   :  { %2486 = vmatprep.subr.mxu0 %v2654_v3 }
 0xc0e   :  { %2487 = vmatpush3.msra.mxu0 %v1713_v41 }
 0xc0f   :  { %2488 = vmatprep.subr.mxu0 %v2654_v3 }
 0xc10   :  { %2489 = vmatpush3.msra.mxu0 %v1712_v42 }
 0xc11   :  { %2490 = vmatprep.subr.mxu0 %v2654_v3 }
 0xc12   :  { %2491 = vmatpush3.msra.mxu0 %v1711_v43 }
 0xc13   :  { %2492 = vmatprep.subr.mxu0 %v2654_v3 }
 0xc14   :  { %2493 = vmatpush3.msra.mxu0 %v1710_v44 }
 0xc15   :  { %2494 = vmatprep.subr.mxu0 %v2654_v3 }
 0xc16   :  { %2495 = vmatpush3.msra.mxu0 %v1709_v45 }
 0xc17   :  { %2496 = vmatprep.subr.mxu0 %v2654_v3 }
 0xc18   :  { %2497 = vmatpush3.msra.mxu0 %v1708_v46 }
 0xc19   :  { %2498 = vmatprep.subr.mxu0 %v2654_v3 }
 0xc1a   :  { %2499 = vmatpush3.msra.mxu0 %v1707_v47 }
 0xc1b   :  { %2500 = vmatprep.subr.mxu0 %v2654_v3 }
 0xc1c   :  { %2501 = vmatpush3.msra.mxu0 %v1706_v48 }
 0xc1d   :  { %2502 = vmatprep.subr.mxu0 %v2654_v3 }
 0xc1e   :  { %2503 = vmatpush3.msra.mxu0 %v1705_v49 }
 0xc1f   :  { %2504 = vmatprep.subr.mxu0 %v2654_v3 }
 0xc20   :  { %2505 = vmatpush3.msra.mxu0 %v1704_v51 }
 0xc21   :  { %2506 = vmatprep.subr.mxu0 %v2654_v3 }
 0xc22   :  { %2507 = vmatpush3.msra.mxu0 %v1703_v52 }
 0xc23   :  { %2508 = vmatprep.subr.mxu0 %v2654_v3 }
 0xc24   :  { %2509 = vmatpush3.msra.mxu0 %v1702_v53 }
 0xc25   :  { %2513 = vmatprep.subr.mxu0 %v2654_v3 }
 0xc85   :  { %v995_v25 = vpop.f32.mrf.mxu0 }
 0xc86   :  { %999 = vst [vmem:[#allocation2 + $0x4] sm:$0x1] %v995_v25 }
 0xc87   :  { %v2372_v26 = vpop.f32.mrf.mxu0 }
 0xcc5   :  { %v1085_v28 = vpop.f32.mrf.mxu0 }
 0xcc6   :  { %v1091_v29 = vsel %vm1090_vm7, -1e+30, %v1085_v28 }
 0xcc7   :  { %v2407_v30 = vpop.f32.mrf.mxu0  ;;  %v1092_v31 = vsel %vm215_vm2, %v1091_v29, -inf }
 0xcc8   :  { %1093 = vmax.xlane.f32.xlu0 %v1092_v31  ;;  %v1439_v30 = vld [vmem:[%s3612_s2 + $0x7] sm:$0x1] }
 0xcc9   :  { %vm1440_vm9 = vcmp.ne.s32.totalorder %v1439_v30, 0 }
 0xd51   :  { %v1094_v32 = vpop.xlane.xlu0 %1093 }
 0xd52   :  { %v1095_v33 = vsub.f32 %v1091_v29, %v1094_v32 }
 0xd54   :  { %v1096_v34 = vmul.f32 1.442695, %v1095_v33 }
 0xd56   :  { %2640 = vpow2.f32 %v1096_v34 }
 0xd63   :  { %v2641_v35 = vpop.eup %2640 }
 0xd64   :  { %v1098_v36 = vsel %vm215_vm2, %v2641_v35, 0.0 }
 0xd65   :  { %1099 = vadd.xlane.f32.xlu1 %v1098_v36 }
 0xdee   :  { %v1100_v54 = vpop.xlane.xlu1 %1099 }
 0xdef   :  { %2642 = vrcp.f32 %v1100_v54  ;;  %v1530_v54 = vld [vmem:[%s3614_s4 + $0x20] sm:$0xff] }
 0xdfc   :  { %v2643_v55 = vpop.eup %2642 }
 0xdfd   :  { %v1102_v56 = vmul.f32 %v2643_v55, %v2641_v35  ;;  %v1529_v55 = vld [vmem:[%s3614_s4 + $0x18] sm:$0xff] }
 0xdff   :  { %1103 = vst [vmem:[%s3613_s6 + $0x5] sm:$0x1] %v1102_v56  ;;  %2441 = vmatmul.mubr.f32.vlgmr.msra.gmra.mxu1 %v1102_v56  ;;  %v1528_v56 = vld [vmem:[%s3614_s4 + $0x10] sm:$0xff] }
 0xe00   :  { %2444 = vmatpush3.xpose.msra.mxu1 %v1717_v37  ;;  %2475 = vmatprep.mubr.msk.f32.mxu1 %vm2655_vm0, %v2654_v3 }
 0xe01   :  { %2445 = vmatprep.subr.mxu1 %v2654_v3 }
 0xe04   :  { %2446 = vmatpush3.xpose.msra.mxu1 %v1716_v38 }
 0xe05   :  { %2447 = vmatprep.subr.mxu1 %v2654_v3 }
 0xe08   :  { %2448 = vmatpush3.xpose.msra.mxu1 %v1715_v39 }
 0xe09   :  { %2449 = vmatprep.subr.mxu1 %v2654_v3 }
 0xe0c   :  { %2450 = vmatpush3.xpose.msra.mxu1 %v1714_v40 }
 0xe0d   :  { %2451 = vmatprep.subr.mxu1 %v2654_v3 }
 0xe10   :  { %2452 = vmatpush3.xpose.msra.mxu1 %v1713_v41 }
 0xe11   :  { %2453 = vmatprep.subr.mxu1 %v2654_v3 }
 0xe14   :  { %2454 = vmatpush3.xpose.msra.mxu1 %v1712_v42  ;;  %v1541_v42 = vld [vmem:[%s3614_s4 + $0x78] sm:$0xff] }
 0xe15   :  { %2455 = vmatprep.subr.mxu1 %v2654_v3 }
 0xe18   :  { %2456 = vmatpush3.xpose.msra.mxu1 %v1711_v43  ;;  %v1540_v43 = vld [vmem:[%s3614_s4 + $0x70] sm:$0xff] }
 0xe19   :  { %2457 = vmatprep.subr.mxu1 %v2654_v3 }
 0xe1c   :  { %2458 = vmatpush3.xpose.msra.mxu1 %v1710_v44  ;;  %v1539_v44 = vld [vmem:[%s3614_s4 + $0x68] sm:$0xff] }
 0xe1d   :  { %2459 = vmatprep.subr.mxu1 %v2654_v3 }
 0xe20   :  { %2460 = vmatpush3.xpose.msra.mxu1 %v1709_v45  ;;  %v1538_v45 = vld [vmem:[%s3614_s4 + $0x60] sm:$0xff] }
 0xe21   :  { %2461 = vmatprep.subr.mxu1 %v2654_v3 }
 0xe24   :  { %2462 = vmatpush3.xpose.msra.mxu1 %v1708_v46  ;;  %v1537_v46 = vld [vmem:[%s3614_s4 + $0x58] sm:$0xff] }
 0xe25   :  { %2463 = vmatprep.subr.mxu1 %v2654_v3 }
 0xe28   :  { %2464 = vmatpush3.xpose.msra.mxu1 %v1707_v47  ;;  %v1536_v47 = vld [vmem:[%s3614_s4 + $0x50] sm:$0xff] }
 0xe29   :  { %2465 = vmatprep.subr.mxu1 %v2654_v3 }
 0xe2c   :  { %2466 = vmatpush3.xpose.msra.mxu1 %v1706_v48  ;;  %v1535_v48 = vld [vmem:[%s3614_s4 + $0x48] sm:$0xff] }
 0xe2d   :  { %2467 = vmatprep.subr.mxu1 %v2654_v3 }
 0xe30   :  { %2468 = vmatpush3.xpose.msra.mxu1 %v1705_v49  ;;  %v1534_v49 = vld [vmem:[%s3614_s4 + $0x40] sm:$0xff] }
 0xe31   :  { %2469 = vmatprep.subr.mxu1 %v2654_v3 }
 0xe34   :  { %2470 = vmatpush3.xpose.msra.mxu1 %v1704_v51  ;;  %v1533_v51 = vld [vmem:[%s3614_s4 + $0x38] sm:$0xff] }
 0xe35   :  { %2471 = vmatprep.subr.mxu1 %v2654_v3 }
 0xe38   :  { %2472 = vmatpush3.xpose.msra.mxu1 %v1703_v52  ;;  %v1532_v52 = vld [vmem:[%s3614_s4 + $0x30] sm:$0xff] }
 0xe39   :  { %2473 = vmatprep.subr.mxu1 %v2654_v3 }
 0xe3c   :  { %2474 = vmatpush3.xpose.msra.mxu1 %v1702_v53  ;;  %v1531_v53 = vld [vmem:[%s3614_s4 + $0x28] sm:$0xff] }
 0xe3d   :  { %2548 = vmatprep.subr.mxu1 %v2654_v3 }
 0xe3f   :  { %2476 = vmatmul.mubr.f32.vlgmr.msra.gmra.mxu1 %v1192_v57  ;;  %v1527_v57 = vld [vmem:[%s3614_s4 + $0x8] sm:$0xff] }
 0xe40   :  { %2580 = vmatprep.mubr.msk.f32.mxu1 %vm2655_vm0, %v2654_v3  ;;  %2549 = vmatpush3.msra.mxu1 %v1733_v7 }
 0xe41   :  { %2550 = vmatprep.subr.mxu1 %v2654_v3 }
 0xe42   :  { %2551 = vmatpush3.msra.mxu1 %v1732_v8 }
 0xe43   :  { %2552 = vmatprep.subr.mxu1 %v2654_v3 }
 0xe44   :  { %2553 = vmatpush3.msra.mxu1 %v1731_v9 }
 0xe45   :  { %2554 = vmatprep.subr.mxu1 %v2654_v3 }
 0xe46   :  { %2555 = vmatpush3.msra.mxu1 %v1730_v10 }
 0xe47   :  { %2556 = vmatprep.subr.mxu1 %v2654_v3 }
 0xe48   :  { %2557 = vmatpush3.msra.mxu1 %v1729_v11 }
 0xe49   :  { %2558 = vmatprep.subr.mxu1 %v2654_v3 }
 0xe4a   :  { %2559 = vmatpush3.msra.mxu1 %v1728_v12 }
 0xe4b   :  { %2560 = vmatprep.subr.mxu1 %v2654_v3 }
 0xe4c   :  { %2561 = vmatpush3.msra.mxu1 %v1727_v13 }
 0xe4d   :  { %2562 = vmatprep.subr.mxu1 %v2654_v3 }
 0xe4e   :  { %2563 = vmatpush3.msra.mxu1 %v1726_v14 }
 0xe4f   :  { %2564 = vmatprep.subr.mxu1 %v2654_v3 }
 0xe50   :  { %2565 = vmatpush3.msra.mxu1 %v1725_v15 }
 0xe51   :  { %2566 = vmatprep.subr.mxu1 %v2654_v3 }
 0xe52   :  { %2567 = vmatpush3.msra.mxu1 %v1724_v16 }
 0xe53   :  { %2568 = vmatprep.subr.mxu1 %v2654_v3 }
 0xe54   :  { %2569 = vmatpush3.msra.mxu1 %v1723_v17 }
 0xe55   :  { %2570 = vmatprep.subr.mxu1 %v2654_v3 }
 0xe56   :  { %2571 = vmatpush3.msra.mxu1 %v1722_v19 }
 0xe57   :  { %2572 = vmatprep.subr.mxu1 %v2654_v3 }
 0xe58   :  { %2573 = vmatpush3.msra.mxu1 %v1721_v20 }
 0xe59   :  { %2574 = vmatprep.subr.mxu1 %v2654_v3 }
 0xe5a   :  { %2575 = vmatpush3.msra.mxu1 %v1720_v21 }
 0xe5b   :  { %2576 = vmatprep.subr.mxu1 %v2654_v3 }
 0xe5c   :  { %2577 = vmatpush3.msra.mxu1 %v1719_v22 }
 0xe5d   :  { %2578 = vmatprep.subr.mxu1 %v2654_v3 }
 0xe5e   :  { %2579 = vmatpush3.msra.mxu1 %v1718_v23 }
 0xe5f   :  { %2583 = vmatprep.subr.mxu1 %v2654_v3 }
 0xebf   :  { %v1170_v58 = vpop.f32.mrf.mxu1 }
 0xec0   :  { %1174 = vst [vmem:[#allocation2 + $0x5] sm:$0x1] %v1170_v58  ;;  %v1526_v58 = vld [vmem:[%s3614_s4] sm:$0xff] }
 0xec1   :  { %v2442_v59 = vpop.f32.mrf.mxu1 }
 0xeff   :  { %v1260_v61 = vpop.f32.mrf.mxu1 }
 0xf00   :  { %v1266_v62 = vsel %vm1265_vm8, -1e+30, %v1260_v61 }
 0xf01   :  { %v2477_v63 = vpop.f32.mrf.mxu1  ;;  %v1267_v0 = vsel %vm215_vm2, %v1266_v62, -inf }
 0xf02   :  { %1268 = vmax.xlane.f32.xlu0 %v1267_v0 }
 0xf8b   :  { %v1269_v1 = vpop.xlane.xlu0 %1268 }
 0xf8c   :  { %v1270_v2 = vsub.f32 %v1266_v62, %v1269_v1 }
 0xf8e   :  { %v1271_v4 = vmul.f32 1.442695, %v1270_v2 }
 0xf90   :  { %2644 = vpow2.f32 %v1271_v4 }
 0xf9d   :  { %v2645_v5 = vpop.eup %2644 }
 0xf9e   :  { %v1273_v6 = vsel %vm215_vm2, %v2645_v5, 0.0 }
 0xf9f   :  { %1274 = vadd.xlane.f32.xlu1 %v1273_v6 }
0x1028   :  { %v1275_v24 = vpop.xlane.xlu1 %1274 }
0x1029   :  { %2646 = vrcp.f32 %v1275_v24 }
0x1036   :  { %v2647_v25 = vpop.eup %2646 }
0x1037   :  { %v1277_v26 = vmul.f32 %v2647_v25, %v2645_v5 }
0x1039   :  { %1278 = vst [vmem:[%s3613_s6 + $0x6] sm:$0x1] %v1277_v26  ;;  %2511 = vmatmul.mubr.f32.vlgmr.msra.gmra.mxu0 %v1277_v26 }
0x103a   :  { %2514 = vmatpush3.xpose.msra.mxu0 %v1733_v7  ;;  %2545 = vmatprep.mubr.msk.f32.mxu0 %vm2655_vm0, %v2654_v3 }
0x103b   :  { %2515 = vmatprep.subr.mxu0 %v2654_v3 }
0x103e   :  { %2516 = vmatpush3.xpose.msra.mxu0 %v1732_v8 }
0x103f   :  { %2517 = vmatprep.subr.mxu0 %v2654_v3 }
0x1042   :  { %2518 = vmatpush3.xpose.msra.mxu0 %v1731_v9 }
0x1043   :  { %2519 = vmatprep.subr.mxu0 %v2654_v3 }
0x1046   :  { %2520 = vmatpush3.xpose.msra.mxu0 %v1730_v10 }
0x1047   :  { %2521 = vmatprep.subr.mxu0 %v2654_v3 }
0x104a   :  { %2522 = vmatpush3.xpose.msra.mxu0 %v1729_v11 }
0x104b   :  { %2523 = vmatprep.subr.mxu0 %v2654_v3 }
0x104e   :  { %2524 = vmatpush3.xpose.msra.mxu0 %v1728_v12 }
0x104f   :  { %2525 = vmatprep.subr.mxu0 %v2654_v3 }
0x1052   :  { %2526 = vmatpush3.xpose.msra.mxu0 %v1727_v13 }
0x1053   :  { %2527 = vmatprep.subr.mxu0 %v2654_v3 }
0x1056   :  { %2528 = vmatpush3.xpose.msra.mxu0 %v1726_v14 }
0x1057   :  { %2529 = vmatprep.subr.mxu0 %v2654_v3 }
0x105a   :  { %2530 = vmatpush3.xpose.msra.mxu0 %v1725_v15 }
0x105b   :  { %2531 = vmatprep.subr.mxu0 %v2654_v3 }
0x105e   :  { %2532 = vmatpush3.xpose.msra.mxu0 %v1724_v16 }
0x105f   :  { %2533 = vmatprep.subr.mxu0 %v2654_v3 }
0x1062   :  { %2534 = vmatpush3.xpose.msra.mxu0 %v1723_v17 }
0x1063   :  { %2535 = vmatprep.subr.mxu0 %v2654_v3 }
0x1066   :  { %2536 = vmatpush3.xpose.msra.mxu0 %v1722_v19 }
0x1067   :  { %2537 = vmatprep.subr.mxu0 %v2654_v3 }
0x106a   :  { %2538 = vmatpush3.xpose.msra.mxu0 %v1721_v20 }
0x106b   :  { %2539 = vmatprep.subr.mxu0 %v2654_v3 }
0x106e   :  { %2540 = vmatpush3.xpose.msra.mxu0 %v1720_v21 }
0x106f   :  { %2541 = vmatprep.subr.mxu0 %v2654_v3 }
0x1072   :  { %2542 = vmatpush3.xpose.msra.mxu0 %v1719_v22 }
0x1073   :  { %2543 = vmatprep.subr.mxu0 %v2654_v3 }
0x1076   :  { %2544 = vmatpush3.xpose.msra.mxu0 %v1718_v23 }
0x1079   :  { %2546 = vmatmul.mubr.f32.vlgmr.msra.gmra.mxu0 %v1367_v27 }
0x10f9   :  { %v1345_v28 = vpop.f32.mrf.mxu0 }
0x10fa   :  { %1349 = vst [vmem:[#allocation2 + $0x6] sm:$0x1] %v1345_v28 }
0x10fb   :  { %v2512_v29 = vpop.f32.mrf.mxu0 }
0x1139   :  { %v1435_v31 = vpop.f32.mrf.mxu0 }
0x113a   :  { %v1441_v32 = vsel %vm1440_vm9, -1e+30, %v1435_v31 }
0x113b   :  { %v2547_v33 = vpop.f32.mrf.mxu0  ;;  %v1442_v34 = vsel %vm215_vm2, %v1441_v32, -inf }
0x113c   :  { %1443 = vmax.xlane.f32.xlu0 %v1442_v34 }
0x11c5   :  { %v1444_v35 = vpop.xlane.xlu0 %1443 }
0x11c6   :  { %v1445_v36 = vsub.f32 %v1441_v32, %v1444_v35 }
0x11c8   :  { %v1446_v37 = vmul.f32 1.442695, %v1445_v36 }
0x11ca   :  { %2648 = vpow2.f32 %v1446_v37 }
0x11d7   :  { %v2649_v50 = vpop.eup %2648 }
0x11d8   :  { %v1448_v38 = vsel %vm215_vm2, %v2649_v50, 0.0 }
0x11d9   :  { %1449 = vadd.xlane.f32.xlu1 %v1448_v38 }
0x1262   :  { %v1450_v39 = vpop.xlane.xlu1 %1449 }
0x1263   :  { %2650 = vrcp.f32 %v1450_v39 }
0x1270   :  { %v2651_v40 = vpop.eup %2650 }
0x1271   :  { %v1452_v41 = vmul.f32 %v2651_v40, %v2649_v50 }
0x1273   :  { %1453 = vst [vmem:[%s3613_s6 + $0x7] sm:$0x1] %v1452_v41  ;;  %2581 = vmatmul.mubr.f32.vlgmr.msra.gmra.mxu1 %v1452_v41 }
0x1274   :  { %2584 = vmatpush3.msra.mxu1 %v1541_v42  ;;  %2615 = vmatprep.mubr.msk.f32.mxu1 %vm2655_vm0, %v2654_v3 }
0x1275   :  { %2585 = vmatprep.subr.mxu1 %v2654_v3 }
0x1276   :  { %2586 = vmatpush3.msra.mxu1 %v1540_v43 }
0x1277   :  { %2587 = vmatprep.subr.mxu1 %v2654_v3 }
0x1278   :  { %2588 = vmatpush3.msra.mxu1 %v1539_v44 }
0x1279   :  { %2589 = vmatprep.subr.mxu1 %v2654_v3 }
0x127a   :  { %2590 = vmatpush3.msra.mxu1 %v1538_v45 }
0x127b   :  { %2591 = vmatprep.subr.mxu1 %v2654_v3 }
0x127c   :  { %2592 = vmatpush3.msra.mxu1 %v1537_v46 }
0x127d   :  { %2593 = vmatprep.subr.mxu1 %v2654_v3 }
0x127e   :  { %2594 = vmatpush3.msra.mxu1 %v1536_v47 }
0x127f   :  { %2595 = vmatprep.subr.mxu1 %v2654_v3 }
0x1280   :  { %2596 = vmatpush3.msra.mxu1 %v1535_v48 }
0x1281   :  { %2597 = vmatprep.subr.mxu1 %v2654_v3 }
0x1282   :  { %2598 = vmatpush3.msra.mxu1 %v1534_v49 }
0x1283   :  { %2599 = vmatprep.subr.mxu1 %v2654_v3 }
0x1284   :  { %2600 = vmatpush3.msra.mxu1 %v1533_v51 }
0x1285   :  { %2601 = vmatprep.subr.mxu1 %v2654_v3 }
0x1286   :  { %2602 = vmatpush3.msra.mxu1 %v1532_v52 }
0x1287   :  { %2603 = vmatprep.subr.mxu1 %v2654_v3 }
0x1288   :  { %2604 = vmatpush3.msra.mxu1 %v1531_v53 }
0x1289   :  { %2605 = vmatprep.subr.mxu1 %v2654_v3 }
0x128a   :  { %2606 = vmatpush3.msra.mxu1 %v1530_v54 }
0x128b   :  { %2607 = vmatprep.subr.mxu1 %v2654_v3 }
0x128c   :  { %2608 = vmatpush3.msra.mxu1 %v1529_v55 }
0x128d   :  { %2609 = vmatprep.subr.mxu1 %v2654_v3 }
0x128e   :  { %2610 = vmatpush3.msra.mxu1 %v1528_v56 }
0x128f   :  { %2611 = vmatprep.subr.mxu1 %v2654_v3 }
0x1290   :  { %2612 = vmatpush3.msra.mxu1 %v1527_v57 }
0x1291   :  { %2613 = vmatprep.subr.mxu1 %v2654_v3 }
0x1292   :  { %2614 = vmatpush3.msra.mxu1 %v1526_v58 }
0x1333   :  { %v1520_v59 = vpop.f32.mrf.mxu1 }
0x1334   :  { %1524 = vst [vmem:[#allocation2 + $0x7] sm:$0x1] %v1520_v59 }
0x1335   :  { %v2582_v60 = vpop.f32.mrf.mxu1 }
0x133b   :  { %v1525_v61 = vld [vmem:[#allocation2] sm:$0xff] }
0x133c   :  { %2616 = vmatmul.mubr.f32.vlgmr.msra.gmra.mxu1 %v1525_v61 }
0x13fc   :  { %v1608_v62 = vpop.f32.mrf.mxu1 }
0x13fd   :  { %v1609_v63 = vadd.f32 %v1608_v62, %v2975_v18 }
0x13fe   :  { %v2617_v0 = vpop.f32.mrf.mxu1 }
0x13ff   :  { %2652 = vtanh.f32 %v1609_v63 }
0x140c   :  { %v2653_v1 = vpop.eup %2652 }
0x140d   :  { %1613 = vst [vmem:[%s3615_s5] sm:$0xff] %v2653_v1 }

// kernel: _soft_dot_attention_impl.1
= control target key start
LH: loop header
LB: loop body
LE: loop exit
PB: predicated region body
PF: predicated region fallthrough
CT: control target
= control target key end

     0   :  { %v2654_v3 = vmov 0.0   ;;  %vm2655_vm0 = vmmov 0   ;;  %vm215_vm2 = vcmask 1040384   ;;  %s3609_s3 = inlined_call_operand.vmem [shape: f32[128,256], index: 3, kind: input, shape index: {}]   ;;  %s3610_s1 = inlined_call_operand.vmem [shape: f32[8,128,128], index: 1, kind: input, shape index: {}]   ;;  %s3611_s0 = inlined_call_operand.vmem [shape: f32[8,128], index: 0, kind: input, shape index: {}]   ;;  %s3612_s2 = inlined_call_operand.vmem [shape: s32[8,128], index: 2, kind: input, shape index: {}]   ;;  %s3613_s6 = inlined_call_operand.vmem [shape: f32[8,128], index: 6, kind: output, shape index: {1}]   ;;  %s3614_s4 = inlined_call_operand.vmem [shape: f32[128,128], index: 4, kind: input, shape index: {}]   ;;  %s3615_s5 = inlined_call_operand.vmem [shape: f32[8,128], index: 5, kind: output, shape index: {0}]  }
   0x1   :  { %v54_v0 = vld [vmem:[%s3609_s3 + $0xf8] sm:$0xff]  ;;  %v53_v1 = vld [vmem:[%s3609_s3 + $0xf0] sm:$0xff]  ;;  %v52_v2 = vld [vmem:[%s3609_s3 + $0xe8] sm:$0xff]  ;;  %119 = vmatprep.mubr.f32.mxu0 %v2654_v3  ;;  %2023 = vmatprep.subr.mxu1 %v2654_v3 }
   0x2   :  { %55 = vmatprep.subr.mxu0 %v54_v0  ;;  %v51_v4 = vld [vmem:[%s3609_s3 + $0xe0] sm:$0xff]  ;;  %v50_v5 = vld [vmem:[%s3609_s3 + $0xd8] sm:$0xff]  ;;  %v49_v6 = vld [vmem:[%s3609_s3 + $0xd0] sm:$0xff]  ;;  %2055 = vmatprep.mubr.msk.f32.mxu1 %vm2655_vm0, %v2654_v3 }
   0x3   :  { %56 = vmatpush1.msra.mxu0 %v53_v1  ;;  %v48_v7 = vld [vmem:[%s3609_s3 + $0xc8] sm:$0xff]  ;;  %v47_v8 = vld [vmem:[%s3609_s3 + $0xc0] sm:$0xff]  ;;  %v46_v9 = vld [vmem:[%s3609_s3 + $0xb8] sm:$0xff] }
   0x4   :  { %57 = vmatprep.subr.mxu0 %v52_v2  ;;  %v45_v10 = vld [vmem:[%s3609_s3 + $0xb0] sm:$0xff]  ;;  %v44_v11 = vld [vmem:[%s3609_s3 + $0xa8] sm:$0xff]  ;;  %v43_v12 = vld [vmem:[%s3609_s3 + $0xa0] sm:$0xff] }
   0x5   :  { %58 = vmatpush1.msra.mxu0 %v51_v4  ;;  %v42_v13 = vld [vmem:[%s3609_s3 + $0x98] sm:$0xff]  ;;  %v41_v14 = vld [vmem:[%s3609_s3 + $0x90] sm:$0xff]  ;;  %v40_v16 = vld [vmem:[%s3609_s3 + $0x88] sm:$0xff] }
   0x6   :  { %59 = vmatprep.subr.mxu0 %v50_v5  ;;  %v141_v15 = vld [vmem:[%s3610_s1 + $0x78] sm:$0xff]  ;;  %v39_v17 = vld [vmem:[%s3609_s3 + $0x80] sm:$0xff]  ;;  %v140_v18 = vld [vmem:[%s3610_s1 + $0x70] sm:$0xff] }
   0x7   :  { %60 = vmatpush1.msra.mxu0 %v49_v6  ;;  %2024 = vmatpush3.xpose.msra.mxu1 %v141_v15  ;;  %v38_v19 = vld [vmem:[%s3609_s3 + $0x78] sm:$0xff]  ;;  %v37_v20 = vld [vmem:[%s3609_s3 + $0x70] sm:$0xff]  ;;  %v36_v21 = vld [vmem:[%s3609_s3 + $0x68] sm:$0xff] }
   0x8   :  { %61 = vmatprep.subr.mxu0 %v48_v7  ;;  %2025 = vmatprep.subr.mxu1 %v2654_v3  ;;  %v35_v22 = vld [vmem:[%s3609_s3 + $0x60] sm:$0xff]  ;;  %v139_v23 = vld [vmem:[%s3610_s1 + $0x68] sm:$0xff]  ;;  %v34_v24 = vld [vmem:[%s3609_s3 + $0x58] sm:$0xff] }
   0x9   :  { %62 = vmatpush1.msra.mxu0 %v47_v8  ;;  %v33_v25 = vld [vmem:[%s3609_s3 + $0x50] sm:$0xff]  ;;  %v32_v26 = vld [vmem:[%s3609_s3 + $0x48] sm:$0xff]  ;;  %v31_v27 = vld [vmem:[%s3609_s3 + $0x40] sm:$0xff] }
   0xa   :  { %63 = vmatprep.subr.mxu0 %v46_v9  ;;  %v138_v28 = vld [vmem:[%s3610_s1 + $0x60] sm:$0xff]  ;;  %v30_v29 = vld [vmem:[%s3609_s3 + $0x38] sm:$0xff]  ;;  %v29_v30 = vld [vmem:[%s3609_s3 + $0x30] sm:$0xff] }
   0xb   :  { %64 = vmatpush1.msra.mxu0 %v45_v10  ;;  %2026 = vmatpush3.xpose.msra.mxu1 %v140_v18  ;;  %v28_v31 = vld [vmem:[%s3609_s3 + $0x28] sm:$0xff]  ;;  %v27_v32 = vld [vmem:[%s3609_s3 + $0x20] sm:$0xff]  ;;  %v137_v33 = vld [vmem:[%s3610_s1 + $0x58] sm:$0xff] }
   0xc   :  { %65 = vmatprep.subr.mxu0 %v44_v11  ;;  %2027 = vmatprep.subr.mxu1 %v2654_v3  ;;  %v26_v34 = vld [vmem:[%s3609_s3 + $0x18] sm:$0xff]  ;;  %v25_v35 = vld [vmem:[%s3609_s3 + $0x10] sm:$0xff]  ;;  %v24_v36 = vld [vmem:[%s3609_s3 + $0x8] sm:$0xff] }
   0xd   :  { %66 = vmatpush1.msra.mxu0 %v43_v12  ;;  %v23_v37 = vld [vmem:[%s3609_s3] sm:$0xff]  ;;  %v136_v38 = vld [vmem:[%s3610_s1 + $0x50] sm:$0xff]  ;;  %v135_v40 = vld [vmem:[%s3610_s1 + $0x48] sm:$0xff] }
   0xe   :  { %67 = vmatprep.subr.mxu0 %v42_v13  ;;  %v22_v39 = vld [vmem:[%s3611_s0] sm:$0xff]  ;;  %v133_v42 = vld [vmem:[%s3610_s1 + $0x38] sm:$0xff]  ;;  %v132_v43 = vld [vmem:[%s3610_s1 + $0x30] sm:$0xff] }
   0xf   :  { %68 = vmatpush1.msra.mxu0 %v41_v14  ;;  %2028 = vmatpush3.xpose.msra.mxu1 %v139_v23  ;;  %v134_v41 = vld [vmem:[%s3610_s1 + $0x40] sm:$0xff]  ;;  %v131_v44 = vld [vmem:[%s3610_s1 + $0x28] sm:$0xff]  ;;  %v129_v46 = vld [vmem:[%s3610_s1 + $0x18] sm:$0xff] }
  0x10   :  { %69 = vmatprep.subr.mxu0 %v40_v16  ;;  %2029 = vmatprep.subr.mxu1 %v2654_v3  ;;  %v130_v45 = vld [vmem:[%s3610_s1 + $0x20] sm:$0xff]  ;;  %v128_v47 = vld [vmem:[%s3610_s1 + $0x10] sm:$0xff]  ;;  %v127_v48 = vld [vmem:[%s3610_s1 + $0x8] sm:$0xff] }
  0x11   :  { %70 = vmatpush1.msra.mxu0 %v39_v17  ;;  %v126_v49 = vld [vmem:[%s3610_s1] sm:$0xff]  ;;  %v1637_v61 = vld [vmem:[%s3610_s1 + $0xf8] sm:$0xff]  ;;  %v1636_v62 = vld [vmem:[%s3610_s1 + $0xf0] sm:$0xff] }
  0x12   :  { %71 = vmatprep.subr.mxu0 %v38_v19  ;;  %v212_v51 = vld [vmem:[%s3612_s2] sm:$0x1]  ;;  %v1635_v63 = vld [vmem:[%s3610_s1 + $0xe8] sm:$0xff]  ;;  %v1633_v1 = vld [vmem:[%s3610_s1 + $0xd8] sm:$0xff] }
  0x13   :  { %72 = vmatpush1.msra.mxu0 %v37_v20  ;;  %2030 = vmatpush3.xpose.msra.mxu1 %v138_v28  ;;  %vm213_vm1 = vcmp.ne.s32.totalorder %v212_v51, 0  ;;  %v1634_v0 = vld [vmem:[%s3610_s1 + $0xe0] sm:$0xff]  ;;  %v1632_v2 = vld [vmem:[%s3610_s1 + $0xd0] sm:$0xff]  ;;  %v1631_v4 = vld [vmem:[%s3610_s1 + $0xc8] sm:$0xff] }
  0x14   :  { %73 = vmatprep.subr.mxu0 %v36_v21  ;;  %2031 = vmatprep.subr.mxu1 %v2654_v3  ;;  %v1630_v5 = vld [vmem:[%s3610_s1 + $0xc0] sm:$0xff]  ;;  %v1629_v6 = vld [vmem:[%s3610_s1 + $0xb8] sm:$0xff]  ;;  %v1628_v7 = vld [vmem:[%s3610_s1 + $0xb0] sm:$0xff] }
  0x15   :  { %74 = vmatpush1.msra.mxu0 %v35_v22  ;;  %v1627_v8 = vld [vmem:[%s3610_s1 + $0xa8] sm:$0xff]  ;;  %v1626_v9 = vld [vmem:[%s3610_s1 + $0xa0] sm:$0xff]  ;;  %v1625_v10 = vld [vmem:[%s3610_s1 + $0x98] sm:$0xff] }
  0x16   :  { %75 = vmatprep.subr.mxu0 %v34_v24  ;;  %v1624_v11 = vld [vmem:[%s3610_s1 + $0x90] sm:$0xff]  ;;  %v1623_v12 = vld [vmem:[%s3610_s1 + $0x88] sm:$0xff]  ;;  %v1622_v13 = vld [vmem:[%s3610_s1 + $0x80] sm:$0xff] }
  0x17   :  { %76 = vmatpush1.msra.mxu0 %v33_v25  ;;  %2032 = vmatpush3.xpose.msra.mxu1 %v137_v33  ;;  %v389_v21 = vld [vmem:[%s3612_s2 + $0x1] sm:$0x1] }
  0x18   :  { %77 = vmatprep.subr.mxu0 %v32_v26  ;;  %2033 = vmatprep.subr.mxu1 %v2654_v3  ;;  %vm390_vm3 = vcmp.ne.s32.totalorder %v389_v21, 0 }
  0x19   :  { %78 = vmatpush1.msra.mxu0 %v31_v27 }
  0x1a   :  { %79 = vmatprep.subr.mxu0 %v30_v29 }
  0x1b   :  { %80 = vmatpush1.msra.mxu0 %v29_v30  ;;  %2034 = vmatpush3.xpose.msra.mxu1 %v136_v38 }
  0x1c   :  { %81 = vmatprep.subr.mxu0 %v28_v31  ;;  %2035 = vmatprep.subr.mxu1 %v2654_v3  ;;  %v1653_v31 = vld [vmem:[%s3610_s1 + $0x178] sm:$0xff] }
  0x1d   :  { %82 = vmatpush1.msra.mxu0 %v27_v32  ;;  %v1652_v32 = vld [vmem:[%s3610_s1 + $0x170] sm:$0xff] }
  0x1e   :  { %83 = vmatprep.subr.mxu0 %v26_v34  ;;  %v1650_v34 = vld [vmem:[%s3610_s1 + $0x160] sm:$0xff] }
  0x1f   :  { %84 = vmatpush1.msra.mxu0 %v25_v35  ;;  %2036 = vmatpush3.xpose.msra.mxu1 %v135_v40  ;;  %v1649_v35 = vld [vmem:[%s3610_s1 + $0x158] sm:$0xff] }
  0x20   :  { %85 = vmatprep.subr.mxu0 %v24_v36  ;;  %2037 = vmatprep.subr.mxu1 %v2654_v3  ;;  %v1648_v36 = vld [vmem:[%s3610_s1 + $0x150] sm:$0xff] }
  0x21   :  { %86 = vmatpush1.msra.mxu0 %v23_v37  ;;  %v1647_v37 = vld [vmem:[%s3610_s1 + $0x148] sm:$0xff] }
  0x22   :  { %120 = vmatmul.mubr.f32.vlgmr.msra.gmra.mxu0 %v22_v39  ;;  %2058 = vmatprep.subr.mxu0 %v2654_v3  ;;  %v1645_v39 = vld [vmem:[%s3610_s1 + $0x138] sm:$0xff] }
  0x23   :  { %2059 = vmatpush3.msra.mxu0 %v141_v15  ;;  %2038 = vmatpush3.xpose.msra.mxu1 %v134_v41 }
  0x24   :  { %2060 = vmatprep.subr.mxu0 %v2654_v3  ;;  %2039 = vmatprep.subr.mxu1 %v2654_v3 }
  0x25   :  { %2061 = vmatpush3.msra.mxu0 %v140_v18  ;;  %2090 = vmatprep.mubr.msk.f32.mxu0 %vm2655_vm0, %v2654_v3 }
  0x26   :  { %2062 = vmatprep.subr.mxu0 %v2654_v3 }
  0x27   :  { %2063 = vmatpush3.msra.mxu0 %v139_v23  ;;  %2040 = vmatpush3.xpose.msra.mxu1 %v133_v42 }
  0x28   :  { %2064 = vmatprep.subr.mxu0 %v2654_v3  ;;  %2041 = vmatprep.subr.mxu1 %v2654_v3 }
  0x29   :  { %2065 = vmatpush3.msra.mxu0 %v138_v28 }
  0x2a   :  { %2066 = vmatprep.subr.mxu0 %v2654_v3 }
  0x2b   :  { %2067 = vmatpush3.msra.mxu0 %v137_v33  ;;  %2042 = vmatpush3.xpose.msra.mxu1 %v132_v43  ;;  %v1651_v33 = vld [vmem:[%s3610_s1 + $0x168] sm:$0xff] }
  0x2c   :  { %2068 = vmatprep.subr.mxu0 %v2654_v3  ;;  %2043 = vmatprep.subr.mxu1 %v2654_v3 }
  0x2d   :  { %2069 = vmatpush3.msra.mxu0 %v136_v38  ;;  %v1646_v38 = vld [vmem:[%s3610_s1 + $0x140] sm:$0xff] }
  0x2e   :  { %2070 = vmatprep.subr.mxu0 %v2654_v3 }
  0x2f   :  { %2071 = vmatpush3.msra.mxu0 %v135_v40  ;;  %2044 = vmatpush3.xpose.msra.mxu1 %v131_v44  ;;  %v1644_v40 = vld [vmem:[%s3610_s1 + $0x130] sm:$0xff] }
  0x30   :  { %2072 = vmatprep.subr.mxu0 %v2654_v3  ;;  %2045 = vmatprep.subr.mxu1 %v2654_v3 }
  0x31   :  { %2073 = vmatpush3.msra.mxu0 %v134_v41  ;;  %v1643_v41 = vld [vmem:[%s3610_s1 + $0x128] sm:$0xff] }
  0x32   :  { %2074 = vmatprep.subr.mxu0 %v2654_v3 }
  0x33   :  { %2075 = vmatpush3.msra.mxu0 %v133_v42  ;;  %2046 = vmatpush3.xpose.msra.mxu1 %v130_v45  ;;  %v1642_v42 = vld [vmem:[%s3610_s1 + $0x120] sm:$0xff] }
  0x34   :  { %2076 = vmatprep.subr.mxu0 %v2654_v3  ;;  %2047 = vmatprep.subr.mxu1 %v2654_v3 }
  0x35   :  { %2077 = vmatpush3.msra.mxu0 %v132_v43  ;;  %v1641_v43 = vld [vmem:[%s3610_s1 + $0x118] sm:$0xff] }
  0x36   :  { %2078 = vmatprep.subr.mxu0 %v2654_v3 }
  0x37   :  { %2079 = vmatpush3.msra.mxu0 %v131_v44  ;;  %2048 = vmatpush3.xpose.msra.mxu1 %v129_v46  ;;  %v1640_v44 = vld [vmem:[%s3610_s1 + $0x110] sm:$0xff] }
  0x38   :  { %2080 = vmatprep.subr.mxu0 %v2654_v3  ;;  %2049 = vmatprep.subr.mxu1 %v2654_v3 }
  0x39   :  { %2081 = vmatpush3.msra.mxu0 %v130_v45  ;;  %v1639_v45 = vld [vmem:[%s3610_s1 + $0x108] sm:$0xff] }
  0x3a   :  { %2082 = vmatprep.subr.mxu0 %v2654_v3 }
  0x3b   :  { %2083 = vmatpush3.msra.mxu0 %v129_v46  ;;  %2050 = vmatpush3.xpose.msra.mxu1 %v128_v47  ;;  %v1638_v46 = vld [vmem:[%s3610_s1 + $0x100] sm:$0xff] }
  0x3c   :  { %2084 = vmatprep.subr.mxu0 %v2654_v3  ;;  %2051 = vmatprep.subr.mxu1 %v2654_v3 }
  0x3d   :  { %2085 = vmatpush3.msra.mxu0 %v128_v47 }
  0x3e   :  { %2086 = vmatprep.subr.mxu0 %v2654_v3 }
  0x3f   :  { %2087 = vmatpush3.msra.mxu0 %v127_v48  ;;  %2052 = vmatpush3.xpose.msra.mxu1 %v127_v48 }
  0x40   :  { %2088 = vmatprep.subr.mxu0 %v2654_v3  ;;  %2053 = vmatprep.subr.mxu1 %v2654_v3 }
  0x41   :  { %2089 = vmatpush3.msra.mxu0 %v126_v49 }
  0x42   :  { %2093 = vmatprep.subr.mxu0 %v2654_v3 }
  0x43   :  { %2054 = vmatpush3.xpose.msra.mxu1 %v126_v49 }
  0x44   :  { %2128 = vmatprep.subr.mxu1 %v2654_v3 }
  0xe2   :  { %v2877_v50 = vpop.f32.mrf.mxu0 }
  0xe3   :  { %2056 = vmatmul.mubr.f32.vlgmr.msra.gmra.mxu1 %v2877_v50  ;;  %v317_v17 = vrot.slane %v2877_v50, 1  ;;  %v492_v51 = vrot.slane %v2877_v50, 2  ;;  %v667_v21 = vrot.slane %v2877_v50, 3 }
  0xe4   :  { %2160 = vmatprep.mubr.msk.f32.mxu1 %vm2655_vm0, %v2654_v3  ;;  %2129 = vmatpush3.msra.mxu1 %v1637_v61  ;;  %v2975_v18 = vpop.f32.mrf.mxu0 }
  0xe5   :  { %2130 = vmatprep.subr.mxu1 %v2654_v3 }
  0xe6   :  { %2131 = vmatpush3.msra.mxu1 %v1636_v62 }
  0xe7   :  { %2132 = vmatprep.subr.mxu1 %v2654_v3 }
  0xe8   :  { %2133 = vmatpush3.msra.mxu1 %v1635_v63 }
  0xe9   :  { %2134 = vmatprep.subr.mxu1 %v2654_v3 }
  0xea   :  { %2135 = vmatpush3.msra.mxu1 %v1634_v0 }
  0xeb   :  { %2136 = vmatprep.subr.mxu1 %v2654_v3 }
  0xec   :  { %2137 = vmatpush3.msra.mxu1 %v1633_v1 }
  0xed   :  { %2138 = vmatprep.subr.mxu1 %v2654_v3 }
  0xee   :  { %2139 = vmatpush3.msra.mxu1 %v1632_v2 }
  0xef   :  { %2140 = vmatprep.subr.mxu1 %v2654_v3 }
  0xf0   :  { %2141 = vmatpush3.msra.mxu1 %v1631_v4 }
  0xf1   :  { %2142 = vmatprep.subr.mxu1 %v2654_v3 }
  0xf2   :  { %2143 = vmatpush3.msra.mxu1 %v1630_v5 }
  0xf3   :  { %2144 = vmatprep.subr.mxu1 %v2654_v3 }
  0xf4   :  { %2145 = vmatpush3.msra.mxu1 %v1629_v6 }
  0xf5   :  { %2146 = vmatprep.subr.mxu1 %v2654_v3 }
  0xf6   :  { %2147 = vmatpush3.msra.mxu1 %v1628_v7 }
  0xf7   :  { %2148 = vmatprep.subr.mxu1 %v2654_v3 }
  0xf8   :  { %2149 = vmatpush3.msra.mxu1 %v1627_v8 }
  0xf9   :  { %2150 = vmatprep.subr.mxu1 %v2654_v3 }
  0xfa   :  { %2151 = vmatpush3.msra.mxu1 %v1626_v9 }
  0xfb   :  { %2152 = vmatprep.subr.mxu1 %v2654_v3 }
  0xfc   :  { %2153 = vmatpush3.msra.mxu1 %v1625_v10 }
  0xfd   :  { %2154 = vmatprep.subr.mxu1 %v2654_v3 }
  0xfe   :  { %2155 = vmatpush3.msra.mxu1 %v1624_v11 }
  0xff   :  { %2156 = vmatprep.subr.mxu1 %v2654_v3 }
 0x100   :  { %2157 = vmatpush3.msra.mxu1 %v1623_v12 }
 0x101   :  { %2158 = vmatprep.subr.mxu1 %v2654_v3 }
 0x102   :  { %2159 = vmatpush3.msra.mxu1 %v1622_v13 }
 0x103   :  { %2163 = vmatprep.subr.mxu1 %v2654_v3 }
 0x1a3   :  { %v208_v52 = vpop.f32.mrf.mxu1 }
 0x1a4   :  { %v214_v53 = vsel %vm213_vm1, -1e+30, %v208_v52 }
 0x1a5   :  { %v2057_v54 = vpop.f32.mrf.mxu1  ;;  %v216_v55 = vsel %vm215_vm2, %v214_v53, -inf }
 0x1a6   :  { %217 = vmax.xlane.f32.xlu0 %v216_v55  ;;  %v564_v54 = vld [vmem:[%s3612_s2 + $0x2] sm:$0x1] }
 0x1a7   :  { %vm565_vm4 = vcmp.ne.s32.totalorder %v564_v54, 0  ;;  %v842_v54 = vrot.slane %v2877_v50, 4 }
 0x22f   :  { %v218_v56 = vpop.xlane.xlu0 %217 }
 0x230   :  { %v219_v57 = vsub.f32 %v214_v53, %v218_v56 }
 0x232   :  { %v220_v58 = vmul.f32 1.442695, %v219_v57 }
 0x234   :  { %2620 = vpow2.f32 %v220_v58 }
 0x241   :  { %v2621_v59 = vpop.eup %2620 }
 0x242   :  { %v222_v60 = vsel %vm215_vm2, %v2621_v59, 0.0 }
 0x243   :  { %223 = vadd.xlane.f32.xlu0 %v222_v60 }
 0x2cc   :  { %v224_v14 = vpop.xlane.xlu0 %223 }
 0x2cd   :  { %2622 = vrcp.f32 %v224_v14  ;;  %v1656_v14 = vld [vmem:[%s3610_s1 + $0x190] sm:$0xff] }
 0x2da   :  { %v2623_v15 = vpop.eup %2622 }
 0x2db   :  { %v226_v16 = vmul.f32 %v2623_v15, %v2621_v59  ;;  %v1655_v15 = vld [vmem:[%s3610_s1 + $0x188] sm:$0xff] }
 0x2dd   :  { %227 = vst [vmem:[%s3613_s6] sm:$0x1] %v226_v16  ;;  %2091 = vmatmul.mubr.f32.vlgmr.msra.gmra.mxu0 %v226_v16  ;;  %v1654_v16 = vld [vmem:[%s3610_s1 + $0x180] sm:$0xff] }
 0x2de   :  { %2094 = vmatpush3.xpose.msra.mxu0 %v1637_v61  ;;  %2125 = vmatprep.mubr.msk.f32.mxu0 %vm2655_vm0, %v2654_v3 }
 0x2df   :  { %2095 = vmatprep.subr.mxu0 %v2654_v3 }
 0x2e2   :  { %2096 = vmatpush3.xpose.msra.mxu0 %v1636_v62 }
 0x2e3   :  { %2097 = vmatprep.subr.mxu0 %v2654_v3 }
 0x2e6   :  { %2098 = vmatpush3.xpose.msra.mxu0 %v1635_v63 }
 0x2e7   :  { %2099 = vmatprep.subr.mxu0 %v2654_v3 }
 0x2ea   :  { %2100 = vmatpush3.xpose.msra.mxu0 %v1634_v0  ;;  %v1669_v0 = vld [vmem:[%s3610_s1 + $0x1f8] sm:$0xff] }
 0x2eb   :  { %2101 = vmatprep.subr.mxu0 %v2654_v3 }
 0x2ee   :  { %2102 = vmatpush3.xpose.msra.mxu0 %v1633_v1  ;;  %v1668_v1 = vld [vmem:[%s3610_s1 + $0x1f0] sm:$0xff] }
 0x2ef   :  { %2103 = vmatprep.subr.mxu0 %v2654_v3 }
 0x2f2   :  { %2104 = vmatpush3.xpose.msra.mxu0 %v1632_v2  ;;  %v1667_v2 = vld [vmem:[%s3610_s1 + $0x1e8] sm:$0xff] }
 0x2f3   :  { %2105 = vmatprep.subr.mxu0 %v2654_v3 }
 0x2f6   :  { %2106 = vmatpush3.xpose.msra.mxu0 %v1631_v4  ;;  %v1666_v4 = vld [vmem:[%s3610_s1 + $0x1e0] sm:$0xff] }
 0x2f7   :  { %2107 = vmatprep.subr.mxu0 %v2654_v3 }
 0x2fa   :  { %2108 = vmatpush3.xpose.msra.mxu0 %v1630_v5  ;;  %v1665_v5 = vld [vmem:[%s3610_s1 + $0x1d8] sm:$0xff] }
 0x2fb   :  { %2109 = vmatprep.subr.mxu0 %v2654_v3 }
 0x2fe   :  { %2110 = vmatpush3.xpose.msra.mxu0 %v1629_v6  ;;  %v1664_v6 = vld [vmem:[%s3610_s1 + $0x1d0] sm:$0xff] }
 0x2ff   :  { %2111 = vmatprep.subr.mxu0 %v2654_v3 }
 0x302   :  { %2112 = vmatpush3.xpose.msra.mxu0 %v1628_v7  ;;  %v1663_v7 = vld [vmem:[%s3610_s1 + $0x1c8] sm:$0xff] }
 0x303   :  { %2113 = vmatprep.subr.mxu0 %v2654_v3 }
 0x306   :  { %2114 = vmatpush3.xpose.msra.mxu0 %v1627_v8  ;;  %v1662_v8 = vld [vmem:[%s3610_s1 + $0x1c0] sm:$0xff] }
 0x307   :  { %2115 = vmatprep.subr.mxu0 %v2654_v3 }
 0x30a   :  { %2116 = vmatpush3.xpose.msra.mxu0 %v1626_v9  ;;  %v1661_v9 = vld [vmem:[%s3610_s1 + $0x1b8] sm:$0xff] }
 0x30b   :  { %2117 = vmatprep.subr.mxu0 %v2654_v3 }
 0x30e   :  { %2118 = vmatpush3.xpose.msra.mxu0 %v1625_v10  ;;  %v1660_v10 = vld [vmem:[%s3610_s1 + $0x1b0] sm:$0xff] }
 0x30f   :  { %2119 = vmatprep.subr.mxu0 %v2654_v3 }
 0x312   :  { %2120 = vmatpush3.xpose.msra.mxu0 %v1624_v11  ;;  %v1659_v11 = vld [vmem:[%s3610_s1 + $0x1a8] sm:$0xff] }
 0x313   :  { %2121 = vmatprep.subr.mxu0 %v2654_v3 }
 0x316   :  { %2122 = vmatpush3.xpose.msra.mxu0 %v1623_v12  ;;  %v1658_v12 = vld [vmem:[%s3610_s1 + $0x1a0] sm:$0xff] }
 0x317   :  { %2123 = vmatprep.subr.mxu0 %v2654_v3 }
 0x31a   :  { %2124 = vmatpush3.xpose.msra.mxu0 %v1622_v13  ;;  %v1657_v13 = vld [vmem:[%s3610_s1 + $0x198] sm:$0xff] }
 0x31b   :  { %2198 = vmatprep.subr.mxu0 %v2654_v3 }
 0x31d   :  { %2126 = vmatmul.mubr.f32.vlgmr.msra.gmra.mxu0 %v317_v17 }
 0x31e   :  { %2230 = vmatprep.mubr.msk.f32.mxu0 %vm2655_vm0, %v2654_v3  ;;  %2199 = vmatpush3.msra.mxu0 %v1653_v31 }
 0x31f   :  { %2200 = vmatprep.subr.mxu0 %v2654_v3 }
 0x320   :  { %2201 = vmatpush3.msra.mxu0 %v1652_v32 }
 0x321   :  { %2202 = vmatprep.subr.mxu0 %v2654_v3 }
 0x322   :  { %2203 = vmatpush3.msra.mxu0 %v1651_v33 }
 0x323   :  { %2204 = vmatprep.subr.mxu0 %v2654_v3 }
 0x324   :  { %2205 = vmatpush3.msra.mxu0 %v1650_v34 }
 0x325   :  { %2206 = vmatprep.subr.mxu0 %v2654_v3 }
 0x326   :  { %2207 = vmatpush3.msra.mxu0 %v1649_v35 }
 0x327   :  { %2208 = vmatprep.subr.mxu0 %v2654_v3 }
 0x328   :  { %2209 = vmatpush3.msra.mxu0 %v1648_v36 }
 0x329   :  { %2210 = vmatprep.subr.mxu0 %v2654_v3 }
 0x32a   :  { %2211 = vmatpush3.msra.mxu0 %v1647_v37 }
 0x32b   :  { %2212 = vmatprep.subr.mxu0 %v2654_v3 }
 0x32c   :  { %2213 = vmatpush3.msra.mxu0 %v1646_v38 }
 0x32d   :  { %2214 = vmatprep.subr.mxu0 %v2654_v3 }
 0x32e   :  { %2215 = vmatpush3.msra.mxu0 %v1645_v39 }
 0x32f   :  { %2216 = vmatprep.subr.mxu0 %v2654_v3 }
 0x330   :  { %2217 = vmatpush3.msra.mxu0 %v1644_v40 }
 0x331   :  { %2218 = vmatprep.subr.mxu0 %v2654_v3 }
 0x332   :  { %2219 = vmatpush3.msra.mxu0 %v1643_v41 }
 0x333   :  { %2220 = vmatprep.subr.mxu0 %v2654_v3 }
 0x334   :  { %2221 = vmatpush3.msra.mxu0 %v1642_v42 }
 0x335   :  { %2222 = vmatprep.subr.mxu0 %v2654_v3 }
 0x336   :  { %2223 = vmatpush3.msra.mxu0 %v1641_v43 }
 0x337   :  { %2224 = vmatprep.subr.mxu0 %v2654_v3 }
 0x338   :  { %2225 = vmatpush3.msra.mxu0 %v1640_v44 }
 0x339   :  { %2226 = vmatprep.subr.mxu0 %v2654_v3 }
 0x33a   :  { %2227 = vmatpush3.msra.mxu0 %v1639_v45 }
 0x33b   :  { %2228 = vmatprep.subr.mxu0 %v2654_v3 }
 0x33c   :  { %2229 = vmatpush3.msra.mxu0 %v1638_v46 }
 0x33d   :  { %2233 = vmatprep.subr.mxu0 %v2654_v3 }
 0x39d   :  { %v294_v19 = vpop.f32.mrf.mxu0 }
 0x39e   :  { %298 = vst [vmem:[#allocation2] sm:$0x1] %v294_v19 }
 0x39f   :  { %v2092_v20 = vpop.f32.mrf.mxu0 }
 0x3dd   :  { %v385_v22 = vpop.f32.mrf.mxu0 }
 0x3de   :  { %v391_v23 = vsel %vm390_vm3, -1e+30, %v385_v22 }
 0x3df   :  { %v2127_v24 = vpop.f32.mrf.mxu0  ;;  %v392_v25 = vsel %vm215_vm2, %v391_v23, -inf }
 0x3e0   :  { %393 = vmax.xlane.f32.xlu1 %v392_v25  ;;  %v739_v24 = vld [vmem:[%s3612_s2 + $0x3] sm:$0x1] }
 0x3e1   :  { %vm740_vm5 = vcmp.ne.s32.totalorder %v739_v24, 0  ;;  %v1017_v24 = vrot.slane %v2877_v50, 5 }
 0x469   :  { %v394_v26 = vpop.xlane.xlu1 %393 }
 0x46a   :  { %v395_v27 = vsub.f32 %v391_v23, %v394_v26 }
 0x46c   :  { %v396_v28 = vmul.f32 1.442695, %v395_v27 }
 0x46e   :  { %2624 = vpow2.f32 %v396_v28 }
 0x47b   :  { %v2625_v29 = vpop.eup %2624 }
 0x47c   :  { %v398_v30 = vsel %vm215_vm2, %v2625_v29, 0.0 }
 0x47d   :  { %399 = vadd.xlane.f32.xlu1 %v398_v30 }
 0x506   :  { %v400_v47 = vpop.xlane.xlu1 %399 }
 0x507   :  { %2626 = vrcp.f32 %v400_v47  ;;  %v1672_v47 = vld [vmem:[%s3610_s1 + $0x210] sm:$0xff] }
 0x514   :  { %v2627_v48 = vpop.eup %2626 }
 0x515   :  { %v402_v49 = vmul.f32 %v2627_v48, %v2625_v29  ;;  %v1671_v48 = vld [vmem:[%s3610_s1 + $0x208] sm:$0xff] }
 0x517   :  { %403 = vst [vmem:[%s3613_s6 + $0x1] sm:$0x1] %v402_v49  ;;  %2161 = vmatmul.mubr.f32.vlgmr.msra.gmra.mxu1 %v402_v49  ;;  %v1670_v49 = vld [vmem:[%s3610_s1 + $0x200] sm:$0xff] }
 0x518   :  { %2164 = vmatpush3.xpose.msra.mxu1 %v1653_v31  ;;  %2195 = vmatprep.mubr.msk.f32.mxu1 %vm2655_vm0, %v2654_v3 }
 0x519   :  { %2165 = vmatprep.subr.mxu1 %v2654_v3 }
 0x51c   :  { %2166 = vmatpush3.xpose.msra.mxu1 %v1652_v32 }
 0x51d   :  { %2167 = vmatprep.subr.mxu1 %v2654_v3 }
 0x520   :  { %2168 = vmatpush3.xpose.msra.mxu1 %v1651_v33 }
 0x521   :  { %2169 = vmatprep.subr.mxu1 %v2654_v3 }
 0x524   :  { %2170 = vmatpush3.xpose.msra.mxu1 %v1650_v34  ;;  %v1685_v34 = vld [vmem:[%s3610_s1 + $0x278] sm:$0xff] }
 0x525   :  { %2171 = vmatprep.subr.mxu1 %v2654_v3 }
 0x528   :  { %2172 = vmatpush3.xpose.msra.mxu1 %v1649_v35  ;;  %v1684_v35 = vld [vmem:[%s3610_s1 + $0x270] sm:$0xff] }
 0x529   :  { %2173 = vmatprep.subr.mxu1 %v2654_v3 }
 0x52c   :  { %2174 = vmatpush3.xpose.msra.mxu1 %v1648_v36  ;;  %v1683_v36 = vld [vmem:[%s3610_s1 + $0x268] sm:$0xff] }
 0x52d   :  { %2175 = vmatprep.subr.mxu1 %v2654_v3 }
 0x530   :  { %2176 = vmatpush3.xpose.msra.mxu1 %v1647_v37  ;;  %v1682_v37 = vld [vmem:[%s3610_s1 + $0x260] sm:$0xff] }
 0x531   :  { %2177 = vmatprep.subr.mxu1 %v2654_v3 }
 0x534   :  { %2178 = vmatpush3.xpose.msra.mxu1 %v1646_v38  ;;  %v1681_v38 = vld [vmem:[%s3610_s1 + $0x258] sm:$0xff] }
 0x535   :  { %2179 = vmatprep.subr.mxu1 %v2654_v3 }
 0x538   :  { %2180 = vmatpush3.xpose.msra.mxu1 %v1645_v39  ;;  %v1680_v39 = vld [vmem:[%s3610_s1 + $0x250] sm:$0xff] }
 0x539   :  { %2181 = vmatprep.subr.mxu1 %v2654_v3 }
 0x53c   :  { %2182 = vmatpush3.xpose.msra.mxu1 %v1644_v40  ;;  %v1679_v40 = vld [vmem:[%s3610_s1 + $0x248] sm:$0xff] }
 0x53d   :  { %2183 = vmatprep.subr.mxu1 %v2654_v3 }
 0x540   :  { %2184 = vmatpush3.xpose.msra.mxu1 %v1643_v41  ;;  %v1678_v41 = vld [vmem:[%s3610_s1 + $0x240] sm:$0xff] }
 0x541   :  { %2185 = vmatprep.subr.mxu1 %v2654_v3 }
 0x544   :  { %2186 = vmatpush3.xpose.msra.mxu1 %v1642_v42  ;;  %v1677_v42 = vld [vmem:[%s3610_s1 + $0x238] sm:$0xff] }
 0x545   :  { %2187 = vmatprep.subr.mxu1 %v2654_v3 }
 0x548   :  { %2188 = vmatpush3.xpose.msra.mxu1 %v1641_v43  ;;  %v1676_v43 = vld [vmem:[%s3610_s1 + $0x230] sm:$0xff] }
 0x549   :  { %2189 = vmatprep.subr.mxu1 %v2654_v3 }
 0x54c   :  { %2190 = vmatpush3.xpose.msra.mxu1 %v1640_v44  ;;  %v1675_v44 = vld [vmem:[%s3610_s1 + $0x228] sm:$0xff] }
 0x54d   :  { %2191 = vmatprep.subr.mxu1 %v2654_v3 }
 0x550   :  { %2192 = vmatpush3.xpose.msra.mxu1 %v1639_v45  ;;  %v1674_v45 = vld [vmem:[%s3610_s1 + $0x220] sm:$0xff] }
 0x551   :  { %2193 = vmatprep.subr.mxu1 %v2654_v3 }
 0x554   :  { %2194 = vmatpush3.xpose.msra.mxu1 %v1638_v46  ;;  %v1673_v46 = vld [vmem:[%s3610_s1 + $0x218] sm:$0xff] }
 0x555   :  { %2268 = vmatprep.subr.mxu1 %v2654_v3 }
 0x557   :  { %2196 = vmatmul.mubr.f32.vlgmr.msra.gmra.mxu1 %v492_v51 }
 0x558   :  { %2300 = vmatprep.mubr.msk.f32.mxu1 %vm2655_vm0, %v2654_v3  ;;  %2269 = vmatpush3.msra.mxu1 %v1669_v0 }
 0x559   :  { %2270 = vmatprep.subr.mxu1 %v2654_v3 }
 0x55a   :  { %2271 = vmatpush3.msra.mxu1 %v1668_v1 }
 0x55b   :  { %2272 = vmatprep.subr.mxu1 %v2654_v3 }
 0x55c   :  { %2273 = vmatpush3.msra.mxu1 %v1667_v2 }
 0x55d   :  { %2274 = vmatprep.subr.mxu1 %v2654_v3 }
 0x55e   :  { %2275 = vmatpush3.msra.mxu1 %v1666_v4 }
 0x55f   :  { %2276 = vmatprep.subr.mxu1 %v2654_v3 }
 0x560   :  { %2277 = vmatpush3.msra.mxu1 %v1665_v5 }
 0x561   :  { %2278 = vmatprep.subr.mxu1 %v2654_v3 }
 0x562   :  { %2279 = vmatpush3.msra.mxu1 %v1664_v6 }
 0x563   :  { %2280 = vmatprep.subr.mxu1 %v2654_v3 }
 0x564   :  { %2281 = vmatpush3.msra.mxu1 %v1663_v7 }
 0x565   :  { %2282 = vmatprep.subr.mxu1 %v2654_v3 }
 0x566   :  { %2283 = vmatpush3.msra.mxu1 %v1662_v8 }
 0x567   :  { %2284 = vmatprep.subr.mxu1 %v2654_v3 }
 0x568   :  { %2285 = vmatpush3.msra.mxu1 %v1661_v9 }
 0x569   :  { %2286 = vmatprep.subr.mxu1 %v2654_v3 }
 0x56a   :  { %2287 = vmatpush3.msra.mxu1 %v1660_v10 }
 0x56b   :  { %2288 = vmatprep.subr.mxu1 %v2654_v3 }
 0x56c   :  { %2289 = vmatpush3.msra.mxu1 %v1659_v11 }
 0x56d   :  { %2290 = vmatprep.subr.mxu1 %v2654_v3 }
 0x56e   :  { %2291 = vmatpush3.msra.mxu1 %v1658_v12 }
 0x56f   :  { %2292 = vmatprep.subr.mxu1 %v2654_v3 }
 0x570   :  { %2293 = vmatpush3.msra.mxu1 %v1657_v13 }
 0x571   :  { %2294 = vmatprep.subr.mxu1 %v2654_v3 }
 0x572   :  { %2295 = vmatpush3.msra.mxu1 %v1656_v14 }
 0x573   :  { %2296 = vmatprep.subr.mxu1 %v2654_v3 }
 0x574   :  { %2297 = vmatpush3.msra.mxu1 %v1655_v15 }
 0x575   :  { %2298 = vmatprep.subr.mxu1 %v2654_v3 }
 0x576   :  { %2299 = vmatpush3.msra.mxu1 %v1654_v16 }
 0x577   :  { %2303 = vmatprep.subr.mxu1 %v2654_v3 }
 0x5d7   :  { %v470_v52 = vpop.f32.mrf.mxu1 }
 0x5d8   :  { %474 = vst [vmem:[#allocation2 + $0x1] sm:$0x1] %v470_v52 }
 0x5d9   :  { %v2162_v53 = vpop.f32.mrf.mxu1 }
 0x617   :  { %v560_v55 = vpop.f32.mrf.mxu1 }
 0x618   :  { %v566_v56 = vsel %vm565_vm4, -1e+30, %v560_v55 }
 0x619   :  { %v2197_v57 = vpop.f32.mrf.mxu1  ;;  %v567_v58 = vsel %vm215_vm2, %v566_v56, -inf }
 0x61a   :  { %568 = vmax.xlane.f32.xlu0 %v567_v58  ;;  %v914_v57 = vld [vmem:[%s3612_s2 + $0x4] sm:$0x1] }
 0x61b   :  { %vm915_vm6 = vcmp.ne.s32.totalorder %v914_v57, 0  ;;  %v1192_v57 = vrot.slane %v2877_v50, 6 }
 0x6a3   :  { %v569_v59 = vpop.xlane.xlu0 %568 }
 0x6a4   :  { %v570_v60 = vsub.f32 %v566_v56, %v569_v59 }
 0x6a6   :  { %v571_v61 = vmul.f32 1.442695, %v570_v60 }
 0x6a8   :  { %2628 = vpow2.f32 %v571_v61 }
 0x6b5   :  { %v2629_v62 = vpop.eup %2628 }
 0x6b6   :  { %v573_v63 = vsel %vm215_vm2, %v2629_v62, 0.0 }
 0x6b7   :  { %574 = vadd.xlane.f32.xlu1 %v573_v63 }
 0x740   :  { %v575_v17 = vpop.xlane.xlu1 %574 }
 0x741   :  { %2630 = vrcp.f32 %v575_v17  ;;  %v1688_v17 = vld [vmem:[%s3610_s1 + $0x290] sm:$0xff] }
 0x74e   :  { %v2631_v19 = vpop.eup %2630 }
 0x74f   :  { %v577_v20 = vmul.f32 %v2631_v19, %v2629_v62  ;;  %v1687_v19 = vld [vmem:[%s3610_s1 + $0x288] sm:$0xff] }
 0x751   :  { %578 = vst [vmem:[%s3613_s6 + $0x2] sm:$0x1] %v577_v20  ;;  %2231 = vmatmul.mubr.f32.vlgmr.msra.gmra.mxu0 %v577_v20  ;;  %v1686_v20 = vld [vmem:[%s3610_s1 + $0x280] sm:$0xff] }
 0x752   :  { %2234 = vmatpush3.xpose.msra.mxu0 %v1669_v0  ;;  %2265 = vmatprep.mubr.msk.f32.mxu0 %vm2655_vm0, %v2654_v3 }
 0x753   :  { %2235 = vmatprep.subr.mxu0 %v2654_v3 }
 0x756   :  { %2236 = vmatpush3.xpose.msra.mxu0 %v1668_v1 }
 0x757   :  { %2237 = vmatprep.subr.mxu0 %v2654_v3 }
 0x75a   :  { %2238 = vmatpush3.xpose.msra.mxu0 %v1667_v2 }
 0x75b   :  { %2239 = vmatprep.subr.mxu0 %v2654_v3 }
 0x75e   :  { %2240 = vmatpush3.xpose.msra.mxu0 %v1666_v4  ;;  %v1701_v4 = vld [vmem:[%s3610_s1 + $0x2f8] sm:$0xff] }
 0x75f   :  { %2241 = vmatprep.subr.mxu0 %v2654_v3 }
 0x762   :  { %2242 = vmatpush3.xpose.msra.mxu0 %v1665_v5  ;;  %v1700_v5 = vld [vmem:[%s3610_s1 + $0x2f0] sm:$0xff] }
 0x763   :  { %2243 = vmatprep.subr.mxu0 %v2654_v3 }
 0x766   :  { %2244 = vmatpush3.xpose.msra.mxu0 %v1664_v6  ;;  %v1699_v6 = vld [vmem:[%s3610_s1 + $0x2e8] sm:$0xff] }
 0x767   :  { %2245 = vmatprep.subr.mxu0 %v2654_v3 }
 0x76a   :  { %2246 = vmatpush3.xpose.msra.mxu0 %v1663_v7  ;;  %v1698_v7 = vld [vmem:[%s3610_s1 + $0x2e0] sm:$0xff] }
 0x76b   :  { %2247 = vmatprep.subr.mxu0 %v2654_v3 }
 0x76e   :  { %2248 = vmatpush3.xpose.msra.mxu0 %v1662_v8  ;;  %v1697_v8 = vld [vmem:[%s3610_s1 + $0x2d8] sm:$0xff] }
 0x76f   :  { %2249 = vmatprep.subr.mxu0 %v2654_v3 }
 0x772   :  { %2250 = vmatpush3.xpose.msra.mxu0 %v1661_v9  ;;  %v1696_v9 = vld [vmem:[%s3610_s1 + $0x2d0] sm:$0xff] }
 0x773   :  { %2251 = vmatprep.subr.mxu0 %v2654_v3 }
 0x776   :  { %2252 = vmatpush3.xpose.msra.mxu0 %v1660_v10  ;;  %v1695_v10 = vld [vmem:[%s3610_s1 + $0x2c8] sm:$0xff] }
 0x777   :  { %2253 = vmatprep.subr.mxu0 %v2654_v3 }
 0x77a   :  { %2254 = vmatpush3.xpose.msra.mxu0 %v1659_v11  ;;  %v1694_v11 = vld [vmem:[%s3610_s1 + $0x2c0] sm:$0xff] }
 0x77b   :  { %2255 = vmatprep.subr.mxu0 %v2654_v3 }
 0x77e   :  { %2256 = vmatpush3.xpose.msra.mxu0 %v1658_v12  ;;  %v1693_v12 = vld [vmem:[%s3610_s1 + $0x2b8] sm:$0xff] }
 0x77f   :  { %2257 = vmatprep.subr.mxu0 %v2654_v3 }
 0x782   :  { %2258 = vmatpush3.xpose.msra.mxu0 %v1657_v13  ;;  %v1692_v13 = vld [vmem:[%s3610_s1 + $0x2b0] sm:$0xff] }
 0x783   :  { %2259 = vmatprep.subr.mxu0 %v2654_v3 }
 0x786   :  { %2260 = vmatpush3.xpose.msra.mxu0 %v1656_v14  ;;  %v1691_v14 = vld [vmem:[%s3610_s1 + $0x2a8] sm:$0xff] }
 0x787   :  { %2261 = vmatprep.subr.mxu0 %v2654_v3 }
 0x78a   :  { %2262 = vmatpush3.xpose.msra.mxu0 %v1655_v15  ;;  %v1690_v15 = vld [vmem:[%s3610_s1 + $0x2a0] sm:$0xff] }
 0x78b   :  { %2263 = vmatprep.subr.mxu0 %v2654_v3 }
 0x78e   :  { %2264 = vmatpush3.xpose.msra.mxu0 %v1654_v16  ;;  %v1689_v16 = vld [vmem:[%s3610_s1 + $0x298] sm:$0xff] }
 0x78f   :  { %2338 = vmatprep.subr.mxu0 %v2654_v3 }
 0x791   :  { %2266 = vmatmul.mubr.f32.vlgmr.msra.gmra.mxu0 %v667_v21 }
 0x792   :  { %2370 = vmatprep.mubr.msk.f32.mxu0 %vm2655_vm0, %v2654_v3  ;;  %2339 = vmatpush3.msra.mxu0 %v1685_v34 }
 0x793   :  { %2340 = vmatprep.subr.mxu0 %v2654_v3 }
 0x794   :  { %2341 = vmatpush3.msra.mxu0 %v1684_v35 }
 0x795   :  { %2342 = vmatprep.subr.mxu0 %v2654_v3 }
 0x796   :  { %2343 = vmatpush3.msra.mxu0 %v1683_v36 }
 0x797   :  { %2344 = vmatprep.subr.mxu0 %v2654_v3 }
 0x798   :  { %2345 = vmatpush3.msra.mxu0 %v1682_v37 }
 0x799   :  { %2346 = vmatprep.subr.mxu0 %v2654_v3 }
 0x79a   :  { %2347 = vmatpush3.msra.mxu0 %v1681_v38 }
 0x79b   :  { %2348 = vmatprep.subr.mxu0 %v2654_v3 }
 0x79c   :  { %2349 = vmatpush3.msra.mxu0 %v1680_v39 }
 0x79d   :  { %2350 = vmatprep.subr.mxu0 %v2654_v3 }
 0x79e   :  { %2351 = vmatpush3.msra.mxu0 %v1679_v40 }
 0x79f   :  { %2352 = vmatprep.subr.mxu0 %v2654_v3 }
 0x7a0   :  { %2353 = vmatpush3.msra.mxu0 %v1678_v41 }
 0x7a1   :  { %2354 = vmatprep.subr.mxu0 %v2654_v3 }
 0x7a2   :  { %2355 = vmatpush3.msra.mxu0 %v1677_v42 }
 0x7a3   :  { %2356 = vmatprep.subr.mxu0 %v2654_v3 }
 0x7a4   :  { %2357 = vmatpush3.msra.mxu0 %v1676_v43 }
 0x7a5   :  { %2358 = vmatprep.subr.mxu0 %v2654_v3 }
 0x7a6   :  { %2359 = vmatpush3.msra.mxu0 %v1675_v44 }
 0x7a7   :  { %2360 = vmatprep.subr.mxu0 %v2654_v3 }
 0x7a8   :  { %2361 = vmatpush3.msra.mxu0 %v1674_v45 }
 0x7a9   :  { %2362 = vmatprep.subr.mxu0 %v2654_v3 }
 0x7aa   :  { %2363 = vmatpush3.msra.mxu0 %v1673_v46 }
 0x7ab   :  { %2364 = vmatprep.subr.mxu0 %v2654_v3 }
 0x7ac   :  { %2365 = vmatpush3.msra.mxu0 %v1672_v47 }
 0x7ad   :  { %2366 = vmatprep.subr.mxu0 %v2654_v3 }
 0x7ae   :  { %2367 = vmatpush3.msra.mxu0 %v1671_v48 }
 0x7af   :  { %2368 = vmatprep.subr.mxu0 %v2654_v3 }
 0x7b0   :  { %2369 = vmatpush3.msra.mxu0 %v1670_v49 }
 0x7b1   :  { %2373 = vmatprep.subr.mxu0 %v2654_v3 }
 0x811   :  { %v645_v22 = vpop.f32.mrf.mxu0 }
 0x812   :  { %649 = vst [vmem:[#allocation2 + $0x2] sm:$0x1] %v645_v22 }
 0x813   :  { %v2232_v23 = vpop.f32.mrf.mxu0 }
 0x851   :  { %v735_v25 = vpop.f32.mrf.mxu0 }
 0x852   :  { %v741_v26 = vsel %vm740_vm5, -1e+30, %v735_v25 }
 0x853   :  { %v2267_v27 = vpop.f32.mrf.mxu0  ;;  %v742_v28 = vsel %vm215_vm2, %v741_v26, -inf }
 0x854   :  { %743 = vmax.xlane.f32.xlu0 %v742_v28  ;;  %v1089_v27 = vld [vmem:[%s3612_s2 + $0x5] sm:$0x1] }
 0x855   :  { %vm1090_vm7 = vcmp.ne.s32.totalorder %v1089_v27, 0  ;;  %v1367_v27 = vrot.slane %v2877_v50, 7 }
 0x8dd   :  { %v744_v29 = vpop.xlane.xlu0 %743 }
 0x8de   :  { %v745_v30 = vsub.f32 %v741_v26, %v744_v29 }
 0x8e0   :  { %v746_v31 = vmul.f32 1.442695, %v745_v30 }
 0x8e2   :  { %2632 = vpow2.f32 %v746_v31 }
 0x8ef   :  { %v2633_v32 = vpop.eup %2632 }
 0x8f0   :  { %v748_v33 = vsel %vm215_vm2, %v2633_v32, 0.0 }
 0x8f1   :  { %749 = vadd.xlane.f32.xlu1 %v748_v33 }
 0x97a   :  { %v750_v51 = vpop.xlane.xlu1 %749 }
 0x97b   :  { %2634 = vrcp.f32 %v750_v51  ;;  %v1704_v51 = vld [vmem:[%s3610_s1 + $0x310] sm:$0xff] }
 0x988   :  { %v2635_v52 = vpop.eup %2634 }
 0x989   :  { %v752_v53 = vmul.f32 %v2635_v52, %v2633_v32  ;;  %v1703_v52 = vld [vmem:[%s3610_s1 + $0x308] sm:$0xff] }
 0x98b   :  { %753 = vst [vmem:[%s3613_s6 + $0x3] sm:$0x1] %v752_v53  ;;  %2301 = vmatmul.mubr.f32.vlgmr.msra.gmra.mxu1 %v752_v53  ;;  %v1702_v53 = vld [vmem:[%s3610_s1 + $0x300] sm:$0xff] }
 0x98c   :  { %2304 = vmatpush3.xpose.msra.mxu1 %v1685_v34  ;;  %2335 = vmatprep.mubr.msk.f32.mxu1 %vm2655_vm0, %v2654_v3 }
 0x98d   :  { %2305 = vmatprep.subr.mxu1 %v2654_v3 }
 0x990   :  { %2306 = vmatpush3.xpose.msra.mxu1 %v1684_v35 }
 0x991   :  { %2307 = vmatprep.subr.mxu1 %v2654_v3 }
 0x994   :  { %2308 = vmatpush3.xpose.msra.mxu1 %v1683_v36 }
 0x995   :  { %2309 = vmatprep.subr.mxu1 %v2654_v3 }
 0x998   :  { %2310 = vmatpush3.xpose.msra.mxu1 %v1682_v37  ;;  %v1717_v37 = vld [vmem:[%s3610_s1 + $0x378] sm:$0xff] }
 0x999   :  { %2311 = vmatprep.subr.mxu1 %v2654_v3 }
 0x99c   :  { %2312 = vmatpush3.xpose.msra.mxu1 %v1681_v38  ;;  %v1716_v38 = vld [vmem:[%s3610_s1 + $0x370] sm:$0xff] }
 0x99d   :  { %2313 = vmatprep.subr.mxu1 %v2654_v3 }
 0x9a0   :  { %2314 = vmatpush3.xpose.msra.mxu1 %v1680_v39  ;;  %v1715_v39 = vld [vmem:[%s3610_s1 + $0x368] sm:$0xff] }
 0x9a1   :  { %2315 = vmatprep.subr.mxu1 %v2654_v3 }
 0x9a4   :  { %2316 = vmatpush3.xpose.msra.mxu1 %v1679_v40  ;;  %v1714_v40 = vld [vmem:[%s3610_s1 + $0x360] sm:$0xff] }
 0x9a5   :  { %2317 = vmatprep.subr.mxu1 %v2654_v3 }
 0x9a8   :  { %2318 = vmatpush3.xpose.msra.mxu1 %v1678_v41  ;;  %v1713_v41 = vld [vmem:[%s3610_s1 + $0x358] sm:$0xff] }
 0x9a9   :  { %2319 = vmatprep.subr.mxu1 %v2654_v3 }
 0x9ac   :  { %2320 = vmatpush3.xpose.msra.mxu1 %v1677_v42  ;;  %v1712_v42 = vld [vmem:[%s3610_s1 + $0x350] sm:$0xff] }
 0x9ad   :  { %2321 = vmatprep.subr.mxu1 %v2654_v3 }
 0x9b0   :  { %2322 = vmatpush3.xpose.msra.mxu1 %v1676_v43  ;;  %v1711_v43 = vld [vmem:[%s3610_s1 + $0x348] sm:$0xff] }
 0x9b1   :  { %2323 = vmatprep.subr.mxu1 %v2654_v3 }
 0x9b4   :  { %2324 = vmatpush3.xpose.msra.mxu1 %v1675_v44  ;;  %v1710_v44 = vld [vmem:[%s3610_s1 + $0x340] sm:$0xff] }
 0x9b5   :  { %2325 = vmatprep.subr.mxu1 %v2654_v3 }
 0x9b8   :  { %2326 = vmatpush3.xpose.msra.mxu1 %v1674_v45  ;;  %v1709_v45 = vld [vmem:[%s3610_s1 + $0x338] sm:$0xff] }
 0x9b9   :  { %2327 = vmatprep.subr.mxu1 %v2654_v3 }
 0x9bc   :  { %2328 = vmatpush3.xpose.msra.mxu1 %v1673_v46  ;;  %v1708_v46 = vld [vmem:[%s3610_s1 + $0x330] sm:$0xff] }
 0x9bd   :  { %2329 = vmatprep.subr.mxu1 %v2654_v3 }
 0x9c0   :  { %2330 = vmatpush3.xpose.msra.mxu1 %v1672_v47  ;;  %v1707_v47 = vld [vmem:[%s3610_s1 + $0x328] sm:$0xff] }
 0x9c1   :  { %2331 = vmatprep.subr.mxu1 %v2654_v3 }
 0x9c4   :  { %2332 = vmatpush3.xpose.msra.mxu1 %v1671_v48  ;;  %v1706_v48 = vld [vmem:[%s3610_s1 + $0x320] sm:$0xff] }
 0x9c5   :  { %2333 = vmatprep.subr.mxu1 %v2654_v3 }
 0x9c8   :  { %2334 = vmatpush3.xpose.msra.mxu1 %v1670_v49  ;;  %v1705_v49 = vld [vmem:[%s3610_s1 + $0x318] sm:$0xff] }
 0x9c9   :  { %2408 = vmatprep.subr.mxu1 %v2654_v3 }
 0x9cb   :  { %2336 = vmatmul.mubr.f32.vlgmr.msra.gmra.mxu1 %v842_v54 }
 0x9cc   :  { %2440 = vmatprep.mubr.msk.f32.mxu1 %vm2655_vm0, %v2654_v3  ;;  %2409 = vmatpush3.msra.mxu1 %v1701_v4 }
 0x9cd   :  { %2410 = vmatprep.subr.mxu1 %v2654_v3 }
 0x9ce   :  { %2411 = vmatpush3.msra.mxu1 %v1700_v5 }
 0x9cf   :  { %2412 = vmatprep.subr.mxu1 %v2654_v3 }
 0x9d0   :  { %2413 = vmatpush3.msra.mxu1 %v1699_v6 }
 0x9d1   :  { %2414 = vmatprep.subr.mxu1 %v2654_v3 }
 0x9d2   :  { %2415 = vmatpush3.msra.mxu1 %v1698_v7 }
 0x9d3   :  { %2416 = vmatprep.subr.mxu1 %v2654_v3 }
 0x9d4   :  { %2417 = vmatpush3.msra.mxu1 %v1697_v8 }
 0x9d5   :  { %2418 = vmatprep.subr.mxu1 %v2654_v3 }
 0x9d6   :  { %2419 = vmatpush3.msra.mxu1 %v1696_v9 }
 0x9d7   :  { %2420 = vmatprep.subr.mxu1 %v2654_v3 }
 0x9d8   :  { %2421 = vmatpush3.msra.mxu1 %v1695_v10 }
 0x9d9   :  { %2422 = vmatprep.subr.mxu1 %v2654_v3 }
 0x9da   :  { %2423 = vmatpush3.msra.mxu1 %v1694_v11 }
 0x9db   :  { %2424 = vmatprep.subr.mxu1 %v2654_v3 }
 0x9dc   :  { %2425 = vmatpush3.msra.mxu1 %v1693_v12 }
 0x9dd   :  { %2426 = vmatprep.subr.mxu1 %v2654_v3 }
 0x9de   :  { %2427 = vmatpush3.msra.mxu1 %v1692_v13 }
 0x9df   :  { %2428 = vmatprep.subr.mxu1 %v2654_v3 }
 0x9e0   :  { %2429 = vmatpush3.msra.mxu1 %v1691_v14 }
 0x9e1   :  { %2430 = vmatprep.subr.mxu1 %v2654_v3 }
 0x9e2   :  { %2431 = vmatpush3.msra.mxu1 %v1690_v15 }
 0x9e3   :  { %2432 = vmatprep.subr.mxu1 %v2654_v3 }
 0x9e4   :  { %2433 = vmatpush3.msra.mxu1 %v1689_v16 }
 0x9e5   :  { %2434 = vmatprep.subr.mxu1 %v2654_v3 }
 0x9e6   :  { %2435 = vmatpush3.msra.mxu1 %v1688_v17 }
 0x9e7   :  { %2436 = vmatprep.subr.mxu1 %v2654_v3 }
 0x9e8   :  { %2437 = vmatpush3.msra.mxu1 %v1687_v19 }
 0x9e9   :  { %2438 = vmatprep.subr.mxu1 %v2654_v3 }
 0x9ea   :  { %2439 = vmatpush3.msra.mxu1 %v1686_v20 }
 0x9eb   :  { %2443 = vmatprep.subr.mxu1 %v2654_v3 }
 0xa4b   :  { %v820_v55 = vpop.f32.mrf.mxu1 }
 0xa4c   :  { %824 = vst [vmem:[#allocation2 + $0x3] sm:$0x1] %v820_v55 }
 0xa4d   :  { %v2302_v56 = vpop.f32.mrf.mxu1 }
 0xa8b   :  { %v910_v58 = vpop.f32.mrf.mxu1 }
 0xa8c   :  { %v916_v59 = vsel %vm915_vm6, -1e+30, %v910_v58 }
 0xa8d   :  { %v2337_v60 = vpop.f32.mrf.mxu1  ;;  %v917_v61 = vsel %vm215_vm2, %v916_v59, -inf }
 0xa8e   :  { %918 = vmax.xlane.f32.xlu0 %v917_v61  ;;  %v1264_v60 = vld [vmem:[%s3612_s2 + $0x6] sm:$0x1] }
 0xa8f   :  { %vm1265_vm8 = vcmp.ne.s32.totalorder %v1264_v60, 0 }
 0xb17   :  { %v919_v62 = vpop.xlane.xlu0 %918 }
 0xb18   :  { %v920_v63 = vsub.f32 %v916_v59, %v919_v62 }
 0xb1a   :  { %v921_v0 = vmul.f32 1.442695, %v920_v63 }
 0xb1c   :  { %2636 = vpow2.f32 %v921_v0 }
 0xb29   :  { %v2637_v1 = vpop.eup %2636 }
 0xb2a   :  { %v923_v2 = vsel %vm215_vm2, %v2637_v1, 0.0 }
 0xb2b   :  { %924 = vadd.xlane.f32.xlu1 %v923_v2 }
 0xbb4   :  { %v925_v21 = vpop.xlane.xlu1 %924 }
 0xbb5   :  { %2638 = vrcp.f32 %v925_v21  ;;  %v1720_v21 = vld [vmem:[%s3610_s1 + $0x390] sm:$0xff] }
 0xbc2   :  { %v2639_v22 = vpop.eup %2638 }
 0xbc3   :  { %v927_v23 = vmul.f32 %v2639_v22, %v2637_v1  ;;  %v1719_v22 = vld [vmem:[%s3610_s1 + $0x388] sm:$0xff] }
 0xbc5   :  { %928 = vst [vmem:[%s3613_s6 + $0x4] sm:$0x1] %v927_v23  ;;  %2371 = vmatmul.mubr.f32.vlgmr.msra.gmra.mxu0 %v927_v23  ;;  %v1718_v23 = vld [vmem:[%s3610_s1 + $0x380] sm:$0xff] }
 0xbc6   :  { %2374 = vmatpush3.xpose.msra.mxu0 %v1701_v4  ;;  %2405 = vmatprep.mubr.msk.f32.mxu0 %vm2655_vm0, %v2654_v3 }
 0xbc7   :  { %2375 = vmatprep.subr.mxu0 %v2654_v3 }
 0xbca   :  { %2376 = vmatpush3.xpose.msra.mxu0 %v1700_v5 }
 0xbcb   :  { %2377 = vmatprep.subr.mxu0 %v2654_v3 }
 0xbce   :  { %2378 = vmatpush3.xpose.msra.mxu0 %v1699_v6 }
 0xbcf   :  { %2379 = vmatprep.subr.mxu0 %v2654_v3 }
 0xbd2   :  { %2380 = vmatpush3.xpose.msra.mxu0 %v1698_v7  ;;  %v1733_v7 = vld [vmem:[%s3610_s1 + $0x3f8] sm:$0xff] }
 0xbd3   :  { %2381 = vmatprep.subr.mxu0 %v2654_v3 }
 0xbd6   :  { %2382 = vmatpush3.xpose.msra.mxu0 %v1697_v8  ;;  %v1732_v8 = vld [vmem:[%s3610_s1 + $0x3f0] sm:$0xff] }
 0xbd7   :  { %2383 = vmatprep.subr.mxu0 %v2654_v3 }
 0xbda   :  { %2384 = vmatpush3.xpose.msra.mxu0 %v1696_v9  ;;  %v1731_v9 = vld [vmem:[%s3610_s1 + $0x3e8] sm:$0xff] }
 0xbdb   :  { %2385 = vmatprep.subr.mxu0 %v2654_v3 }
 0xbde   :  { %2386 = vmatpush3.xpose.msra.mxu0 %v1695_v10  ;;  %v1730_v10 = vld [vmem:[%s3610_s1 + $0x3e0] sm:$0xff] }
 0xbdf   :  { %2387 = vmatprep.subr.mxu0 %v2654_v3 }
 0xbe2   :  { %2388 = vmatpush3.xpose.msra.mxu0 %v1694_v11  ;;  %v1729_v11 = vld [vmem:[%s3610_s1 + $0x3d8] sm:$0xff] }
 0xbe3   :  { %2389 = vmatprep.subr.mxu0 %v2654_v3 }
 0xbe6   :  { %2390 = vmatpush3.xpose.msra.mxu0 %v1693_v12  ;;  %v1728_v12 = vld [vmem:[%s3610_s1 + $0x3d0] sm:$0xff] }
 0xbe7   :  { %2391 = vmatprep.subr.mxu0 %v2654_v3 }
 0xbea   :  { %2392 = vmatpush3.xpose.msra.mxu0 %v1692_v13  ;;  %v1727_v13 = vld [vmem:[%s3610_s1 + $0x3c8] sm:$0xff] }
 0xbeb   :  { %2393 = vmatprep.subr.mxu0 %v2654_v3 }
 0xbee   :  { %2394 = vmatpush3.xpose.msra.mxu0 %v1691_v14  ;;  %v1726_v14 = vld [vmem:[%s3610_s1 + $0x3c0] sm:$0xff] }
 0xbef   :  { %2395 = vmatprep.subr.mxu0 %v2654_v3 }
 0xbf2   :  { %2396 = vmatpush3.xpose.msra.mxu0 %v1690_v15  ;;  %v1725_v15 = vld [vmem:[%s3610_s1 + $0x3b8] sm:$0xff] }
 0xbf3   :  { %2397 = vmatprep.subr.mxu0 %v2654_v3 }
 0xbf6   :  { %2398 = vmatpush3.xpose.msra.mxu0 %v1689_v16  ;;  %v1724_v16 = vld [vmem:[%s3610_s1 + $0x3b0] sm:$0xff] }
 0xbf7   :  { %2399 = vmatprep.subr.mxu0 %v2654_v3 }
 0xbfa   :  { %2400 = vmatpush3.xpose.msra.mxu0 %v1688_v17  ;;  %v1723_v17 = vld [vmem:[%s3610_s1 + $0x3a8] sm:$0xff] }
 0xbfb   :  { %2401 = vmatprep.subr.mxu0 %v2654_v3 }
 0xbfe   :  { %2402 = vmatpush3.xpose.msra.mxu0 %v1687_v19  ;;  %v1722_v19 = vld [vmem:[%s3610_s1 + $0x3a0] sm:$0xff] }
 0xbff   :  { %2403 = vmatprep.subr.mxu0 %v2654_v3 }
 0xc02   :  { %2404 = vmatpush3.xpose.msra.mxu0 %v1686_v20  ;;  %v1721_v20 = vld [vmem:[%s3610_s1 + $0x398] sm:$0xff] }
 0xc03   :  { %2478 = vmatprep.subr.mxu0 %v2654_v3 }
 0xc05   :  { %2406 = vmatmul.mubr.f32.vlgmr.msra.gmra.mxu0 %v1017_v24 }
 0xc06   :  { %2510 = vmatprep.mubr.msk.f32.mxu0 %vm2655_vm0, %v2654_v3  ;;  %2479 = vmatpush3.msra.mxu0 %v1717_v37 }
 0xc07   :  { %2480 = vmatprep.subr.mxu0 %v2654_v3 }
 0xc08   :  { %2481 = vmatpush3.msra.mxu0 %v1716_v38 }
 0xc09   :  { %2482 = vmatprep.subr.mxu0 %v2654_v3 }
 0xc0a   :  { %2483 = vmatpush3.msra.mxu0 %v1715_v39 }
 0xc0b   :  { %2484 = vmatprep.subr.mxu0 %v2654_v3 }
 0xc0c   :  { %2485 = vmatpush3.msra.mxu0 %v1714_v40 }
 0xc0d   :  { %2486 = vmatprep.subr.mxu0 %v2654_v3 }
 0xc0e   :  { %2487 = vmatpush3.msra.mxu0 %v1713_v41 }
 0xc0f   :  { %2488 = vmatprep.subr.mxu0 %v2654_v3 }
 0xc10   :  { %2489 = vmatpush3.msra.mxu0 %v1712_v42 }
 0xc11   :  { %2490 = vmatprep.subr.mxu0 %v2654_v3 }
 0xc12   :  { %2491 = vmatpush3.msra.mxu0 %v1711_v43 }
 0xc13   :  { %2492 = vmatprep.subr.mxu0 %v2654_v3 }
 0xc14   :  { %2493 = vmatpush3.msra.mxu0 %v1710_v44 }
 0xc15   :  { %2494 = vmatprep.subr.mxu0 %v2654_v3 }
 0xc16   :  { %2495 = vmatpush3.msra.mxu0 %v1709_v45 }
 0xc17   :  { %2496 = vmatprep.subr.mxu0 %v2654_v3 }
 0xc18   :  { %2497 = vmatpush3.msra.mxu0 %v1708_v46 }
 0xc19   :  { %2498 = vmatprep.subr.mxu0 %v2654_v3 }
 0xc1a   :  { %2499 = vmatpush3.msra.mxu0 %v1707_v47 }
 0xc1b   :  { %2500 = vmatprep.subr.mxu0 %v2654_v3 }
 0xc1c   :  { %2501 = vmatpush3.msra.mxu0 %v1706_v48 }
 0xc1d   :  { %2502 = vmatprep.subr.mxu0 %v2654_v3 }
 0xc1e   :  { %2503 = vmatpush3.msra.mxu0 %v1705_v49 }
 0xc1f   :  { %2504 = vmatprep.subr.mxu0 %v2654_v3 }
 0xc20   :  { %2505 = vmatpush3.msra.mxu0 %v1704_v51 }
 0xc21   :  { %2506 = vmatprep.subr.mxu0 %v2654_v3 }
 0xc22   :  { %2507 = vmatpush3.msra.mxu0 %v1703_v52 }
 0xc23   :  { %2508 = vmatprep.subr.mxu0 %v2654_v3 }
 0xc24   :  { %2509 = vmatpush3.msra.mxu0 %v1702_v53 }
 0xc25   :  { %2513 = vmatprep.subr.mxu0 %v2654_v3 }
 0xc85   :  { %v995_v25 = vpop.f32.mrf.mxu0 }
 0xc86   :  { %999 = vst [vmem:[#allocation2 + $0x4] sm:$0x1] %v995_v25 }
 0xc87   :  { %v2372_v26 = vpop.f32.mrf.mxu0 }
 0xcc5   :  { %v1085_v28 = vpop.f32.mrf.mxu0 }
 0xcc6   :  { %v1091_v29 = vsel %vm1090_vm7, -1e+30, %v1085_v28 }
 0xcc7   :  { %v2407_v30 = vpop.f32.mrf.mxu0  ;;  %v1092_v31 = vsel %vm215_vm2, %v1091_v29, -inf }
 0xcc8   :  { %1093 = vmax.xlane.f32.xlu0 %v1092_v31  ;;  %v1439_v30 = vld [vmem:[%s3612_s2 + $0x7] sm:$0x1] }
 0xcc9   :  { %vm1440_vm9 = vcmp.ne.s32.totalorder %v1439_v30, 0 }
 0xd51   :  { %v1094_v32 = vpop.xlane.xlu0 %1093 }
 0xd52   :  { %v1095_v33 = vsub.f32 %v1091_v29, %v1094_v32 }
 0xd54   :  { %v1096_v34 = vmul.f32 1.442695, %v1095_v33 }
 0xd56   :  { %2640 = vpow2.f32 %v1096_v34 }
 0xd63   :  { %v2641_v35 = vpop.eup %2640 }
 0xd64   :  { %v1098_v36 = vsel %vm215_vm2, %v2641_v35, 0.0 }
 0xd65   :  { %1099 = vadd.xlane.f32.xlu1 %v1098_v36 }
 0xdee   :  { %v1100_v54 = vpop.xlane.xlu1 %1099 }
 0xdef   :  { %2642 = vrcp.f32 %v1100_v54  ;;  %v1530_v54 = vld [vmem:[%s3614_s4 + $0x20] sm:$0xff] }
 0xdfc   :  { %v2643_v55 = vpop.eup %2642 }
 0xdfd   :  { %v1102_v56 = vmul.f32 %v2643_v55, %v2641_v35  ;;  %v1529_v55 = vld [vmem:[%s3614_s4 + $0x18] sm:$0xff] }
 0xdff   :  { %1103 = vst [vmem:[%s3613_s6 + $0x5] sm:$0x1] %v1102_v56  ;;  %2441 = vmatmul.mubr.f32.vlgmr.msra.gmra.mxu1 %v1102_v56  ;;  %v1528_v56 = vld [vmem:[%s3614_s4 + $0x10] sm:$0xff] }
 0xe00   :  { %2444 = vmatpush3.xpose.msra.mxu1 %v1717_v37  ;;  %2475 = vmatprep.mubr.msk.f32.mxu1 %vm2655_vm0, %v2654_v3 }
 0xe01   :  { %2445 = vmatprep.subr.mxu1 %v2654_v3 }
 0xe04   :  { %2446 = vmatpush3.xpose.msra.mxu1 %v1716_v38 }
 0xe05   :  { %2447 = vmatprep.subr.mxu1 %v2654_v3 }
 0xe08   :  { %2448 = vmatpush3.xpose.msra.mxu1 %v1715_v39 }
 0xe09   :  { %2449 = vmatprep.subr.mxu1 %v2654_v3 }
 0xe0c   :  { %2450 = vmatpush3.xpose.msra.mxu1 %v1714_v40 }
 0xe0d   :  { %2451 = vmatprep.subr.mxu1 %v2654_v3 }
 0xe10   :  { %2452 = vmatpush3.xpose.msra.mxu1 %v1713_v41 }
 0xe11   :  { %2453 = vmatprep.subr.mxu1 %v2654_v3 }
 0xe14   :  { %2454 = vmatpush3.xpose.msra.mxu1 %v1712_v42  ;;  %v1541_v42 = vld [vmem:[%s3614_s4 + $0x78] sm:$0xff] }
 0xe15   :  { %2455 = vmatprep.subr.mxu1 %v2654_v3 }
 0xe18   :  { %2456 = vmatpush3.xpose.msra.mxu1 %v1711_v43  ;;  %v1540_v43 = vld [vmem:[%s3614_s4 + $0x70] sm:$0xff] }
 0xe19   :  { %2457 = vmatprep.subr.mxu1 %v2654_v3 }
 0xe1c   :  { %2458 = vmatpush3.xpose.msra.mxu1 %v1710_v44  ;;  %v1539_v44 = vld [vmem:[%s3614_s4 + $0x68] sm:$0xff] }
 0xe1d   :  { %2459 = vmatprep.subr.mxu1 %v2654_v3 }
 0xe20   :  { %2460 = vmatpush3.xpose.msra.mxu1 %v1709_v45  ;;  %v1538_v45 = vld [vmem:[%s3614_s4 + $0x60] sm:$0xff] }
 0xe21   :  { %2461 = vmatprep.subr.mxu1 %v2654_v3 }
 0xe24   :  { %2462 = vmatpush3.xpose.msra.mxu1 %v1708_v46  ;;  %v1537_v46 = vld [vmem:[%s3614_s4 + $0x58] sm:$0xff] }
 0xe25   :  { %2463 = vmatprep.subr.mxu1 %v2654_v3 }
 0xe28   :  { %2464 = vmatpush3.xpose.msra.mxu1 %v1707_v47  ;;  %v1536_v47 = vld [vmem:[%s3614_s4 + $0x50] sm:$0xff] }
 0xe29   :  { %2465 = vmatprep.subr.mxu1 %v2654_v3 }
 0xe2c   :  { %2466 = vmatpush3.xpose.msra.mxu1 %v1706_v48  ;;  %v1535_v48 = vld [vmem:[%s3614_s4 + $0x48] sm:$0xff] }
 0xe2d   :  { %2467 = vmatprep.subr.mxu1 %v2654_v3 }
 0xe30   :  { %2468 = vmatpush3.xpose.msra.mxu1 %v1705_v49  ;;  %v1534_v49 = vld [vmem:[%s3614_s4 + $0x40] sm:$0xff] }
 0xe31   :  { %2469 = vmatprep.subr.mxu1 %v2654_v3 }
 0xe34   :  { %2470 = vmatpush3.xpose.msra.mxu1 %v1704_v51  ;;  %v1533_v51 = vld [vmem:[%s3614_s4 + $0x38] sm:$0xff] }
 0xe35   :  { %2471 = vmatprep.subr.mxu1 %v2654_v3 }
 0xe38   :  { %2472 = vmatpush3.xpose.msra.mxu1 %v1703_v52  ;;  %v1532_v52 = vld [vmem:[%s3614_s4 + $0x30] sm:$0xff] }
 0xe39   :  { %2473 = vmatprep.subr.mxu1 %v2654_v3 }
 0xe3c   :  { %2474 = vmatpush3.xpose.msra.mxu1 %v1702_v53  ;;  %v1531_v53 = vld [vmem:[%s3614_s4 + $0x28] sm:$0xff] }
 0xe3d   :  { %2548 = vmatprep.subr.mxu1 %v2654_v3 }
 0xe3f   :  { %2476 = vmatmul.mubr.f32.vlgmr.msra.gmra.mxu1 %v1192_v57  ;;  %v1527_v57 = vld [vmem:[%s3614_s4 + $0x8] sm:$0xff] }
 0xe40   :  { %2580 = vmatprep.mubr.msk.f32.mxu1 %vm2655_vm0, %v2654_v3  ;;  %2549 = vmatpush3.msra.mxu1 %v1733_v7 }
 0xe41   :  { %2550 = vmatprep.subr.mxu1 %v2654_v3 }
 0xe42   :  { %2551 = vmatpush3.msra.mxu1 %v1732_v8 }
 0xe43   :  { %2552 = vmatprep.subr.mxu1 %v2654_v3 }
 0xe44   :  { %2553 = vmatpush3.msra.mxu1 %v1731_v9 }
 0xe45   :  { %2554 = vmatprep.subr.mxu1 %v2654_v3 }
 0xe46   :  { %2555 = vmatpush3.msra.mxu1 %v1730_v10 }
 0xe47   :  { %2556 = vmatprep.subr.mxu1 %v2654_v3 }
 0xe48   :  { %2557 = vmatpush3.msra.mxu1 %v1729_v11 }
 0xe49   :  { %2558 = vmatprep.subr.mxu1 %v2654_v3 }
 0xe4a   :  { %2559 = vmatpush3.msra.mxu1 %v1728_v12 }
 0xe4b   :  { %2560 = vmatprep.subr.mxu1 %v2654_v3 }
 0xe4c   :  { %2561 = vmatpush3.msra.mxu1 %v1727_v13 }
 0xe4d   :  { %2562 = vmatprep.subr.mxu1 %v2654_v3 }
 0xe4e   :  { %2563 = vmatpush3.msra.mxu1 %v1726_v14 }
 0xe4f   :  { %2564 = vmatprep.subr.mxu1 %v2654_v3 }
 0xe50   :  { %2565 = vmatpush3.msra.mxu1 %v1725_v15 }
 0xe51   :  { %2566 = vmatprep.subr.mxu1 %v2654_v3 }
 0xe52   :  { %2567 = vmatpush3.msra.mxu1 %v1724_v16 }
 0xe53   :  { %2568 = vmatprep.subr.mxu1 %v2654_v3 }
 0xe54   :  { %2569 = vmatpush3.msra.mxu1 %v1723_v17 }
 0xe55   :  { %2570 = vmatprep.subr.mxu1 %v2654_v3 }
 0xe56   :  { %2571 = vmatpush3.msra.mxu1 %v1722_v19 }
 0xe57   :  { %2572 = vmatprep.subr.mxu1 %v2654_v3 }
 0xe58   :  { %2573 = vmatpush3.msra.mxu1 %v1721_v20 }
 0xe59   :  { %2574 = vmatprep.subr.mxu1 %v2654_v3 }
 0xe5a   :  { %2575 = vmatpush3.msra.mxu1 %v1720_v21 }
 0xe5b   :  { %2576 = vmatprep.subr.mxu1 %v2654_v3 }
 0xe5c   :  { %2577 = vmatpush3.msra.mxu1 %v1719_v22 }
 0xe5d   :  { %2578 = vmatprep.subr.mxu1 %v2654_v3 }
 0xe5e   :  { %2579 = vmatpush3.msra.mxu1 %v1718_v23 }
 0xe5f   :  { %2583 = vmatprep.subr.mxu1 %v2654_v3 }
 0xebf   :  { %v1170_v58 = vpop.f32.mrf.mxu1 }
 0xec0   :  { %1174 = vst [vmem:[#allocation2 + $0x5] sm:$0x1] %v1170_v58  ;;  %v1526_v58 = vld [vmem:[%s3614_s4] sm:$0xff] }
 0xec1   :  { %v2442_v59 = vpop.f32.mrf.mxu1 }
 0xeff   :  { %v1260_v61 = vpop.f32.mrf.mxu1 }
 0xf00   :  { %v1266_v62 = vsel %vm1265_vm8, -1e+30, %v1260_v61 }
 0xf01   :  { %v2477_v63 = vpop.f32.mrf.mxu1  ;;  %v1267_v0 = vsel %vm215_vm2, %v1266_v62, -inf }
 0xf02   :  { %1268 = vmax.xlane.f32.xlu0 %v1267_v0 }
 0xf8b   :  { %v1269_v1 = vpop.xlane.xlu0 %1268 }
 0xf8c   :  { %v1270_v2 = vsub.f32 %v1266_v62, %v1269_v1 }
 0xf8e   :  { %v1271_v4 = vmul.f32 1.442695, %v1270_v2 }
 0xf90   :  { %2644 = vpow2.f32 %v1271_v4 }
 0xf9d   :  { %v2645_v5 = vpop.eup %2644 }
 0xf9e   :  { %v1273_v6 = vsel %vm215_vm2, %v2645_v5, 0.0 }
 0xf9f   :  { %1274 = vadd.xlane.f32.xlu1 %v1273_v6 }
0x1028   :  { %v1275_v24 = vpop.xlane.xlu1 %1274 }
0x1029   :  { %2646 = vrcp.f32 %v1275_v24 }
0x1036   :  { %v2647_v25 = vpop.eup %2646 }
0x1037   :  { %v1277_v26 = vmul.f32 %v2647_v25, %v2645_v5 }
0x1039   :  { %1278 = vst [vmem:[%s3613_s6 + $0x6] sm:$0x1] %v1277_v26  ;;  %2511 = vmatmul.mubr.f32.vlgmr.msra.gmra.mxu0 %v1277_v26 }
0x103a   :  { %2514 = vmatpush3.xpose.msra.mxu0 %v1733_v7  ;;  %2545 = vmatprep.mubr.msk.f32.mxu0 %vm2655_vm0, %v2654_v3 }
0x103b   :  { %2515 = vmatprep.subr.mxu0 %v2654_v3 }
0x103e   :  { %2516 = vmatpush3.xpose.msra.mxu0 %v1732_v8 }
0x103f   :  { %2517 = vmatprep.subr.mxu0 %v2654_v3 }
0x1042   :  { %2518 = vmatpush3.xpose.msra.mxu0 %v1731_v9 }
0x1043   :  { %2519 = vmatprep.subr.mxu0 %v2654_v3 }
0x1046   :  { %2520 = vmatpush3.xpose.msra.mxu0 %v1730_v10 }
0x1047   :  { %2521 = vmatprep.subr.mxu0 %v2654_v3 }
0x104a   :  { %2522 = vmatpush3.xpose.msra.mxu0 %v1729_v11 }
0x104b   :  { %2523 = vmatprep.subr.mxu0 %v2654_v3 }
0x104e   :  { %2524 = vmatpush3.xpose.msra.mxu0 %v1728_v12 }
0x104f   :  { %2525 = vmatprep.subr.mxu0 %v2654_v3 }
0x1052   :  { %2526 = vmatpush3.xpose.msra.mxu0 %v1727_v13 }
0x1053   :  { %2527 = vmatprep.subr.mxu0 %v2654_v3 }
0x1056   :  { %2528 = vmatpush3.xpose.msra.mxu0 %v1726_v14 }
0x1057   :  { %2529 = vmatprep.subr.mxu0 %v2654_v3 }
0x105a   :  { %2530 = vmatpush3.xpose.msra.mxu0 %v1725_v15 }
0x105b   :  { %2531 = vmatprep.subr.mxu0 %v2654_v3 }
0x105e   :  { %2532 = vmatpush3.xpose.msra.mxu0 %v1724_v16 }
0x105f   :  { %2533 = vmatprep.subr.mxu0 %v2654_v3 }
0x1062   :  { %2534 = vmatpush3.xpose.msra.mxu0 %v1723_v17 }
0x1063   :  { %2535 = vmatprep.subr.mxu0 %v2654_v3 }
0x1066   :  { %2536 = vmatpush3.xpose.msra.mxu0 %v1722_v19 }
0x1067   :  { %2537 = vmatprep.subr.mxu0 %v2654_v3 }
0x106a   :  { %2538 = vmatpush3.xpose.msra.mxu0 %v1721_v20 }
0x106b   :  { %2539 = vmatprep.subr.mxu0 %v2654_v3 }
0x106e   :  { %2540 = vmatpush3.xpose.msra.mxu0 %v1720_v21 }
0x106f   :  { %2541 = vmatprep.subr.mxu0 %v2654_v3 }
0x1072   :  { %2542 = vmatpush3.xpose.msra.mxu0 %v1719_v22 }
0x1073   :  { %2543 = vmatprep.subr.mxu0 %v2654_v3 }
0x1076   :  { %2544 = vmatpush3.xpose.msra.mxu0 %v1718_v23 }
0x1079   :  { %2546 = vmatmul.mubr.f32.vlgmr.msra.gmra.mxu0 %v1367_v27 }
0x10f9   :  { %v1345_v28 = vpop.f32.mrf.mxu0 }
0x10fa   :  { %1349 = vst [vmem:[#allocation2 + $0x6] sm:$0x1] %v1345_v28 }
0x10fb   :  { %v2512_v29 = vpop.f32.mrf.mxu0 }
0x1139   :  { %v1435_v31 = vpop.f32.mrf.mxu0 }
0x113a   :  { %v1441_v32 = vsel %vm1440_vm9, -1e+30, %v1435_v31 }
0x113b   :  { %v2547_v33 = vpop.f32.mrf.mxu0  ;;  %v1442_v34 = vsel %vm215_vm2, %v1441_v32, -inf }
0x113c   :  { %1443 = vmax.xlane.f32.xlu0 %v1442_v34 }
0x11c5   :  { %v1444_v35 = vpop.xlane.xlu0 %1443 }
0x11c6   :  { %v1445_v36 = vsub.f32 %v1441_v32, %v1444_v35 }
0x11c8   :  { %v1446_v37 = vmul.f32 1.442695, %v1445_v36 }
0x11ca   :  { %2648 = vpow2.f32 %v1446_v37 }
0x11d7   :  { %v2649_v50 = vpop.eup %2648 }
0x11d8   :  { %v1448_v38 = vsel %vm215_vm2, %v2649_v50, 0.0 }
0x11d9   :  { %1449 = vadd.xlane.f32.xlu1 %v1448_v38 }
0x1262   :  { %v1450_v39 = vpop.xlane.xlu1 %1449 }
0x1263   :  { %2650 = vrcp.f32 %v1450_v39 }
0x1270   :  { %v2651_v40 = vpop.eup %2650 }
0x1271   :  { %v1452_v41 = vmul.f32 %v2651_v40, %v2649_v50 }
0x1273   :  { %1453 = vst [vmem:[%s3613_s6 + $0x7] sm:$0x1] %v1452_v41  ;;  %2581 = vmatmul.mubr.f32.vlgmr.msra.gmra.mxu1 %v1452_v41 }
0x1274   :  { %2584 = vmatpush3.msra.mxu1 %v1541_v42  ;;  %2615 = vmatprep.mubr.msk.f32.mxu1 %vm2655_vm0, %v2654_v3 }
0x1275   :  { %2585 = vmatprep.subr.mxu1 %v2654_v3 }
0x1276   :  { %2586 = vmatpush3.msra.mxu1 %v1540_v43 }
0x1277   :  { %2587 = vmatprep.subr.mxu1 %v2654_v3 }
0x1278   :  { %2588 = vmatpush3.msra.mxu1 %v1539_v44 }
0x1279   :  { %2589 = vmatprep.subr.mxu1 %v2654_v3 }
0x127a   :  { %2590 = vmatpush3.msra.mxu1 %v1538_v45 }
0x127b   :  { %2591 = vmatprep.subr.mxu1 %v2654_v3 }
0x127c   :  { %2592 = vmatpush3.msra.mxu1 %v1537_v46 }
0x127d   :  { %2593 = vmatprep.subr.mxu1 %v2654_v3 }
0x127e   :  { %2594 = vmatpush3.msra.mxu1 %v1536_v47 }
0x127f   :  { %2595 = vmatprep.subr.mxu1 %v2654_v3 }
0x1280   :  { %2596 = vmatpush3.msra.mxu1 %v1535_v48 }
0x1281   :  { %2597 = vmatprep.subr.mxu1 %v2654_v3 }
0x1282   :  { %2598 = vmatpush3.msra.mxu1 %v1534_v49 }
0x1283   :  { %2599 = vmatprep.subr.mxu1 %v2654_v3 }
0x1284   :  { %2600 = vmatpush3.msra.mxu1 %v1533_v51 }
0x1285   :  { %2601 = vmatprep.subr.mxu1 %v2654_v3 }
0x1286   :  { %2602 = vmatpush3.msra.mxu1 %v1532_v52 }
0x1287   :  { %2603 = vmatprep.subr.mxu1 %v2654_v3 }
0x1288   :  { %2604 = vmatpush3.msra.mxu1 %v1531_v53 }
0x1289   :  { %2605 = vmatprep.subr.mxu1 %v2654_v3 }
0x128a   :  { %2606 = vmatpush3.msra.mxu1 %v1530_v54 }
0x128b   :  { %2607 = vmatprep.subr.mxu1 %v2654_v3 }
0x128c   :  { %2608 = vmatpush3.msra.mxu1 %v1529_v55 }
0x128d   :  { %2609 = vmatprep.subr.mxu1 %v2654_v3 }
0x128e   :  { %2610 = vmatpush3.msra.mxu1 %v1528_v56 }
0x128f   :  { %2611 = vmatprep.subr.mxu1 %v2654_v3 }
0x1290   :  { %2612 = vmatpush3.msra.mxu1 %v1527_v57 }
0x1291   :  { %2613 = vmatprep.subr.mxu1 %v2654_v3 }
0x1292   :  { %2614 = vmatpush3.msra.mxu1 %v1526_v58 }
0x1333   :  { %v1520_v59 = vpop.f32.mrf.mxu1 }
0x1334   :  { %1524 = vst [vmem:[#allocation2 + $0x7] sm:$0x1] %v1520_v59 }
0x1335   :  { %v2582_v60 = vpop.f32.mrf.mxu1 }
0x133b   :  { %v1525_v61 = vld [vmem:[#allocation2] sm:$0xff] }
0x133c   :  { %2616 = vmatmul.mubr.f32.vlgmr.msra.gmra.mxu1 %v1525_v61 }
0x13fc   :  { %v1608_v62 = vpop.f32.mrf.mxu1 }
0x13fd   :  { %v1609_v63 = vadd.f32 %v1608_v62, %v2975_v18 }
0x13fe   :  { %v2617_v0 = vpop.f32.mrf.mxu1 }
0x13ff   :  { %2652 = vtanh.f32 %v1609_v63 }
0x140c   :  { %v2653_v1 = vpop.eup %2652 }
0x140d   :  { %1613 = vst [vmem:[%s3615_s5] sm:$0xff] %v2653_v1 }

</bundles_post_ra>
